<compile_context>
chip_gen: v6e
topology: v6e:2x2x1
jax: 0.10.0
libtpu: 0.0.40
codegen_flags: <defaults>
</compile_context>

<pallas_src>
import functools

import jax
import jax.numpy as jnp
from jax.experimental import pallas as pl
from jax.experimental.pallas import tpu as pltpu


# ---------------------------------------------------------------------------
# Fused kernel: L-chunked im2col conv (all 3 branches in one matmul) + bias +
# ReLU + running-max pool over time + MLP head.
# ---------------------------------------------------------------------------
def fused_cnn_kernel(x_ref, wc_ref, bc_ref,
                     w1_ref, b1_ref, w2_ref, b2_ref, w3_ref, b3_ref,
                     o_ref, *, k_sizes, seq_len, c_pad, l_chunk, pool_bf16):
    k_min, k_max = min(k_sizes), max(k_sizes)
    halo = k_max - k_min
    L_common = seq_len - k_max + 1          # output rows valid for EVERY branch
    CT = wc_ref.shape[1]                    # 3 * c_pad (lane-dense)
    TB = x_ref.shape[0]
    Lc = l_chunk                            # static chunk size, <= L_common
    n_chunks = -(-L_common // Lc)
    pool_dt = jnp.bfloat16 if pool_bf16 else jnp.float32

    wc = wc_ref[...]                        # (k_max*D, CT) bf16 — resident
    bc = bc_ref[...][None, :, :]            # (1, 1, CT) f32 — hoisted broadcast

    def conv_chunk(r0, rows):
        # Fused-K im2col conv for output rows [r0, r0+rows): the k_max shifted
        # views are concatenated only for this chunk (bounded VMEM); one MXU
        # matmul covers all three branches (zero weight rows for unused shifts).
        xw = x_ref[:, pl.ds(r0, rows + k_max - 1), :]          # (TB, rows+k_max-1, D)
        xcat = jnp.concatenate([xw[:, j:j + rows, :] for j in range(k_max)],
                               axis=-1)                        # (TB, rows, k_max*D)
        y = jax.lax.dot_general(xcat, wc,
                                dimension_numbers=(((2,), (0,)), ((), ())),
                                preferred_element_type=jnp.float32)  # (TB, rows, CT)
        y = jnp.maximum(y + bc, 0.0)                           # bias + ReLU (f32 VPU)
        return y.astype(pool_dt)            # bf16 pooling on v6e/v7x, f32 on v5e

    # ---- running max over the rows where every branch is valid --------------
    if n_chunks == 1:                       # toy / short-L path: fully static
        feat = jnp.max(conv_chunk(0, Lc), axis=1)              # (TB, CT)
    else:
        def body(i, acc):
            # Last chunk is shifted back to stay full-size; overlap is harmless
            # because max is idempotent.
            r0 = jnp.minimum(i * Lc, L_common - Lc)
            return jnp.maximum(acc, jnp.max(conv_chunk(r0, Lc), axis=1))
        feat = jax.lax.fori_loop(0, n_chunks, body,
                                 jnp.zeros((TB, CT), pool_dt))

    # ---- tail rows: branches with kernel < k_max have a few extra valid rows.
    # Static per-branch lane slices (multiples of c_pad=256) — no iota/where.
    if halo > 0:
        y_tail = conv_chunk(L_common, halo)                    # (TB, halo, CT)
        parts = []
        for b, kb in enumerate(k_sizes):
            fb = feat[:, b * c_pad:(b + 1) * c_pad]
            nb = k_max - kb                 # extra valid output rows for this branch
            if nb > 0:
                fb = jnp.maximum(
                    fb, jnp.max(y_tail[:, :nb, b * c_pad:(b + 1) * c_pad], axis=1))
            parts.append(fb)
        feat = jnp.concatenate(parts, axis=-1)                 # (TB, CT)

    # TODO(synk): Dropout(0.5) is identity (inference / eval mode).

    # ---- fused MLP head: fc1 -> ReLU -> fc2 -> ReLU -> fc3 (bf16 in, f32 acc)
    h = jnp.dot(feat.astype(jnp.bfloat16), w1_ref[...],
                preferred_element_type=jnp.float32) + b1_ref[...]
    h = jnp.maximum(h, 0.0)
    h = jnp.dot(h.astype(jnp.bfloat16), w2_ref[...],
                preferred_element_type=jnp.float32) + b2_ref[...]
    h = jnp.maximum(h, 0.0)
    o_ref[...] = jnp.dot(h.astype(jnp.bfloat16), w3_ref[...],
                         preferred_element_type=jnp.float32) + b3_ref[...]


# ---------------------------------------------------------------------------
# Parameter packing: PyTorch-style params -> lane-dense, bf16, im2col layout.
# ---------------------------------------------------------------------------
def pack_params(params, k_sizes=(3, 4, 5), c_pad=256, n_out_pad=128):
    D = params["embed"].shape[1]
    C = params["b_c1"].shape[-1]                # 200
    k_max = max(k_sizes)
    n_br = len(k_sizes)

    conv_ws = [params["w_c1"], params["w_c2"], params["w_c3"]]
    conv_bs = [params["b_c1"], params["b_c2"], params["b_c3"]]

    # Block-packed conv weight: (k_max*D, n_br*c_pad); unused shift rows and
    # padded filter columns are zero.
    wc = jnp.zeros((k_max * D, n_br * c_pad), jnp.float32)
    bc = jnp.zeros((1, n_br * c_pad), jnp.float32)
    for b, (K, w, bias) in enumerate(zip(k_sizes, conv_ws, conv_bs)):
        wc = wc.at[:K * D, b * c_pad:b * c_pad + C].set(w.reshape(K * D, C))
        bc = bc.at[:, b * c_pad:b * c_pad + C].set(bias)

    # fc1 rows re-ordered to the padded feat layout [b*c_pad + c].
    w1 = params["w1"]                           # (n_br*C, 256)
    w1_p = jnp.zeros((n_br * c_pad, w1.shape[1]), jnp.float32)
    for b in range(n_br):
        w1_p = w1_p.at[b * c_pad:b * c_pad + C, :].set(w1[b * C:(b + 1) * C, :])

    # fc3 output padded 2 -> n_out_pad lanes.
    w3 = params["w3"]
    w3_p = jnp.pad(w3, ((0, 0), (0, n_out_pad - w3.shape[1])))
    b3_p = jnp.pad(params["b3"], ((0, 0), (0, n_out_pad - params["b3"].shape[1])))

    return {
        "embed": params["embed"].astype(jnp.bfloat16),
        "wc": wc.astype(jnp.bfloat16), "bc": bc,
        "w1": w1_p.astype(jnp.bfloat16), "b1": params["b1"].astype(jnp.float32),
        "w2": params["w2"].astype(jnp.bfloat16), "b2": params["b2"].astype(jnp.float32),
        "w3": w3_p.astype(jnp.bfloat16), "b3": b3_p.astype(jnp.float32),
        "k_sizes": tuple(int(k) for k in k_sizes),
        "c_pad": int(c_pad),
        "n_out": int(w3.shape[1]),
    }


# ---------------------------------------------------------------------------
# Per-generation tuning + tile selection.
# ---------------------------------------------------------------------------
def _round_up(x, m):
    return -(-x // m) * m


def _device_tuning():
    try:
        kind = jax.devices()[0].device_kind.lower()
    except Exception:
        kind = ""
    is_v7 = "v7" in kind
    if is_v7:
        vmem_limit = 48 * 1024 * 1024        # 64 MiB physical per TC on v7x
    elif kind:
        vmem_limit = 100 * 1024 * 1024       # 128 MiB physical on v5e/v6e
    else:
        vmem_limit = 64 * 1024 * 1024        # unknown: be conservative
    pool_bf16 = ("v6" in kind) or is_v7      # bf16 VPU only on v6e / v7x
    return vmem_limit, pool_bf16, is_v7


def _choose_tiles(B, L, D, CT, k_max, halo, n_pad, batch_tile, l_chunk, vmem_limit):
    """Pick (TB, Lc) so the per-step working set fits comfortably in VMEM."""
    L_common = L - k_max + 1
    lc = max(1, min(l_chunk, L_common))
    tb = max(8, min(_round_up(batch_tile, 8), _round_up(B, 8)))
    resident = 2 * 1024 * 1024               # resident weights + slack

    def est(tb_, lc_):
        x_blk = 2 * tb_ * (L + halo) * D * 2           # double-buffered bf16 input
        conv = tb_ * lc_ * CT * (4 + 2)                # f32 conv chunk + pooled copy
        xcat = tb_ * lc_ * k_max * D * 2               # per-chunk im2col
        o_blk = 2 * tb_ * n_pad * 4
        return x_blk + conv + xcat + o_blk + resident

    budget = int(0.6 * vmem_limit)
    while lc > 8 and est(tb, lc) > budget:             # shrink L chunk first,
        lc = max(8, lc // 2)
    while tb > 8 and est(tb, lc) > budget:             # keep TB (MLP matmul M) large
        tb = max(8, _round_up(tb // 2, 8))
    return tb, lc


# ---------------------------------------------------------------------------
# Forward pass (embedding gather is plain-JAX glue; everything else fused).
# ---------------------------------------------------------------------------
def mycnn_forward(token_ids, packed, *, batch_tile=128, l_chunk=64):
    k_sizes = packed["k_sizes"]
    c_pad = packed["c_pad"]
    k_min, k_max = min(k_sizes), max(k_sizes)
    halo = k_max - k_min

    B, L = token_ids.shape
    assert L >= k_max, f"sequence length {L} must be >= largest conv kernel {k_max}"

    # Embedding gather (padding_idx row is zero in the table).
    # TODO(synk): fuse the gather in-kernel via scalar-prefetched token_ids when
    #             the table fits VMEM, removing the (B, L, D) HBM round trip.
    x = jnp.take(packed["embed"], token_ids, axis=0)          # (B, L, D) bf16
    D = x.shape[-1]
    CT = packed["wc"].shape[1]
    N_pad = packed["w3"].shape[1]

    vmem_limit, pool_bf16, is_v7 = _device_tuning()
    TB, Lc = _choose_tiles(B, L, D, CT, k_max, halo, N_pad,
                           batch_tile, l_chunk, vmem_limit)
    # v7x has 2 TensorCores: make sure the batch grid has >= 2 steps if possible.
    if is_v7 and _round_up(B, TB) // TB < 2 and TB >= 16:
        TB = max(8, _round_up(TB // 2, 8))

    B_pad = _round_up(B, TB)
    # Zero-pad the batch to a tile multiple and add `halo` zero rows along L so
    # the widest-kernel im2col shifts of the tail rows exist (those padded rows
    # only feed zero weight rows / output rows that are never read).
    x = jnp.pad(x, ((0, B_pad - B), (0, halo), (0, 0)))
    L_pad = L + halo

    kern = functools.partial(fused_cnn_kernel, k_sizes=k_sizes, seq_len=L,
                             c_pad=c_pad, l_chunk=Lc, pool_bf16=pool_bf16)

    def full(a):  # whole-array block, constant index_map -> stays resident in VMEM
        return pl.BlockSpec(a.shape, lambda *_: (0,) * a.ndim)

    out = pl.pallas_call(
        kern,
        out_shape=jax.ShapeDtypeStruct((B_pad, N_pad), jnp.float32),
        grid=(B_pad // TB,),
        in_specs=[
            pl.BlockSpec((TB, L_pad, D), lambda i: (i, 0, 0)),
            full(packed["wc"]), full(packed["bc"]),
            full(packed["w1"]), full(packed["b1"]),
            full(packed["w2"]), full(packed["b2"]),
            full(packed["w3"]), full(packed["b3"]),
        ],
        out_specs=pl.BlockSpec((TB, N_pad), lambda i: (i, 0)),
        compiler_params=pltpu.CompilerParams(
            dimension_semantics=("parallel",),        # batch split across TCs (v7x)
            vmem_limit_bytes=int(vmem_limit)),
    )(x, packed["wc"], packed["bc"],
      packed["w1"], packed["b1"], packed["w2"], packed["b2"],
      packed["w3"], packed["b3"])

    return out[:B, :packed["n_out"]]


# ---------------------------------------------------------------------------
# Pure-JAX reference (true module semantics; compute_dtype controls the
# matmul operand precision so we can check both f32 and bf16-operand paths).
# ---------------------------------------------------------------------------
def mycnn_reference(token_ids, params, compute_dtype=jnp.float32):
    cd = compute_dtype

    def mm(a, b):
        return jax.lax.dot_general(
            a.astype(cd), b.astype(cd),
            dimension_numbers=(((a.ndim - 1,), (0,)), ((), ())),
            preferred_element_type=jnp.float32)

    x = jnp.take(params["embed"], token_ids, axis=0)         # (B, L, D)

    def branch(w, b):
        K = w.shape[0]
        L_out = x.shape[1] - K + 1
        acc = mm(x[:, 0:L_out, :], w[0])
        for j in range(1, K):
            acc = acc + mm(x[:, j:j + L_out, :], w[j])
        acc = jnp.maximum(acc + b[0][None, None, :], 0.0)
        return jnp.max(acc, axis=1)

    feat = jnp.concatenate([branch(params["w_c1"], params["b_c1"]),
                            branch(params["w_c2"], params["b_c2"]),
                            branch(params["w_c3"], params["b_c3"])], axis=1)
    h = jnp.maximum(mm(feat, params["w1"]) + params["b1"], 0.0)
    h = jnp.maximum(mm(h, params["w2"]) + params["b2"], 0.0)
    return mm(h, params["w3"]) + params["b3"]


# ---------------------------------------------------------------------------
# Deterministic parameter init (PyTorch-like layouts) + run
# ---------------------------------------------------------------------------
def make_params(key, vocab, embed_dim, n_filters=200):
    ks = jax.random.split(key, 16)
    s = 0.05

    embed = s * jax.random.normal(ks[0], (vocab, embed_dim), jnp.float32)
    embed = embed.at[1].set(0.0)            # padding_idx = 1

    def conv_w(k, ksize):
        return s * jax.random.normal(k, (ksize, embed_dim, n_filters), jnp.float32)

    params = {
        "embed": embed,
        "w_c1": conv_w(ks[1], 3), "b_c1": s * jax.random.normal(ks[2], (1, n_filters)),
        "w_c2": conv_w(ks[3], 4), "b_c2": s * jax.random.normal(ks[4], (1, n_filters)),
        "w_c3": conv_w(ks[5], 5), "b_c3": s * jax.random.normal(ks[6], (1, n_filters)),
        "w1": s * jax.random.normal(ks[7], (3 * n_filters, 256)),
        "b1": s * jax.random.normal(ks[8], (1, 256)),
        "w2": s * jax.random.normal(ks[9], (256, 128)),
        "b2": s * jax.random.normal(ks[10], (1, 128)),
        "w3": s * jax.random.normal(ks[11], (128, 2)),
        "b3": s * jax.random.normal(ks[12], (1, 2)),
    }
    # Note: PyTorch Conv1d stores weights as (C_out, C_in, K); loading a real
    # checkpoint would require transposing to this (K, C_in, C_out) layout.
    return jax.tree_util.tree_map(lambda a: a.astype(jnp.float32), params)


if __name__ == "__main__":
    key = jax.random.PRNGKey(0)
    VOCAB, EMBED_DIM = 500, 32      # EMBED_SIZE, EMBED_DIM (small, synthetic)
    B, L = 2, 16                    # batch, sequence length

    k_tok, k_par = jax.random.split(key)
    token_ids = jax.random.randint(k_tok, (B, L), 0, VOCAB, dtype=jnp.int32)
    params = make_params(k_par, VOCAB, EMBED_DIM)
    packed = pack_params(params)

    out = jax.block_until_ready(mycnn_forward(token_ids, packed))
    assert out.shape == (B, 2), out.shape

    # Tight check against a reference with the same bf16-operand / f32-accum
    # math (validates fusion, chunked im2col, packing, tail handling).
    ref_bf16 = jax.block_until_ready(
        mycnn_reference(token_ids, params, compute_dtype=jnp.bfloat16))
    assert jnp.allclose(out, ref_bf16, rtol=1e-3, atol=1e-3), (out, ref_bf16)

    # Looser check against full-f32 module semantics.
    ref_f32 = jax.block_until_ready(
        mycnn_reference(token_ids, params, compute_dtype=jnp.float32))
    assert jnp.allclose(out, ref_f32, rtol=2e-2, atol=2e-2), (out, ref_f32)

    print("KERNEL_OK")
</pallas_src>

<mosaic_0001>
module attributes {stable_mosaic.version = 11 : i64} {
  func.func @fused_cnn_kernel(%arg0: i32, %arg1: memref<8x18x32xbf16, #tpu.memory_space<vmem>>, %arg2: memref<160x768xbf16, #tpu.memory_space<vmem>>, %arg3: memref<1x768xf32, #tpu.memory_space<vmem>>, %arg4: memref<768x256xbf16, #tpu.memory_space<vmem>>, %arg5: memref<1x256xf32, #tpu.memory_space<vmem>>, %arg6: memref<256x128xbf16, #tpu.memory_space<vmem>>, %arg7: memref<1x128xf32, #tpu.memory_space<vmem>>, %arg8: memref<128x128xbf16, #tpu.memory_space<vmem>>, %arg9: memref<1x128xf32, #tpu.memory_space<vmem>>, %arg10: memref<8x128xf32, #tpu.memory_space<vmem>>) attributes {dimension_semantics = [#tpu.dimension_semantics<parallel>], iteration_bounds = array<i64: 1>, scalar_prefetch = 0 : i64, scratch_operands = 0 : i64, tpu.core_type = #tpu.core_type<tc>, window_params = [{transform_indices = @transform_0, window_bounds = array<i64: 8, 18, 32>}, {pipeline_mode = #tpu.pipeline_mode<synchronous>, transform_indices = @transform_1, window_bounds = array<i64: 160, 768>}, {pipeline_mode = #tpu.pipeline_mode<synchronous>, transform_indices = @transform_2, window_bounds = array<i64: 1, 768>}, {pipeline_mode = #tpu.pipeline_mode<synchronous>, transform_indices = @transform_3, window_bounds = array<i64: 768, 256>}, {pipeline_mode = #tpu.pipeline_mode<synchronous>, transform_indices = @transform_4, window_bounds = array<i64: 1, 256>}, {pipeline_mode = #tpu.pipeline_mode<synchronous>, transform_indices = @transform_5, window_bounds = array<i64: 256, 128>}, {pipeline_mode = #tpu.pipeline_mode<synchronous>, transform_indices = @transform_6, window_bounds = array<i64: 1, 128>}, {pipeline_mode = #tpu.pipeline_mode<synchronous>, transform_indices = @transform_7, window_bounds = array<i64: 128, 128>}, {pipeline_mode = #tpu.pipeline_mode<synchronous>, transform_indices = @transform_8, window_bounds = array<i64: 1, 128>}, {transform_indices = @transform_9, window_bounds = array<i64: 8, 128>}]} {
    %c0 = arith.constant 0 : index
    %c0_0 = arith.constant 0 : index
    %0 = vector.load %arg2[%c0, %c0_0] : memref<160x768xbf16, #tpu.memory_space<vmem>>, vector<160x768xbf16>
    %c0_1 = arith.constant 0 : index
    %c0_2 = arith.constant 0 : index
    %1 = vector.load %arg3[%c0_1, %c0_2] : memref<1x768xf32, #tpu.memory_space<vmem>>, vector<1x768xf32>
    %2 = vector.shape_cast %1 : vector<1x768xf32> to vector<1x1x768xf32>
    %c0_3 = arith.constant 0 : index
    %c0_4 = arith.constant 0 : index
    %c0_5 = arith.constant 0 : index
    %3 = vector.load %arg1[%c0_3, %c0_4, %c0_5] : memref<8x18x32xbf16, #tpu.memory_space<vmem>>, vector<8x16x32xbf16>
    %4 = vector.extract_strided_slice %3 {offsets = [0, 0, 0], sizes = [8, 12, 32], strides = [1, 1, 1]} : vector<8x16x32xbf16> to vector<8x12x32xbf16>
    %5 = vector.extract_strided_slice %3 {offsets = [0, 1, 0], sizes = [8, 12, 32], strides = [1, 1, 1]} : vector<8x16x32xbf16> to vector<8x12x32xbf16>
    %6 = vector.extract_strided_slice %3 {offsets = [0, 2, 0], sizes = [8, 12, 32], strides = [1, 1, 1]} : vector<8x16x32xbf16> to vector<8x12x32xbf16>
    %7 = vector.extract_strided_slice %3 {offsets = [0, 3, 0], sizes = [8, 12, 32], strides = [1, 1, 1]} : vector<8x16x32xbf16> to vector<8x12x32xbf16>
    %8 = vector.extract_strided_slice %3 {offsets = [0, 4, 0], sizes = [8, 12, 32], strides = [1, 1, 1]} : vector<8x16x32xbf16> to vector<8x12x32xbf16>
    %9 = tpu.concatenate %4, %5, %6, %7, %8 in 2 : vector<8x12x32xbf16>, vector<8x12x32xbf16>, vector<8x12x32xbf16>, vector<8x12x32xbf16>, vector<8x12x32xbf16> -> vector<8x12x160xbf16>
    %cst = arith.constant dense<0.000000e+00> : vector<8x12x768xf32>
    %10 = tpu.matmul %9, %0, %cst {dimension_numbers = #tpu.dot_dimension_numbers<[2], [0], [0, 1], [1], [0, 0, 0, 1, 1, 1], [], []>} : vector<8x12x160xbf16>, vector<160x768xbf16>, vector<8x12x768xf32> -> vector<8x12x768xf32>
    %11 = vector.broadcast %2 : vector<1x1x768xf32> to vector<8x12x768xf32>
    %12 = arith.addf %10, %11 : vector<8x12x768xf32>
    %cst_6 = arith.constant 0.000000e+00 : f32
    %13 = vector.broadcast %cst_6 : f32 to vector<8x12x768xf32>
    %14 = arith.maximumf %12, %13 : vector<8x12x768xf32>
    %cst_7 = arith.constant dense<0xFF800000> : vector<8x768xf32>
    %15 = vector.multi_reduction <maximumf>, %14, %cst_7 [1] : vector<8x12x768xf32> to vector<8x768xf32>
    %c0_8 = arith.constant 0 : index
    %c12 = arith.constant 12 : index
    %c0_9 = arith.constant 0 : index
    %16 = vector.load %arg1[%c0_8, %c12, %c0_9] : memref<8x18x32xbf16, #tpu.memory_space<vmem>>, vector<8x6x32xbf16>
    %17 = vector.extract_strided_slice %16 {offsets = [0, 0, 0], sizes = [8, 2, 32], strides = [1, 1, 1]} : vector<8x6x32xbf16> to vector<8x2x32xbf16>
    %18 = vector.extract_strided_slice %16 {offsets = [0, 1, 0], sizes = [8, 2, 32], strides = [1, 1, 1]} : vector<8x6x32xbf16> to vector<8x2x32xbf16>
    %19 = vector.extract_strided_slice %16 {offsets = [0, 2, 0], sizes = [8, 2, 32], strides = [1, 1, 1]} : vector<8x6x32xbf16> to vector<8x2x32xbf16>
    %20 = vector.extract_strided_slice %16 {offsets = [0, 3, 0], sizes = [8, 2, 32], strides = [1, 1, 1]} : vector<8x6x32xbf16> to vector<8x2x32xbf16>
    %21 = vector.extract_strided_slice %16 {offsets = [0, 4, 0], sizes = [8, 2, 32], strides = [1, 1, 1]} : vector<8x6x32xbf16> to vector<8x2x32xbf16>
    %22 = tpu.concatenate %17, %18, %19, %20, %21 in 2 : vector<8x2x32xbf16>, vector<8x2x32xbf16>, vector<8x2x32xbf16>, vector<8x2x32xbf16>, vector<8x2x32xbf16> -> vector<8x2x160xbf16>
    %cst_10 = arith.constant dense<0.000000e+00> : vector<8x2x768xf32>
    %23 = tpu.matmul %22, %0, %cst_10 {dimension_numbers = #tpu.dot_dimension_numbers<[2], [0], [0, 1], [1], [0, 0, 0, 1, 1, 1], [], []>} : vector<8x2x160xbf16>, vector<160x768xbf16>, vector<8x2x768xf32> -> vector<8x2x768xf32>
    %24 = vector.broadcast %2 : vector<1x1x768xf32> to vector<8x2x768xf32>
    %25 = arith.addf %23, %24 : vector<8x2x768xf32>
    %cst_11 = arith.constant 0.000000e+00 : f32
    %26 = vector.broadcast %cst_11 : f32 to vector<8x2x768xf32>
    %27 = arith.maximumf %25, %26 : vector<8x2x768xf32>
    %28 = vector.extract_strided_slice %15 {offsets = [0, 0], sizes = [8, 256], strides = [1, 1]} : vector<8x768xf32> to vector<8x256xf32>
    %29 = vector.extract_strided_slice %27 {offsets = [0, 0, 0], sizes = [8, 2, 256], strides = [1, 1, 1]} : vector<8x2x768xf32> to vector<8x2x256xf32>
    %cst_12 = arith.constant dense<0xFF800000> : vector<8x256xf32>
    %30 = vector.multi_reduction <maximumf>, %29, %cst_12 [1] : vector<8x2x256xf32> to vector<8x256xf32>
    %31 = arith.maximumf %28, %30 : vector<8x256xf32>
    %32 = vector.extract_strided_slice %15 {offsets = [0, 256], sizes = [8, 256], strides = [1, 1]} : vector<8x768xf32> to vector<8x256xf32>
    %33 = vector.extract_strided_slice %27 {offsets = [0, 0, 256], sizes = [8, 1, 256], strides = [1, 1, 1]} : vector<8x2x768xf32> to vector<8x1x256xf32>
    %cst_13 = arith.constant dense<0xFF800000> : vector<8x256xf32>
    %34 = vector.multi_reduction <maximumf>, %33, %cst_13 [1] : vector<8x1x256xf32> to vector<8x256xf32>
    %35 = arith.maximumf %32, %34 : vector<8x256xf32>
    %36 = vector.extract_strided_slice %15 {offsets = [0, 512], sizes = [8, 256], strides = [1, 1]} : vector<8x768xf32> to vector<8x256xf32>
    %37 = tpu.concatenate %31, %35, %36 in 1 : vector<8x256xf32>, vector<8x256xf32>, vector<8x256xf32> -> vector<8x768xf32>
    %38 = arith.truncf %37 : vector<8x768xf32> to vector<8x768xbf16>
    %c0_14 = arith.constant 0 : index
    %c0_15 = arith.constant 0 : index
    %39 = vector.load %arg4[%c0_14, %c0_15] : memref<768x256xbf16, #tpu.memory_space<vmem>>, vector<768x256xbf16>
    %cst_16 = arith.constant dense<0.000000e+00> : vector<8x256xf32>
    %40 = tpu.matmul %38, %39, %cst_16 {dimension_numbers = #tpu.dot_dimension_numbers<[1], [0], [0], [1], [0, 0, 1, 1], [], []>} : vector<8x768xbf16>, vector<768x256xbf16>, vector<8x256xf32> -> vector<8x256xf32>
    %c0_17 = arith.constant 0 : index
    %c0_18 = arith.constant 0 : index
    %41 = vector.load %arg5[%c0_17, %c0_18] : memref<1x256xf32, #tpu.memory_space<vmem>>, vector<1x256xf32>
    %42 = vector.broadcast %41 : vector<1x256xf32> to vector<8x256xf32>
    %43 = arith.addf %40, %42 : vector<8x256xf32>
    %cst_19 = arith.constant 0.000000e+00 : f32
    %44 = vector.broadcast %cst_19 : f32 to vector<8x256xf32>
    %45 = arith.maximumf %43, %44 : vector<8x256xf32>
    %46 = arith.truncf %45 : vector<8x256xf32> to vector<8x256xbf16>
    %c0_20 = arith.constant 0 : index
    %c0_21 = arith.constant 0 : index
    %47 = vector.load %arg6[%c0_20, %c0_21] : memref<256x128xbf16, #tpu.memory_space<vmem>>, vector<256x128xbf16>
    %cst_22 = arith.constant dense<0.000000e+00> : vector<8x128xf32>
    %48 = tpu.matmul %46, %47, %cst_22 {dimension_numbers = #tpu.dot_dimension_numbers<[1], [0], [0], [1], [0, 0, 1, 1], [], []>} : vector<8x256xbf16>, vector<256x128xbf16>, vector<8x128xf32> -> vector<8x128xf32>
    %c0_23 = arith.constant 0 : index
    %c0_24 = arith.constant 0 : index
    %49 = vector.load %arg7[%c0_23, %c0_24] : memref<1x128xf32, #tpu.memory_space<vmem>>, vector<1x128xf32>
    %50 = vector.broadcast %49 : vector<1x128xf32> to vector<8x128xf32>
    %51 = arith.addf %48, %50 : vector<8x128xf32>
    %cst_25 = arith.constant 0.000000e+00 : f32
    %52 = vector.broadcast %cst_25 : f32 to vector<8x128xf32>
    %53 = arith.maximumf %51, %52 : vector<8x128xf32>
    %54 = arith.truncf %53 : vector<8x128xf32> to vector<8x128xbf16>
    %c0_26 = arith.constant 0 : index
    %c0_27 = arith.constant 0 : index
    %55 = vector.load %arg8[%c0_26, %c0_27] : memref<128x128xbf16, #tpu.memory_space<vmem>>, vector<128x128xbf16>
    %cst_28 = arith.constant dense<0.000000e+00> : vector<8x128xf32>
    %56 = tpu.matmul %54, %55, %cst_28 {dimension_numbers = #tpu.dot_dimension_numbers<[1], [0], [0], [1], [0, 0, 1, 1], [], []>} : vector<8x128xbf16>, vector<128x128xbf16>, vector<8x128xf32> -> vector<8x128xf32>
    %c0_29 = arith.constant 0 : index
    %c0_30 = arith.constant 0 : index
    %57 = vector.load %arg9[%c0_29, %c0_30] : memref<1x128xf32, #tpu.memory_space<vmem>>, vector<1x128xf32>
    %58 = vector.broadcast %57 : vector<1x128xf32> to vector<8x128xf32>
    %59 = arith.addf %56, %58 : vector<8x128xf32>
    %c0_31 = arith.constant 0 : index
    %c0_32 = arith.constant 0 : index
    %60 = vector.load %arg10[%c0_31, %c0_32] : memref<8x128xf32, #tpu.memory_space<vmem>>, vector<8x128xf32>
    tpu.vector_store %arg10[%c0_31, %c0_32], %59 {strides = array<i32>} : memref<8x128xf32, #tpu.memory_space<vmem>>, vector<8x128xf32>,
    return
  }
  func.func @transform_0(%arg0: i32) -> (i32, i32, i32) {
    %c0_i32 = arith.constant 0 : i32
    %c0_i32_0 = arith.constant 0 : i32
    %c0_i32_1 = arith.constant 0 : i32
    return %arg0, %c0_i32, %c0_i32_0 : i32, i32, i32
  }
  func.func @transform_1(%arg0: i32) -> (i32, i32) {
    %c0_i32 = arith.constant 0 : i32
    %c0_i32_0 = arith.constant 0 : i32
    %c0_i32_1 = arith.constant 0 : i32
    return %c0_i32, %c0_i32_0 : i32, i32
  }
  func.func @transform_2(%arg0: i32) -> (i32, i32) {
    %c0_i32 = arith.constant 0 : i32
    %c0_i32_0 = arith.constant 0 : i32
    %c0_i32_1 = arith.constant 0 : i32
    return %c0_i32, %c0_i32_0 : i32, i32
  }
  func.func @transform_3(%arg0: i32) -> (i32, i32) {
    %c0_i32 = arith.constant 0 : i32
    %c0_i32_0 = arith.constant 0 : i32
    %c0_i32_1 = arith.constant 0 : i32
    return %c0_i32, %c0_i32_0 : i32, i32
  }
  func.func @transform_4(%arg0: i32) -> (i32, i32) {
    %c0_i32 = arith.constant 0 : i32
    %c0_i32_0 = arith.constant 0 : i32
    %c0_i32_1 = arith.constant 0 : i32
    return %c0_i32, %c0_i32_0 : i32, i32
  }
  func.func @transform_5(%arg0: i32) -> (i32, i32) {
    %c0_i32 = arith.constant 0 : i32
    %c0_i32_0 = arith.constant 0 : i32
    %c0_i32_1 = arith.constant 0 : i32
    return %c0_i32, %c0_i32_0 : i32, i32
  }
  func.func @transform_6(%arg0: i32) -> (i32, i32) {
    %c0_i32 = arith.constant 0 : i32
    %c0_i32_0 = arith.constant 0 : i32
    %c0_i32_1 = arith.constant 0 : i32
    return %c0_i32, %c0_i32_0 : i32, i32
  }
  func.func @transform_7(%arg0: i32) -> (i32, i32) {
    %c0_i32 = arith.constant 0 : i32
    %c0_i32_0 = arith.constant 0 : i32
    %c0_i32_1 = arith.constant 0 : i32
    return %c0_i32, %c0_i32_0 : i32, i32
  }
  func.func @transform_8(%arg0: i32) -> (i32, i32) {
    %c0_i32 = arith.constant 0 : i32
    %c0_i32_0 = arith.constant 0 : i32
    %c0_i32_1 = arith.constant 0 : i32
    return %c0_i32, %c0_i32_0 : i32, i32
  }
  func.func @transform_9(%arg0: i32) -> (i32, i32) {
    %c0_i32 = arith.constant 0 : i32
    %c0_i32_0 = arith.constant 0 : i32
    return %arg0, %c0_i32 : i32, i32
  }
}

</mosaic_0001>

<bundles_post_ra>
// kernel: tpu_custom_call.1
= control target key start
LH: loop header
LB: loop body
LE: loop exit
PB: predicated region body
PF: predicated region fallthrough
CT: control target
= control target key end

     0   :  { %14 = vsyncpa [#allocation3], 0  ;;  %s6872_s0 = inlined_call_operand.vmem [shape: bf16[8,18,32], index: 0, kind: input, shape index: {}]   ;;  %s6873_s1 = inlined_call_operand.hbm [shape: bf16[160,768], index: 1, kind: input, shape index: {}]   ;;  %s6874_s2 = inlined_call_operand.vmem [shape: f32[1,768], index: 2, kind: input, shape index: {}]   ;;  %s6875_s3 = inlined_call_operand.hbm [shape: bf16[768,256], index: 3, kind: input, shape index: {}]   ;;  %s6876_s4 = inlined_call_operand.vmem [shape: f32[1,256], index: 4, kind: input, shape index: {}]   ;;  %s6877_s5 = inlined_call_operand.vmem [shape: bf16[256,128], index: 5, kind: input, shape index: {}]   ;;  %s6878_s6 = inlined_call_operand.vmem [shape: f32[1,128], index: 6, kind: input, shape index: {}]   ;;  %s6879_s7 = inlined_call_operand.hbm [shape: bf16[128,128], index: 7, kind: input, shape index: {}]   ;;  %s6880_s8 = inlined_call_operand.vmem [shape: f32[1,128], index: 8, kind: input, shape index: {}]   ;;  %s6881_s9 = inlined_call_operand.hbm [shape: f32[8,128], index: 9, kind: output, shape index: {}]  }
   0x1   :  { %15 = vsyncpa [#allocation6], 0 }
   0x2   :  { %16 = vsyncpa [#allocation4], 0  ;;  %s5186_s30 = smov [#allocation5]  }
   0x3   :  { %s38_s10 = sshll.u32 %s5186_s30, 4  ;;  %s39_s10 = int_to_ptr.vmem [resolvable:$true] %s38_s10 }
   0x4   :  { %s5108_s11 = scalar_lea.vmem %s39_s10, 12288  ;;  %p5113_p1 = scmp.lt.s32.totalorder %s39_s10, %s39_s10 }
   0x5   :  { %p5109_p0 = scmp.ne.s32.totalorder %s39_s10, %s5108_s11  ;;  %p5114_p2 = scmp.lt.s32.totalorder %s5108_s11, %s5108_s11 }
   0x7   :  { %p5115_p3 = por %p5114_p2, %p5113_p1 }
   0x9   :  { %p5116_p4 = pnand %p5115_p3, %p5109_p0 }
   0xb   :  { %5119 = shalt.err (!%p5116_p4)
}
   0xc   :  { %s5187_s12 = smov 128   ;;  %s5188_s13 = smov 8  }
   0xd   :  { %44 = dma.hbm_to_vmem [thread:$0]  %s6875_s3, 12288, %s39_s10, [#allocation6], %s5187_s12, %s5187_s12, %s5188_s13  }
   0xe   :  { %s5189_s16 = smov [#allocation2]  }
   0xf   :  { %s24_s17 = sshll.u32 %s5189_s16, 4  ;;  %s25_s17 = int_to_ptr.vmem [resolvable:$true] %s24_s17 }
  0x10   :  { %s5128_s18 = scalar_lea.vmem %s25_s17, 7680  ;;  %p5133_p6 = scmp.lt.s32.totalorder %s25_s17, %s25_s17 }
  0x11   :  { %p5129_p5 = scmp.ne.s32.totalorder %s25_s17, %s5128_s18  ;;  %p5134_p7 = scmp.lt.s32.totalorder %s5128_s18, %s5128_s18 }
  0x13   :  { %p5135_p8 = por %p5134_p7, %p5133_p6 }
  0x15   :  { %p5136_p9 = pnand %p5135_p8, %p5129_p5 }
  0x17   :  { %5139 = shalt.err (!%p5136_p9)
}
  0x18   :  { %s5190_s19 = smov 384   ;;  %s5191_s20 = smov 24  }
  0x19   :  { %30 = dma.hbm_to_vmem [thread:$0]  %s6873_s1, 7680, %s25_s17, [#allocation3], %s5190_s19, %s5190_s19, %s5191_s20  }
  0x1a   :  { %s5192_s23 = smov [#allocation7]  }
  0x1b   :  { %s56_s24 = sshll.u32 %s5192_s23, 4  ;;  %s57_s24 = int_to_ptr.vmem [resolvable:$true] %s56_s24 }
  0x1c   :  { %s5148_s3 = scalar_lea.vmem %s57_s24, 1024  ;;  %p5153_p11 = scmp.lt.s32.totalorder %s57_s24, %s57_s24 }
  0x1d   :  { %p5149_p10 = scmp.ne.s32.totalorder %s57_s24, %s5148_s3  ;;  %p5154_p12 = scmp.lt.s32.totalorder %s5148_s3, %s5148_s3 }
  0x1f   :  { %p5155_p13 = por %p5154_p12, %p5153_p11 }
  0x21   :  { %p5156_p0 = pnand %p5155_p13, %p5149_p10 }
  0x23   :  { %5159 = shalt.err (!%p5156_p0)
}
  0x24   :  { %s5193_s25 = smov 64   ;;  %s5194_s26 = smov 4  }
  0x25   :  { %62 = dma.hbm_to_vmem [thread:$0]  %s6879_s7, 1024, %s57_s24, [#allocation6], %s5193_s25, %s5193_s25, %s5194_s26  }
  0x26   :  { %5180 = dma.done.wait [#allocation3], 7680  }
  0x27   :  { %5181 = vsyncadd [#allocation3], 4294959616 }
  0x28   :  { %5182 = dma.done.wait [#allocation6], 13312  }
  0x29   :  { %5183 = vsyncadd [#allocation6], 4294953984  ;;  %v4760_v0 = vld [vmem:[%s6872_s0 + $0x18] sm:$0xff]   ;;  %v4761_v1 = vld [vmem:[%s6872_s0] sm:$0xff]   ;;  %s5195_s14 = smov 32   ;;  %s5196_s17 = smov 96  }
  0x2a   :  { %v266_v2 = vrot.slane %v4760_v0, 1  ;;  %v4762_v3 = vld [vmem:[%s6872_s0 + $0xc] sm:$0xff]   ;;  %v264_v4 = vrot.slane %v4761_v1, 1  ;;  %v193_v5 = vshrl.u32 %v4761_v1, 16  ;;  %v195_v6 = vshll.u32 %v4761_v1, 16  ;;  %v4763_v15 = vld [vmem:[%s6872_s0 + $0x24] sm:$0xff]  }
  0x2b   :  { %v200_v7 = vshrl.u32 %v4762_v3, 16  ;;  %v202_v8 = vshll.u32 %v4762_v3, 16  ;;  %v265_v9 = vrot.slane %v4762_v3, 1  ;;  %v209_v11 = vshll.u32 %v4760_v0, 16  ;;  %v4764_v27 = vld [vmem:[%s6872_s0 + $0x30] sm:$0xff]   ;;  %v5288_v33 = vld [vmem:[%s6872_s0 + $0x3c] sm:$0xff]  }
  0x2c   :  { %276 = vrot.lane.b32.xlu1 %v266_v2, %s5193_s25  ;;  %272 = vrot.lane.b32.xlu0 %v264_v4, %s5193_s25  ;;  %v197_v10 = vrot.slane %v195_v6, 1  ;;  %v288_v13 = vrot.slane %v193_v5, 1  ;;  %v289_v14 = vrot.slane %v195_v6, 2  ;;  %v207_v18 = vshrl.u32 %v4760_v0, 16  ;;  %v5294_v42 = vld [vmem:[#allocation2 + $0x154] ss:$24 sps:$4 sm:$0xff]  }
  0x2d   :  { %v204_v12 = vrot.slane %v202_v8, 1  ;;  %v211_v19 = vrot.slane %v209_v11, 1  ;;  %v291_v21 = vrot.slane %v200_v7, 1  ;;  %v292_v22 = vrot.slane %v202_v8, 2  ;;  %v4786_v43 = vld [vmem:[#allocation2 + $0x15c] ss:$24 sps:$4 sm:$0xff]   ;;  %1030 = vmatprep.subr.bf16.mxu0 %v5294_v42 }
  0x2e   :  { %v198_v17 = vor.u32 %v197_v10, %v193_v5  ;;  %v290_v20 = vor.u32 %v289_v14, %v288_v13  ;;  %v216_v23 = vshll.u32 %v4763_v15, 16  ;;  %v294_v25 = vrot.slane %v207_v18, 1  ;;  %v4788_v44 = vld [vmem:[#allocation2 + $0x150] ss:$24 sps:$4 sm:$0xff]   ;;  %1123 = vmatprep.subr.bf16.mxu1 %v4786_v43  ;;  %v4790_v50 = vld [vmem:[#allocation2 + $0x124] ss:$24 sps:$4 sm:$0xff]  }
  0x2f   :  { %v205_v16 = vor.u32 %v204_v12, %v200_v7  ;;  %v212_v24 = vor.u32 %v211_v19, %v207_v18  ;;  %v295_v26 = vrot.slane %v209_v11, 2  ;;  %v293_v28 = vor.u32 %v292_v22, %v291_v21  ;;  %v4789_v45 = vld [vmem:[#allocation2 + $0x158] ss:$24 sps:$4 sm:$0xff]   ;;  %v5302_v49 = vld [vmem:[%s6872_s0 + $0x48] sm:$0xff]   ;;  %1031 = vmatpush1.bf16.msra.mxu0 %v4788_v44  ;;  %v4798_v0 = vld [vmem:[#allocation2 + $0xfc] ss:$24 sps:$4 sm:$0xff]  }
  0x30   :  { %274 = vrot.lane.b32.xlu0 %v265_v9, %s5193_s25  ;;  %v214_v29 = vshrl.u32 %v4763_v15, 16  ;;  %v218_v30 = vrot.slane %v216_v23, 1  ;;  %v223_v32 = vshll.u32 %v4764_v27, 16  ;;  %v298_v36 = vrot.slane %v216_v23, 2  ;;  %1124 = vmatpush1.bf16.msra.mxu1 %v4789_v45  ;;  %v4792_v54 = vld [vmem:[#allocation2 + $0x12c] ss:$24 sps:$4 sm:$0xff]  }
  0x31   :  { %250 = vrot.lane.b32.xlu1 %v205_v16, %s5195_s14  ;;  %v296_v31 = vor.u32 %v295_v26, %v294_v25  ;;  %v267_v37 = vrot.slane %v4763_v15, 1  ;;  %v221_v38 = vshrl.u32 %v4764_v27, 16  ;;  %v230_v40 = vshll.u32 %v5288_v33, 16  ;;  %1032 = vmatprep.subr.bf16.mxu0 %v4790_v50  ;;  %v4794_v55 = vld [vmem:[#allocation2 + $0x120] ss:$24 sps:$4 sm:$0xff]   ;;  %s5201_s28 = smov [#allocation8]  }
  0x32   :  { %v219_v34 = vor.u32 %v218_v30, %v214_v29  ;;  %v297_v35 = vrot.slane %v214_v29, 1  ;;  %v225_v39 = vrot.slane %v223_v32, 1  ;;  %v228_v47 = vshrl.u32 %v5288_v33, 16  ;;  %v5310_v58 = vld [vmem:[%s6872_s0 + $0x54] sm:$0xff]   ;;  %1125 = vmatprep.subr.bf16.mxu1 %v4792_v54  ;;  %v4795_v59 = vld [vmem:[#allocation2 + $0x128] ss:$24 sps:$4 sm:$0xff]  }
  0x33   :  { %v232_v48 = vrot.slane %v230_v40, 1  ;;  %v268_v51 = vrot.slane %v4764_v27, 1  ;;  %v300_v52 = vrot.slane %v221_v38, 1  ;;  %v301_v53 = vrot.slane %v223_v32, 2  ;;  %v4796_v60 = vld [vmem:[#allocation2 + $0xf4] ss:$24 sps:$4 sm:$0xff]   ;;  %1033 = vmatpush1.bf16.msra.mxu0 %v4794_v55 }
  0x34   :  { %248 = vrot.lane.b32.xlu0 %v198_v17, %s5195_s14  ;;  %v299_v41 = vor.u32 %v298_v36, %v297_v35  ;;  %v226_v46 = vor.u32 %v225_v39, %v221_v38  ;;  %v237_v57 = vshll.u32 %v5302_v49, 16  ;;  %v303_v62 = vrot.slane %v228_v47, 1  ;;  %1126 = vmatpush1.bf16.msra.mxu1 %v4795_v59  ;;  %v4800_v1 = vld [vmem:[#allocation2 + $0xf0] ss:$24 sps:$4 sm:$0xff]   ;;  %v4802_v3 = vld [vmem:[#allocation2 + $0xc4] ss:$24 sps:$4 sm:$0xff]  }
  0x35   :  { %312 = vrot.lane.b32.xlu1 %v290_v20, %s5196_s17  ;;  %v233_v56 = vor.u32 %v232_v48, %v228_v47  ;;  %v302_v61 = vor.u32 %v301_v53, %v300_v52  ;;  %v304_v63 = vrot.slane %v230_v40, 2  ;;  %v4801_v2 = vld [vmem:[#allocation2 + $0xf8] ss:$24 sps:$4 sm:$0xff]   ;;  %1034 = vmatprep.subr.bf16.mxu0 %v4796_v60  ;;  %v269_v4 = vrot.slane %v5288_v33, 1  ;;  %v5321_v9 = vld [vmem:[%s6872_s0 + $0x4] sm:$0xc] }
  0x36   :  { %1127 = vmatprep.subr.bf16.mxu1 %v4798_v0  ;;  %v235_v5 = vshrl.u32 %v5302_v49, 16  ;;  %v239_v6 = vrot.slane %v237_v57, 1  ;;  %v244_v8 = vshll.u32 %v5310_v58, 16  ;;  %v4804_v10 = vld [vmem:[#allocation2 + $0xcc] ss:$24 sps:$4 sm:$0xff]   ;;  %v307_v17 = vrot.slane %v237_v57, 2 }
  0x37   :  { %v305_v7 = vor.u32 %v304_v63, %v303_v62  ;;  %1035 = vmatpush1.bf16.msra.mxu0 %v4800_v1  ;;  %v5326_v11 = vld [vmem:[%s6872_s0 + $0x10] sm:$0xc]  ;;  %v4806_v12 = vld [vmem:[#allocation2 + $0xc0] ss:$24 sps:$4 sm:$0xff]   ;;  %v5331_v13 = vld [vmem:[%s6872_s0 + $0x1c] sm:$0xc]  ;;  %v5336_v18 = vcombine.low %v5321_v9, %v5321_v9 }
  0x38   :  { %252 = vrot.lane.b32.xlu0 %v212_v24, %s5195_s14  ;;  %1128 = vmatpush1.bf16.msra.mxu1 %v4801_v2  ;;  %v4807_v14 = vld [vmem:[#allocation2 + $0xc8] ss:$24 sps:$4 sm:$0xff]   ;;  %v240_v15 = vor.u32 %v239_v6, %v235_v5  ;;  %v306_v16 = vrot.slane %v235_v5, 1  ;;  %v4808_v19 = vld [vmem:[#allocation2 + $0x94] ss:$24 sps:$4 sm:$0xff]   ;;  %v270_v20 = vrot.slane %v5302_v49, 1  ;;  %v5343_v23 = vcombine.low %v5326_v11, %v5326_v11 }
  0x39   :  { %314 = vrot.lane.b32.xlu1 %v293_v28, %s5196_s17  ;;  %1036 = vmatprep.subr.bf16.mxu0 %v4802_v3  ;;  %v242_v21 = vshrl.u32 %v5310_v58, 16  ;;  %v246_v22 = vrot.slane %v244_v8, 1  ;;  %v4810_v24 = vld [vmem:[#allocation2 + $0x9c] ss:$24 sps:$4 sm:$0xff]   ;;  %v5348_v25 = vld [vmem:[%s6872_s0 + $0x28] sm:$0xc]  ;;  %v5359_v33 = vcombine.low %v5331_v13, %v5331_v13 }
  0x3a   :  { %1129 = vmatprep.subr.bf16.mxu1 %v4804_v10  ;;  %v4812_v26 = vld [vmem:[#allocation2 + $0x90] ss:$24 sps:$4 sm:$0xff]   ;;  %v5353_v27 = vld [vmem:[%s6872_s0 + $0x34] sm:$0xc]  ;;  %v4814_v29 = vld [vmem:[#allocation2 + $0x64] ss:$24 sps:$4 sm:$0xff]   ;;  %v308_v30 = vor.u32 %v307_v17, %v306_v16  ;;  %v5370_v38 = vcombine.low %v5348_v25, %v5348_v25 }
  0x3b   :  { %1037 = vmatpush1.bf16.msra.mxu0 %v4806_v12  ;;  %v4813_v28 = vld [vmem:[#allocation2 + $0x98] ss:$24 sps:$4 sm:$0xff]   ;;  %v2241_v32 = vshll.u32 %v5336_v18, 16  ;;  %v247_v35 = vor.u32 %v246_v22, %v242_v21  ;;  %v310_v36 = vrot.slane %v244_v8, 2  ;;  %v4816_v39 = vld [vmem:[#allocation2 + $0x6c] ss:$24 sps:$4 sm:$0xff]  }
  0x3c   :  { %316 = vrot.lane.b32.xlu0 %v296_v31, %s5196_s17  ;;  %1130 = vmatpush1.bf16.msra.mxu1 %v4807_v14  ;;  %v309_v31 = vrot.slane %v242_v21, 1  ;;  %v4818_v40 = vld [vmem:[#allocation2 + $0x60] ss:$24 sps:$4 sm:$0xff]   ;;  %v4820_v44 = vld [vmem:[#allocation2 + $0x34] ss:$24 sps:$4 sm:$0xff]   ;;  %v271_v45 = vrot.slane %v5310_v58, 1 }
  0x3d   :  { %254 = vrot.lane.b32.xlu1 %v219_v34, %s5195_s14  ;;  %1038 = vmatprep.subr.bf16.mxu0 %v4808_v19  ;;  %v5364_v34 = vld [vmem:[%s6872_s0 + $0x40] sm:$0xc]  ;;  %v4822_v47 = vld [vmem:[#allocation2 + $0x3c] ss:$24 sps:$4 sm:$0xff]   ;;  %v2239_v48 = vshrl.u32 %v5336_v18, 16  ;;  %v2243_v49 = vrot.slane %v2241_v32, 1 }
  0x3e   :  { %1131 = vmatprep.subr.bf16.mxu1 %v4810_v24  ;;  %v4819_v43 = vld [vmem:[#allocation2 + $0x68] ss:$24 sps:$4 sm:$0xff]   ;;  %v2255_v50 = vshll.u32 %v5359_v33, 16  ;;  %v5389_v52 = vld [vmem:[%s6872_s0 + $0x4c] sm:$0xc]  ;;  %v311_v53 = vor.u32 %v310_v36, %v309_v31  ;;  %v2262_v55 = vshll.u32 %v5370_v38, 16 }
  0x3f   :  { %1039 = vmatpush1.bf16.msra.mxu0 %v4812_v26  ;;  %v4824_v57 = vld [vmem:[#allocation2 + $0x30] ss:$24 sps:$4 sm:$0xff]   ;;  %v4826_v59 = vld [vmem:[#allocation2 + $0x4] ss:$24 sps:$4 sm:$0xff]   ;;  %v2260_v60 = vshrl.u32 %v5370_v38, 16  ;;  %v5404_v62 = vcombine.low %v5389_v52, %v5389_v52  ;;  %v2244_v0 = vor.u32 %v2243_v49, %v2239_v48  ;;  %v2253_v1 = vshrl.u32 %v5359_v33, 16 }
  0x40   :  { %278 = vrot.lane.b32.xlu0 %v267_v37, %s5193_s25  ;;  %v2248_v37 = vshll.u32 %v5343_v23, 16  ;;  %1132 = vmatpush1.bf16.msra.mxu1 %v4813_v28  ;;  %v4825_v58 = vld [vmem:[#allocation2 + $0x38] ss:$24 sps:$4 sm:$0xff]   ;;  %v4828_v63 = vld [vmem:[#allocation2 + $0xc] ss:$24 sps:$4 sm:$0xff]   ;;  %v2257_v2 = vrot.slane %v2255_v50, 1 }
  0x41   :  { %318 = vrot.lane.b32.xlu1 %v299_v41, %s5196_s17  ;;  %v5375_v41 = vld [vmem:[%s6872_s0 + $0x58] sm:$0xc]  ;;  %1040 = vmatprep.subr.bf16.mxu0 %v4814_v29  ;;  %v2264_v5 = vrot.slane %v2262_v55, 1  ;;  %v4831_v8 = vld [vmem:[#allocation2 + $0x8] ss:$24 sps:$4 sm:$0xff]   ;;  %v2281_v32 = vshrl.u32 %v5404_v62, 16 }
  0x42   :  { %1133 = vmatprep.subr.bf16.mxu1 %v4816_v39  ;;  %v2250_v54 = vrot.slane %v2248_v37, 1  ;;  %v5413_v10 = vld [vmem:[#allocation2 + $0x1b4] ss:$24 sps:$4 sm:$0xff]   ;;  %v2258_v16 = vor.u32 %v2257_v2, %v2253_v1  ;;  %v5422_v24 = vld [vmem:[#allocation2 + $0x1b0] ss:$24 sps:$4 sm:$0xff]   ;;  %v2316_v1 = vrot.slane %v5404_v62, 1 }
  0x43   :  { %1041 = vmatpush1.bf16.msra.mxu0 %v4818_v40  ;;  %v2265_v21 = vor.u32 %v2264_v5, %v2260_v60  ;;  %v4837_v26 = vld [vmem:[#allocation2 + $0x1b8] ss:$24 sps:$4 sm:$0xff]   ;;  %v5425_v28 = vld [vmem:[#allocation2 + $0x184] ss:$24 sps:$4 sm:$0xff]   ;;  %v4843_v40 = vld [vmem:[#allocation2 + $0x188] ss:$24 sps:$4 sm:$0xff]  }
  0x44   :  { %256 = vrot.lane.b32.xlu0 %v226_v46, %s5195_s14  ;;  %v2246_v46 = vshrl.u32 %v5343_v23, 16  ;;  %1134 = vmatpush1.bf16.msra.mxu1 %v4819_v43  ;;  %v4840_v29 = vld [vmem:[#allocation2 + $0x18c] ss:$24 sps:$4 sm:$0xff]   ;;  %v5432_v39 = vld [vmem:[#allocation2 + $0x180] ss:$24 sps:$4 sm:$0xff]   ;;  %vm336_vm0 = vcmask 261120  }
  0x45   :  { %280 = vrot.lane.b32.xlu1 %v268_v51, %s5193_s25  ;;  %v5384_v51 = vcombine.low %v5353_v27, %v5353_v27  ;;  %1042 = vmatprep.subr.bf16.mxu0 %v4820_v44  ;;  %v5435_v43 = vld [vmem:[#allocation2 + $0x164] ss:$24 sps:$4 sm:$0xff]   ;;  %v5449_v48 = vld [vmem:[%s6872_s0 + $0x14] sm:$0x1]  ;;  %v5454_v49 = vld [vmem:[%s6872_s0 + $0x8] sm:$0x1] }
  0x46   :  { %1135 = vmatprep.subr.bf16.mxu1 %v4822_v47  ;;  %v2311_v47 = vrot.slane %v5343_v23, 1  ;;  %v2312_v23 = vrot.slane %v5359_v33, 1  ;;  %v4546_v50 = vcombine.low %v5321_v9, %v5454_v49  ;;  %v5477_v55 = vld [vmem:[%s6872_s0 + $0x44] sm:$0x1]  ;;  %vm370_vm1 = vcmask 785408   ;;  %s4430_s1 = sshll.u32 %s5201_s28, 4  ;;  %s4431_s1 = int_to_ptr.vmem [resolvable:$true] %s4430_s1 }
  0x47   :  { %v2269_v3 = vshll.u32 %v5384_v51, 16  ;;  %1043 = vmatpush1.bf16.msra.mxu0 %v4824_v57  ;;  %v2267_v14 = vshrl.u32 %v5384_v51, 16  ;;  %v5482_v57 = vld [vmem:[%s6872_s0 + $0x38] sm:$0x1]  ;;  %vm353_vm2 = vcmask 523264   ;;  %vm1813_vm3 = vcmask 1043456   ;;  %p5165_p2 = scmp.lt.s32.totalorder %s4431_s1, %s4431_s1 }
  0x48   :  { %258 = vrot.lane.b32.xlu0 %v233_v56, %s5195_s14  ;;  %v5395_v56 = vcombine.low %v5364_v34, %v5364_v34  ;;  %1136 = vmatpush1.bf16.msra.mxu1 %v4825_v58  ;;  %v2362_v58 = vshll.u32 %v4546_v50, 16  ;;  %vm3313_vm4 = vcmask 1041409   ;;  %vm3315_vm5 = vcmask 1042434  }
  0x49   :  { %320 = vrot.lane.b32.xlu1 %v302_v61, %s5196_s17  ;;  %v5400_v61 = vcombine.low %v5375_v41, %v5375_v41  ;;  %1044 = vmatprep.subr.bf16.mxu0 %v4826_v59  ;;  %v2271_v17 = vrot.slane %v2269_v3, 1  ;;  %v4550_v3 = vcombine.low %v5353_v27, %v5482_v57  ;;  %vm3317_vm6 = vcmask 1043459  }
  0x4a   :  { %v2276_v6 = vshll.u32 %v5395_v56, 16  ;;  %v2274_v12 = vshrl.u32 %v5395_v56, 16  ;;  %1137 = vmatprep.subr.bf16.mxu1 %v4828_v63  ;;  %v2315_v59 = vrot.slane %v5395_v56, 1  ;;  %v5506_v56 = vld [vmem:[%s6872_s0 + $0x50] sm:$0x1]  ;;  %vm3319_vm7 = vcmask 1044484  }
  0x4b   :  { %v2290_v19 = vshll.u32 %v5400_v61, 16  ;;  %v2288_v31 = vshrl.u32 %v5400_v61, 16  ;;  %vm3321_vm8 = vcmask 1045509   ;;  %vm3064_vm9 = vcmask 1041408  }
  0x4c   :  { %282 = vrot.lane.b32.xlu0 %v269_v4, %s5193_s25  ;;  %v2251_v4 = vor.u32 %v2250_v54, %v2246_v46  ;;  %v2278_v22 = vrot.slane %v2276_v6, 1  ;;  %1138 = vmatpush1.bf16.msra.mxu1 %v4831_v8  ;;  %v2310_v46 = vrot.slane %v5336_v18, 1  ;;  %v5464_v18 = vld [vmem:[%s6872_s0 + $0x20] sm:$0x1]  ;;  %v4547_v54 = vcombine.low %v5326_v11, %v5449_v48 }
  0x4d   :  { %322 = vrot.lane.b32.xlu1 %v305_v7, %s5196_s17  ;;  %v5411_v7 = vld [vmem:[#allocation2] ss:$24 sps:$4 sm:$0xff]   ;;  %v2292_v37 = vrot.slane %v2290_v19, 1  ;;  %v4548_v33 = vcombine.low %v5331_v13, %v5464_v18  ;;  %v2314_v11 = vrot.slane %v5384_v51, 1  ;;  %v5497_v13 = vld [vmem:[%s6872_s0 + $0x5c] sm:$0x1]  ;;  %v4551_v51 = vcombine.low %v5364_v34, %v5477_v55 }
  0x4e   :  { %1045 = vmatpush1.bf16.msra.mxu0 %v5411_v7  ;;  %v2279_v36 = vor.u32 %v2278_v22, %v2274_v12  ;;  %v2367_v60 = vshrl.u32 %v4547_v54, 16  ;;  %v2370_v63 = vshll.u32 %v4547_v54, 16  ;;  %v4553_v27 = vcombine.low %v5375_v41, %v5497_v13 }
  0x4f   :  { %1058 = vmatprep.subr.bf16.mxu0 %v5413_v10  ;;  %v2375_v2 = vshrl.u32 %v4548_v33, 16  ;;  %v2399_v34 = vshrl.u32 %v4551_v51, 16  ;;  %v4552_v19 = vcombine.low %v5389_v52, %v5506_v56  ;;  %vm3323_vm10 = vcmask 1046534  }
  0x50   :  { %260 = vrot.lane.b32.xlu0 %v240_v15, %s5195_s14  ;;  %v4834_v15 = vld [vmem:[#allocation2 + $0x1bc] ss:$24 sps:$4 sm:$0xff]   ;;  %v2369_v5 = vrot.slane %v2367_v60, 1  ;;  %v2372_v6 = vrot.slane %v2370_v63, 2  ;;  %v2418_v52 = vshll.u32 %v4553_v27, 16  ;;  %vm3325_vm11 = vcmask 1047559  }
  0x51   :  { %284 = vrot.lane.b32.xlu1 %v270_v20, %s5193_s25  ;;  %v2283_v20 = vshll.u32 %v5404_v62, 16  ;;  %1151 = vmatprep.subr.bf16.mxu1 %v4834_v15  ;;  %v2364_v62 = vrot.slane %v2362_v58, 2  ;;  %v2377_v12 = vrot.slane %v2375_v2, 1  ;;  %vm5200_vm12 = vmmov 0  }
  0x52   :  { %1059 = vmatpush2.bf16.msra.mxu0 %v5422_v24  ;;  %1152 = vmatpush2.bf16.msra.mxu1 %v4837_v26  ;;  %v2402_v26 = vshll.u32 %v4551_v51, 16 }
  0x53   :  { %1060 = vmatprep.subr.bf16.mxu0 %v5425_v28  ;;  %1153 = vmatprep.subr.bf16.mxu1 %v4840_v29  ;;  %v2401_v29 = vrot.slane %v2399_v34, 1 }
  0x54   :  { %324 = vrot.lane.b32.xlu0 %v308_v30, %s5196_s17  ;;  %v2272_v30 = vor.u32 %v2271_v17, %v2267_v14  ;;  %v2391_v14 = vshrl.u32 %v4550_v3, 16  ;;  %v2394_v17 = vshll.u32 %v4550_v3, 16 }
  0x55   :  { %262 = vrot.lane.b32.xlu1 %v247_v35, %s5195_s14  ;;  %v2285_v35 = vrot.slane %v2283_v20, 1  ;;  %v2373_v20 = vor.u32 %v2372_v6, %v2369_v5 }
  0x56   :  { %1061 = vmatpush2.bf16.msra.mxu0 %v5432_v39  ;;  %1154 = vmatpush2.bf16.msra.mxu1 %v4843_v40  ;;  %v2396_v41 = vrot.slane %v2394_v17, 2  ;;  %v2415_v40 = vshrl.u32 %v4553_v27, 16 }
  0x57   :  { %v2286_v44 = vor.u32 %v2285_v35, %v2281_v32  ;;  %1216 = vmatprep.subr.bf16.mxu0 %v5435_v43  ;;  %2755 = vmatprep.subr.bf16.mxu1 %v5294_v42  ;;  %v5459_v42 = vld [vmem:[%s6872_s0 + $0x2c] sm:$0x1]  ;;  %v2407_v32 = vshrl.u32 %v4552_v19, 16  ;;  %v2410_v35 = vshll.u32 %v4552_v19, 16 }
  0x58   :  { %286 = vrot.lane.b32.xlu0 %v271_v45, %s5193_s25  ;;  %v2293_v45 = vor.u32 %v2292_v37, %v2288_v31  ;;  %v4549_v9 = vcombine.low %v5348_v25, %v5459_v42  ;;  %v2404_v37 = vrot.slane %v2402_v26, 2 }
  0x59   :  { %326 = vrot.lane.b32.xlu1 %v311_v53, %s5196_s17  ;;  %v2313_v53 = vrot.slane %v5370_v38, 1  ;;  %v2359_v38 = vshrl.u32 %v4546_v50, 16  ;;  %v2420_v50 = vrot.slane %v2418_v52, 2 }
  0x5a   :  { %v2383_v25 = vshrl.u32 %v4549_v9, 16  ;;  %v2386_v8 = vshll.u32 %v4549_v9, 16 }
  0x5c   :  { %2294 = vrot.lane.b32.xlu0 %v2244_v0, %s5195_s14  ;;  %v2317_v0 = vrot.slane %v5400_v61, 1  ;;  %v2361_v61 = vrot.slane %v2359_v38, 1  ;;  %v2388_v22 = vrot.slane %v2386_v8, 2  ;;  %v5197_v38 = vmov 1983009808  }
  0x5d   :  { %2296 = vrot.lane.b32.xlu1 %v2251_v4, %s5195_s14  ;;  %v2378_v4 = vshll.u32 %v4548_v33, 16  ;;  %v423_v58 = vunpack.c.l.s4 %v5197_v38 }
  0x5e   :  { %v2365_v15 = vor.u32 %v2364_v62, %v2361_v61  ;;  %v5051_v61 = vld [vmem:[%s6872_s0 + $0xc] sm:$0xff]  }
  0x5f   :  { %v329_v8 = vrot.slane %v5051_v61, 2 }
  0x60   :  { %2298 = vrot.lane.b32.xlu0 %v2258_v16, %s5195_s14  ;;  %v2380_v16 = vrot.slane %v2378_v4, 2 }
  0x61   :  { %2300 = vrot.lane.b32.xlu1 %v2265_v21, %s5195_s14  ;;  %v2385_v21 = vrot.slane %v2383_v25, 1 }
  0x62   :  { %v2381_v31 = vor.u32 %v2380_v16, %v2377_v12  ;;  %v5052_v16 = vld [vmem:[%s6872_s0 + $0x18] sm:$0xff]  }
  0x64   :  { %2302 = vrot.lane.b32.xlu0 %v2272_v30, %s5195_s14  ;;  %v2393_v30 = vrot.slane %v2391_v14, 1 }
  0x65   :  { %2304 = vrot.lane.b32.xlu1 %v2279_v36, %s5195_s14  ;;  %v2389_v36 = vor.u32 %v2388_v22, %v2385_v21  ;;  %v330_v21 = vrot.slane %v5052_v16, 2 }
  0x68   :  { %2306 = vrot.lane.b32.xlu0 %v2286_v44, %s5195_s14  ;;  %v2397_v44 = vor.u32 %v2396_v41, %v2393_v30 }
  0x69   :  { %2308 = vrot.lane.b32.xlu1 %v2293_v45, %s5195_s14  ;;  %v2409_v45 = vrot.slane %v2407_v32, 1 }
  0x6c   :  { %2318 = vrot.lane.b32.xlu0 %v2310_v46, %s5193_s25  ;;  %v2412_v46 = vrot.slane %v2410_v35, 2 }
  0x6d   :  { %2320 = vrot.lane.b32.xlu1 %v2311_v47, %s5193_s25  ;;  %v2405_v47 = vor.u32 %v2404_v37, %v2401_v29 }
  0x70   :  { %2322 = vrot.lane.b32.xlu0 %v2312_v23, %s5193_s25  ;;  %v2417_v23 = vrot.slane %v2415_v40, 1 }
  0x71   :  { %2324 = vrot.lane.b32.xlu1 %v2313_v53, %s5193_s25  ;;  %v2413_v53 = vor.u32 %v2412_v46, %v2409_v45  ;;  %v5053_v45 = vld [vmem:[%s6872_s0 + $0x24] sm:$0xff]  }
  0x72   :  { %v2421_v54 = vor.u32 %v2420_v50, %v2417_v23  ;;  %v331_v46 = vrot.slane %v5053_v45, 2 }
  0x74   :  { %2326 = vrot.lane.b32.xlu0 %v2314_v11, %s5193_s25  ;;  %v388_v11 = vlaneseq }
  0x75   :  { %2328 = vrot.lane.b32.xlu1 %v2315_v59, %s5193_s25 }
  0x76   :  { %v5524_v63 = vshrl.u32 %v388_v11, 7 }
  0x78   :  { %2330 = vrot.lane.b32.xlu0 %v2316_v1, %s5193_s25  ;;  %6904 = vst [vmem:[#allocation12_spill] sm:$0xff] %v5524_v63  ;;  %v5050_v1 = vld [vmem:[%s6872_s0] sm:$0xff]  }
  0x79   :  { %2332 = vrot.lane.b32.xlu1 %v2317_v0, %s5193_s25  ;;  %v424_v0 = vunpack.c.0.s8 %v423_v58  ;;  %v328_v25 = vrot.slane %v5050_v1, 2 }
  0x7b   :  { %v5535_v4 = vsub.s32 %v424_v0, %v5524_v63 }
  0x7c   :  { %2422 = vrot.lane.b32.xlu0 %v2365_v15, %s5196_s17 }
  0x7d   :  { %2424 = vrot.lane.b32.xlu1 %v2373_v20, %s5196_s17  ;;  %6905 = vst [vmem:[#allocation13_spill] sm:$0xff] %v5535_v4 }
  0x80   :  { %2426 = vrot.lane.b32.xlu0 %v2381_v31, %s5196_s17 }
  0x81   :  { %2428 = vrot.lane.b32.xlu1 %v2389_v36, %s5196_s17 }
  0x84   :  { %2430 = vrot.lane.b32.xlu0 %v2397_v44, %s5196_s17 }
  0x85   :  { %2432 = vrot.lane.b32.xlu1 %v2405_v47, %s5196_s17 }
  0x88   :  { %2434 = vrot.lane.b32.xlu0 %v2413_v53, %s5196_s17 }
  0x89   :  { %2436 = vrot.lane.b32.xlu1 %v2421_v54, %s5196_s17 }
  0x9e   :  { %v277_v9 = vpop.permute.xlu1 %276  ;;  %v273_v33 = vpop.permute.xlu0 %272 }
  0xa2   :  { %v275_v59 = vpop.permute.xlu0 %274 }
  0xa3   :  { %v251_v60 = vpop.permute.xlu1 %250 }
  0xa4   :  { %v340_v62 = vsel %vm336_vm0, %v5051_v61, %v251_v60 }
  0xa5   :  { %v357_v14 = vsel %vm353_vm2, %v340_v62, %v275_v59  ;;  %v5566_v62 = vld [vmem:[#allocation2 + $0x134] ss:$24 sps:$4 sm:$0xff]  }
  0xa6   :  { %v249_v2 = vpop.permute.xlu0 %248 }
  0xa7   :  { %v313_v51 = vpop.permute.xlu1 %312  ;;  %v338_v3 = vsel %vm336_vm0, %v5050_v1, %v249_v2  ;;  %v5562_v2 = vld [vmem:[#allocation2 + $0x160] ss:$24 sps:$4 sm:$0xff]  }
  0xa8   :  { %v355_v5 = vsel %vm353_vm2, %v338_v3, %v273_v33 }
  0xa9   :  { %v372_v6 = vsel %vm370_vm1, %v355_v5, %v313_v51 }
  0xaa   :  { %v420_v12 = vcombine.low %v372_v6, %v328_v25  ;;  %v253_v34 = vpop.permute.xlu0 %252  ;;  %v421_v27 = vcombine.high %v372_v6, %v328_v25 }
  0xab   :  { %v315_v15 = vpop.permute.xlu1 %314  ;;  %v342_v17 = vsel %vm336_vm0, %v5052_v16, %v253_v34 }
  0xac   :  { %v428_v19 = vrot.slane %v420_v12, %v5535_v4  ;;  %v374_v20 = vsel %vm370_vm1, %v357_v14, %v315_v15  ;;  %v359_v29 = vsel %vm353_vm2, %v342_v17, %v277_v9  ;;  %v435_v41 = vrot.slane %v421_v27, %v5535_v4  ;;  %v5054_v14 = vld [vmem:[%s6872_s0 + $0x30] sm:$0xff]  }
  0xad   :  { %v437_v22 = vcombine.low %v374_v20, %v329_v8  ;;  %v438_v26 = vcombine.high %v374_v20, %v329_v8  ;;  %v5584_v20 = vld [vmem:[#allocation2 + $0x130] ss:$24 sps:$4 sm:$0xff]  }
  0xae   :  { %v317_v30 = vpop.permute.xlu0 %316  ;;  %v436_v31 = vcombine.high %v428_v19, %v428_v19 }
  0xaf   :  { %v445_v32 = vrot.slane %v437_v22, %v5535_v4  ;;  %v255_v35 = vpop.permute.xlu1 %254  ;;  %v376_v36 = vsel %vm370_vm1, %v359_v29, %v317_v30  ;;  %v452_v47 = vrot.slane %v438_v26, %v5535_v4  ;;  %v5589_v29 = vld [vmem:[#allocation2 + $0x104] ss:$24 sps:$4 sm:$0xff]  }
  0xb0   :  { %v454_v37 = vcombine.low %v376_v36, %v330_v21  ;;  %v562_v40 = vcombine.low %v428_v19, %v436_v31  ;;  %v344_v23 = vsel %vm336_vm0, %v5053_v45, %v255_v35  ;;  %v455_v9 = vcombine.high %v376_v36, %v330_v21  ;;  %v5055_v21 = vld [vmem:[#allocation2 + $0x150] ss:$24 sps:$4 sm:$0xff]   ;;  %v5056_v30 = vld [vmem:[#allocation2 + $0x124] ss:$24 sps:$4 sm:$0xff]   ;;  %v5058_v45 = vld [vmem:[#allocation2 + $0x120] ss:$24 sps:$4 sm:$0xff]  }
  0xb1   :  { %v453_v52 = vcombine.high %v445_v32, %v445_v32  ;;  %v563_v44 = vcombine.low %v435_v41, %v445_v32  ;;  %v332_v19 = vrot.slane %v5054_v14, 2 }
  0xb2   :  { %v462_v50 = vrot.slane %v454_v37, %v5535_v4  ;;  %v279_v53 = vpop.permute.xlu0 %278  ;;  %v570_v54 = vrot.slane %v562_v40, %v5535_v4  ;;  %v469_v5 = vrot.slane %v455_v9, %v5535_v4  ;;  %v5057_v37 = vld [vmem:[%s6872_s0 + $0x3c] sm:$0xff]  }
  0xb3   :  { %v319_v33 = vpop.permute.xlu1 %318  ;;  %v361_v11 = vsel %vm353_vm2, %v344_v23, %v279_v53  ;;  %v577_v38 = vrot.slane %v563_v44, %v5535_v4  ;;  %v580_v58 = vcombine.low %v453_v52, %v452_v47  ;;  %v333_v40 = vrot.slane %v5057_v37, 2  ;;  %v5059_v53 = vld [vmem:[#allocation2 + $0xf4] ss:$24 sps:$4 sm:$0xff]  }
  0xb4   :  { %v470_v59 = vcombine.high %v462_v50, %v462_v50  ;;  %v378_v60 = vsel %vm370_vm1, %v361_v11, %v319_v33 }
  0xb5   :  { %v471_v0 = vcombine.low %v378_v60, %v331_v46  ;;  %v472_v1 = vcombine.high %v378_v60, %v331_v46  ;;  %v5560_v25 = vcombine.high %v570_v54, %v577_v38  ;;  %v5564_v61 = vcombine.low %v570_v54, %v577_v38 }
  0xb6   :  { %v581_v51 = vcombine.low %v462_v50, %v470_v59  ;;  %v257_v3 = vpop.permute.xlu0 %256  ;;  %v588_v12 = vrot.slane %v580_v58, %v5535_v4  ;;  %v5606_v50 = vld [vmem:[#allocation2 + $0x100] ss:$24 sps:$4 sm:$0xff]   ;;  %v5613_v58 = vld [vmem:[#allocation2 + $0xd4] ss:$24 sps:$4 sm:$0xff]  }
  0xb7   :  { %v479_v6 = vrot.slane %v471_v0, %v5535_v4  ;;  %v281_v8 = vpop.permute.xlu1 %280  ;;  %4520 = vmatprep.mubr.msk.bf16.mxu0 %vm336_vm0, %v5560_v25  ;;  %4526 = vmatprep.mubr.msk.bf16.mxu1 %vm336_vm0, %v5560_v25  ;;  %v346_v27 = vsel %vm336_vm0, %v5054_v14, %v257_v3  ;;  %v486_v15 = vrot.slane %v472_v1, %v5535_v4  ;;  %v5060_v3 = vld [vmem:[#allocation2 + $0xf0] ss:$24 sps:$4 sm:$0xff]  }
  0xb8   :  { %v595_v34 = vrot.slane %v581_v51, %v5535_v4  ;;  %1063 = vmatmul.mubr.bf16.vlgmr.msra.gmra.mxu0 %v5564_v61  ;;  %1156 = vmatmul.mubr.bf16.vlgmr.msra.gmra.mxu1 %v5564_v61  ;;  %v363_v32 = vsel %vm353_vm2, %v346_v27, %v281_v8  ;;  %v5623_v51 = vld [vmem:[#allocation2 + $0xd0] ss:$24 sps:$4 sm:$0xff]   ;;  %v5632_v27 = vld [vmem:[#allocation2 + $0xa4] ss:$24 sps:$4 sm:$0xff]  }
  0xb9   :  { %v487_v16 = vcombine.high %v479_v6, %v479_v6  ;;  %v598_v17 = vcombine.low %v469_v5, %v479_v6  ;;  %1217 = vmatpush1.bf16.msra.mxu0 %v5562_v2  ;;  %2756 = vmatpush1.bf16.msra.mxu1 %v5055_v21 }
  0xba   :  { %v259_v22 = vpop.permute.xlu0 %258  ;;  %v5586_v26 = vcombine.high %v588_v12, %v595_v34  ;;  %1218 = vmatprep.subr.bf16.mxu0 %v5566_v62  ;;  %2757 = vmatprep.subr.bf16.mxu1 %v5056_v30  ;;  %v5604_v23 = vcombine.low %v588_v12, %v595_v34  ;;  %v5061_v34 = vld [vmem:[%s6872_s0 + $0x48] sm:$0xff]  }
  0xbb   :  { %v599_v31 = vcombine.low %v487_v16, %v486_v15  ;;  %v321_v41 = vpop.permute.xlu1 %320  ;;  %v606_v52 = vrot.slane %v598_v17, %v5535_v4  ;;  %v348_v46 = vsel %vm336_vm0, %v5057_v37, %v259_v22  ;;  %v334_v15 = vrot.slane %v5061_v34, 2  ;;  %v5062_v16 = vld [vmem:[#allocation2 + $0xc4] ss:$24 sps:$4 sm:$0xff]  }
  0xbc   :  { %v380_v35 = vsel %vm370_vm1, %v363_v32, %v321_v41  ;;  %4521 = vmatprep.mubr.msk.bf16.mxu0 %vm336_vm0, %v5586_v26  ;;  %4527 = vmatprep.mubr.msk.bf16.mxu1 %vm336_vm0, %v5586_v26  ;;  %v5063_v41 = vld [vmem:[#allocation2 + $0xc0] ss:$24 sps:$4 sm:$0xff]  }
  0xbd   :  { %v488_v36 = vcombine.low %v380_v35, %v332_v19  ;;  %v613_v44 = vrot.slane %v599_v31, %v5535_v4  ;;  %1219 = vmatpush1.bf16.msra.mxu0 %v5584_v20  ;;  %2758 = vmatpush1.bf16.msra.mxu1 %v5058_v45  ;;  %v489_v54 = vcombine.high %v380_v35, %v332_v19  ;;  %v5638_v31 = vld [vmem:[#allocation2 + $0xa0] ss:$24 sps:$4 sm:$0xff]  }
  0xbe   :  { %v283_v47 = vpop.permute.xlu0 %282  ;;  %1220 = vmatprep.subr.bf16.mxu0 %v5589_v29  ;;  %2759 = vmatprep.subr.bf16.mxu1 %v5059_v53 }
  0xbf   :  { %v496_v9 = vrot.slane %v488_v36, %v5535_v4  ;;  %v323_v33 = vpop.permute.xlu1 %322  ;;  %v365_v11 = vsel %vm353_vm2, %v348_v46, %v283_v47  ;;  %v5611_v38 = vcombine.high %v606_v52, %v613_v44  ;;  %v503_v5 = vrot.slane %v489_v54, %v5535_v4  ;;  %v5065_v46 = vld [vmem:[%s6872_s0 + $0x54] sm:$0xff]  }
  0xc0   :  { %v382_v59 = vsel %vm370_vm1, %v365_v11, %v323_v33  ;;  %1073 = vmatmul.mubr.bf16.gmra.mxu0 %v5604_v23  ;;  %1166 = vmatmul.mubr.bf16.gmra.mxu1 %v5604_v23  ;;  %v5635_v30 = vcombine.low %v606_v52, %v613_v44  ;;  %v5646_v44 = vld [vmem:[#allocation2 + $0x74] ss:$24 sps:$4 sm:$0xff]   ;;  %v335_v47 = vrot.slane %v5065_v46, 2 }
  0xc1   :  { %v504_v60 = vcombine.high %v496_v9, %v496_v9  ;;  %v505_v0 = vcombine.low %v382_v59, %v333_v40  ;;  %4522 = vmatprep.mubr.msk.bf16.mxu0 %vm336_vm0, %v5611_v38  ;;  %4528 = vmatprep.mubr.msk.bf16.mxu1 %vm336_vm0, %v5611_v38  ;;  %v506_v19 = vcombine.high %v382_v59, %v333_v40  ;;  %v5064_v40 = vld [vmem:[#allocation2 + $0x94] ss:$24 sps:$4 sm:$0xff]   ;;  %v5657_v59 = vld [vmem:[#allocation2 + $0x70] ss:$24 sps:$4 sm:$0xff]  }
  0xc2   :  { %v261_v1 = vpop.permute.xlu0 %260  ;;  %1221 = vmatpush1.bf16.msra.mxu0 %v5606_v50  ;;  %2760 = vmatpush1.bf16.msra.mxu1 %v5060_v3 }
  0xc3   :  { %v616_v6 = vcombine.low %v496_v9, %v504_v60  ;;  %v513_v8 = vrot.slane %v505_v0, %v5535_v4  ;;  %v285_v12 = vpop.permute.xlu1 %284  ;;  %v350_v14 = vsel %vm336_vm0, %v5061_v34, %v261_v1  ;;  %1222 = vmatprep.subr.bf16.mxu0 %v5613_v58  ;;  %2761 = vmatprep.subr.bf16.mxu1 %v5062_v16  ;;  %v5066_v60 = vld [vmem:[#allocation2 + $0x90] ss:$24 sps:$4 sm:$0xff]   ;;  %v5067_v34 = vld [vmem:[#allocation2 + $0x64] ss:$24 sps:$4 sm:$0xff]  }
  0xc4   :  { %v367_v21 = vsel %vm353_vm2, %v350_v14, %v285_v12  ;;  %v520_v54 = vrot.slane %v506_v19, %v5535_v4 }
  0xc5   :  { %v617_v17 = vcombine.low %v503_v5, %v513_v8  ;;  %v624_v32 = vrot.slane %v616_v6, %v5535_v4  ;;  %v521_v45 = vcombine.high %v513_v8, %v513_v8  ;;  %v5664_v5 = vld [vmem:[#allocation2 + $0x44] ss:$24 sps:$4 sm:$0xff]  }
  0xc6   :  { %v325_v22 = vpop.permute.xlu0 %324  ;;  %1223 = vmatpush1.bf16.msra.mxu0 %v5623_v51  ;;  %2762 = vmatpush1.bf16.msra.mxu1 %v5063_v41 }
  0xc7   :  { %v263_v35 = vpop.permute.xlu1 %262  ;;  %v384_v36 = vsel %vm370_vm1, %v367_v21, %v325_v22  ;;  %v631_v37 = vrot.slane %v617_v17, %v5535_v4  ;;  %1224 = vmatprep.subr.bf16.mxu0 %v5632_v27  ;;  %2763 = vmatprep.subr.bf16.mxu1 %v5064_v40  ;;  %v634_v6 = vcombine.low %v521_v45, %v520_v54  ;;  %v5673_v21 = vld [vmem:[#allocation2 + $0x40] ss:$24 sps:$4 sm:$0xff]   ;;  %v5680_v40 = vld [vmem:[#allocation2 + $0x14] ss:$24 sps:$4 sm:$0xff]  }
  0xc8   :  { %v522_v52 = vcombine.low %v384_v36, %v334_v15  ;;  %1083 = vmatmul.mubr.bf16.gmra.mxu0 %v5635_v30  ;;  %1176 = vmatmul.mubr.bf16.gmra.mxu1 %v5635_v30  ;;  %v352_v9 = vsel %vm336_vm0, %v5065_v46, %v263_v35  ;;  %v523_v0 = vcombine.high %v384_v36, %v334_v15  ;;  %v5068_v22 = vld [vmem:[#allocation2 + $0x60] ss:$24 sps:$4 sm:$0xff]   ;;  %v5069_v45 = vld [vmem:[#allocation2 + $0x34] ss:$24 sps:$4 sm:$0xff]  }
  0xc9   :  { %v5651_v53 = vcombine.high %v624_v32, %v631_v37  ;;  %v5670_v19 = vcombine.low %v624_v32, %v631_v37  ;;  %v642_v37 = vrot.slane %v634_v6, %v5535_v4 }
  0xca   :  { %v530_v33 = vrot.slane %v522_v52, %v5535_v4  ;;  %v287_v11 = vpop.permute.xlu0 %286  ;;  %1225 = vmatpush1.bf16.msra.mxu0 %v5638_v31  ;;  %2764 = vmatpush1.bf16.msra.mxu1 %v5066_v60  ;;  %v537_v41 = vrot.slane %v523_v0, %v5535_v4 }
  0xcb   :  { %v327_v1 = vpop.permute.xlu1 %326  ;;  %v369_v3 = vsel %vm353_vm2, %v352_v9, %v287_v11  ;;  %4523 = vmatprep.mubr.msk.bf16.mxu0 %vm336_vm0, %v5651_v53  ;;  %4529 = vmatprep.mubr.msk.bf16.mxu1 %vm336_vm0, %v5651_v53  ;;  %v5070_v11 = vld [vmem:[#allocation2 + $0x30] ss:$24 sps:$4 sm:$0xff]  }
  0xcc   :  { %v538_v8 = vcombine.high %v530_v33, %v530_v33  ;;  %v386_v12 = vsel %vm370_vm1, %v369_v3, %v327_v1  ;;  %1226 = vmatprep.subr.bf16.mxu0 %v5646_v44  ;;  %2765 = vmatprep.subr.bf16.mxu1 %v5067_v34  ;;  %v5697_v1 = vld [vmem:[#allocation2 + $0x1c4] ss:$24 sps:$4 sm:$0xff]  }
  0xcd   :  { %v539_v14 = vcombine.low %v386_v12, %v335_v47  ;;  %v540_v15 = vcombine.high %v386_v12, %v335_v47  ;;  %v5071_v3 = vld [vmem:[#allocation2 + $0x4] ss:$24 sps:$4 sm:$0xff]  }
  0xce   :  { %v635_v16 = vcombine.low %v530_v33, %v538_v8  ;;  %v5668_v17 = vpop.permute.xlu0 %2294  ;;  %1227 = vmatpush1.bf16.msra.mxu0 %v5657_v59  ;;  %2766 = vmatpush1.bf16.msra.mxu1 %v5068_v22  ;;  %v5692_v33 = vld [vmem:[#allocation2 + $0x10] ss:$24 sps:$4 sm:$0xff]   ;;  %v5718_v22 = vld [vmem:[#allocation2 + $0x194] ss:$24 sps:$4 sm:$0xff]  }
  0xcf   :  { %v547_v35 = vrot.slane %v539_v14, %v5535_v4  ;;  %v5677_v36 = vpop.permute.xlu1 %2296  ;;  %1228 = vmatprep.subr.bf16.mxu0 %v5664_v5  ;;  %2767 = vmatprep.subr.bf16.mxu1 %v5069_v45  ;;  %v554_v52 = vrot.slane %v540_v15, %v5535_v4  ;;  %v5710_v14 = vld [vmem:[#allocation2 + $0x1c0] ss:$24 sps:$4 sm:$0xff]  }
  0xd0   :  { %v649_v32 = vrot.slane %v635_v16, %v5535_v4  ;;  %1093 = vmatmul.mubr.bf16.gmra.mxu0 %v5670_v19  ;;  %1186 = vmatmul.mubr.bf16.gmra.mxu1 %v5670_v19 }
  0xd1   :  { %v555_v46 = vcombine.high %v547_v35, %v547_v35  ;;  %v652_v47 = vcombine.low %v537_v41, %v547_v35  ;;  %v5730_v41 = vld [vmem:[#allocation2 + $0x190] ss:$24 sps:$4 sm:$0xff]  }
  0xd2   :  { %v5687_v54 = vpop.permute.xlu0 %2298  ;;  %v5689_v9 = vcombine.high %v642_v37, %v649_v32  ;;  %1229 = vmatpush1.bf16.msra.mxu0 %v5673_v21  ;;  %2768 = vmatpush1.bf16.msra.mxu1 %v5070_v11  ;;  %v5707_v34 = vcombine.low %v642_v37, %v649_v32  ;;  %v5072_v37 = vld [vmem:[#allocation2 + $0x15c] ss:$24 sps:$4 sm:$0xff]  }
  0xd3   :  { %v653_v60 = vcombine.low %v555_v46, %v554_v52  ;;  %v5694_v0 = vpop.permute.xlu1 %2300  ;;  %1230 = vmatprep.subr.bf16.mxu0 %v5680_v40  ;;  %2769 = vmatprep.subr.bf16.mxu1 %v5071_v3  ;;  %v660_v6 = vrot.slane %v652_v47, %v5535_v4  ;;  %v5198_v46 = vmov 1966171168  }
  0xd4   :  { %4524 = vmatprep.mubr.msk.bf16.mxu0 %vm336_vm0, %v5689_v9  ;;  %4530 = vmatprep.mubr.msk.bf16.mxu1 %vm336_vm0, %v5689_v9  ;;  %v2520_v47 = vunpack.c.l.s4 %v5198_v46 }
  0xd5   :  { %v667_v8 = vrot.slane %v653_v60, %v5535_v4 }
  0xd6   :  { %v5705_v12 = vpop.permute.xlu0 %2302  ;;  %1231 = vmatpush1.bf16.msra.mxu0 %v5692_v33  ;;  %2770 = vmatpush1.bf16.msra.mxu1 %v5411_v7  ;;  %v2521_v60 = vunpack.c.0.s8 %v2520_v47 }
  0xd7   :  { %v5713_v15 = vpop.permute.xlu1 %2304  ;;  %v5715_v16 = vcombine.high %v660_v6, %v667_v8  ;;  %1244 = vmatprep.subr.bf16.mxu0 %v5697_v1  ;;  %2783 = vmatprep.subr.bf16.mxu1 %v5413_v10  ;;  %v5737_v45 = vcombine.low %v660_v6, %v667_v8 }
  0xd8   :  { %1103 = vmatmul.mubr.bf16.gmra.mxu0 %v5707_v34  ;;  %1196 = vmatmul.mubr.bf16.gmra.mxu1 %v5707_v34 }
  0xd9   :  { %4525 = vmatprep.mubr.msk.bf16.mxu0 %vm336_vm0, %v5715_v16  ;;  %4531 = vmatprep.mubr.msk.bf16.mxu1 %vm336_vm0, %v5715_v16 }
  0xda   :  { %v5727_v7 = vpop.permute.xlu0 %2306  ;;  %1245 = vmatpush2.bf16.msra.mxu0 %v5710_v14  ;;  %2784 = vmatpush2.bf16.msra.mxu1 %v5422_v24 }
  0xdb   :  { %v5733_v35 = vpop.permute.xlu1 %2308  ;;  %1246 = vmatprep.subr.bf16.mxu0 %v5718_v22  ;;  %2785 = vmatprep.subr.bf16.mxu1 %v5425_v28 }
  0xde   :  { %v2319_v10 = vpop.permute.xlu0 %2318  ;;  %1247 = vmatpush2.bf16.msra.mxu0 %v5730_v41  ;;  %2786 = vmatpush2.bf16.msra.mxu1 %v5432_v39  ;;  %v4554_v39 = vcombine.low %v5454_v49, %v5454_v49  ;;  %v5073_v49 = vld [vmem:[%s6872_s0 + $0x4] sm:$0xc] }
  0xdf   :  { %v2321_v32 = vpop.permute.xlu1 %2320  ;;  %2841 = vmatprep.subr.bf16.mxu0 %v5435_v43  ;;  %2798 = vmatprep.subr.bf16.mxu1 %v5072_v37  ;;  %v4555_v43 = vcombine.low %v5449_v48, %v5449_v48  ;;  %v2456_v48 = vsel %vm336_vm0, %v5073_v49, %v5668_v17  ;;  %v5780_v37 = vsub.s32 %v2521_v60, %v5524_v63 }
  0xe0   :  { %1113 = vmatmul.mubr.bf16.gmra.mxu0 %v5737_v45  ;;  %1206 = vmatmul.mubr.bf16.gmra.mxu1 %v5737_v45  ;;  %v2446_v6 = vrot.slane %v4554_v39, 6  ;;  %v2479_v8 = vsel %vm353_vm2, %v2456_v48, %v2319_v10  ;;  %v4559_v17 = vcombine.low %v5477_v55, %v5477_v55  ;;  %v4558_v39 = vcombine.low %v5482_v57, %v5482_v57  ;;  %v5075_v55 = vld [vmem:[%s6872_s0 + $0x1c] sm:$0xc]  ;;  %v5076_v57 = vld [vmem:[%s6872_s0 + $0x28] sm:$0xc] }
  0xe1   :  { %4532 = vmatprep.mubr.msk.bf16.mxu0 %vm336_vm0, %v5560_v25 }
  0xe2   :  { %v2323_v24 = vpop.permute.xlu0 %2322 }
  0xe3   :  { %v2325_v28 = vpop.permute.xlu1 %2324 }
  0xe6   :  { %v5746_v52 = vpop.permute.xlu0 %2326 }
  0xe7   :  { %v5748_v11 = vpop.permute.xlu1 %2328 }
  0xe8   :  { %1249 = vmatmul.mubr.bf16.vlgmr.msra.gmra.mxu0 %v5564_v61  ;;  %v4556_v61 = vcombine.low %v5464_v18, %v5464_v18 }
  0xe9   :  { %4533 = vmatprep.mubr.msk.bf16.mxu0 %vm336_vm0, %v5586_v26  ;;  %2842 = vmatpush1.bf16.msra.mxu0 %v5562_v2  ;;  %v2447_v26 = vrot.slane %v4555_v43, 6  ;;  %v4557_v2 = vcombine.low %v5459_v42, %v5459_v42 }
  0xea   :  { %v5758_v25 = vpop.permute.xlu0 %2330  ;;  %2843 = vmatprep.subr.bf16.mxu0 %v5566_v62  ;;  %v5074_v62 = vld [vmem:[%s6872_s0 + $0x10] sm:$0xc]  ;;  %v2448_v43 = vrot.slane %v4556_v61, 6 }
  0xeb   :  { %v5761_v3 = vpop.permute.xlu1 %2332  ;;  %v2459_v18 = vsel %vm336_vm0, %v5074_v62, %v5677_v36  ;;  %v2449_v60 = vrot.slane %v4557_v2, 6  ;;  %v2450_v2 = vrot.slane %v4558_v39, 6 }
  0xec   :  { %v2481_v42 = vsel %vm353_vm2, %v2459_v18, %v2321_v32 }
  0xed   :  { %2844 = vmatpush1.bf16.msra.mxu0 %v5584_v20 }
  0xee   :  { %v2423_v46 = vpop.permute.xlu0 %2422  ;;  %2845 = vmatprep.subr.bf16.mxu0 %v5589_v29  ;;  %v2462_v29 = vsel %vm336_vm0, %v5075_v55, %v5687_v54  ;;  %v2451_v54 = vrot.slane %v4559_v17, 6  ;;  %v4561_v17 = vcombine.low %v5497_v13, %v5497_v13 }
  0xef   :  { %v2425_v20 = vpop.permute.xlu1 %2424  ;;  %v2495_v47 = vsel %vm370_vm1, %v2479_v8, %v2423_v46 }
  0xf0   :  { %v2497_v36 = vsel %vm370_vm1, %v2481_v42, %v2425_v20  ;;  %v2518_v10 = vcombine.low %v2495_v47, %v2446_v6  ;;  %1259 = vmatmul.mubr.bf16.gmra.mxu0 %v5604_v23  ;;  %v2465_v23 = vsel %vm336_vm0, %v5076_v57, %v5694_v0  ;;  %v2483_v6 = vsel %vm353_vm2, %v2462_v29, %v2323_v24  ;;  %v5078_v42 = vld [vmem:[%s6872_s0 + $0x40] sm:$0xc] }
  0xf1   :  { %v2534_v32 = vcombine.low %v2497_v36, %v2447_v26  ;;  %4534 = vmatprep.mubr.msk.bf16.mxu0 %vm336_vm0, %v5611_v38  ;;  %2846 = vmatpush1.bf16.msra.mxu0 %v5606_v50  ;;  %v2485_v38 = vsel %vm353_vm2, %v2465_v23, %v2325_v28  ;;  %v4560_v24 = vcombine.low %v5506_v56, %v5506_v56 }
  0xf2   :  { %v2525_v61 = vrot.slane %v2518_v10, %v5780_v37  ;;  %v2427_v49 = vpop.permute.xlu0 %2426  ;;  %2847 = vmatprep.subr.bf16.mxu0 %v5613_v58  ;;  %v5077_v58 = vld [vmem:[%s6872_s0 + $0x34] sm:$0xc]  ;;  %v2471_v56 = vsel %vm336_vm0, %v5078_v42, %v5713_v15 }
  0xf3   :  { %v2541_v48 = vrot.slane %v2534_v32, %v5780_v37  ;;  %v2429_v50 = vpop.permute.xlu1 %2428  ;;  %v2499_v26 = vsel %vm370_vm1, %v2483_v6, %v2427_v49  ;;  %v2468_v28 = vsel %vm336_vm0, %v5077_v58, %v5705_v12  ;;  %v2489_v13 = vsel %vm353_vm2, %v2471_v56, %v5748_v11  ;;  %v5088_v42 = vld [vmem:[#allocation2 + $0x9c] ss:$24 sps:$4 sm:$0xff]   ;;  %v5089_v56 = vld [vmem:[#allocation2 + $0x98] ss:$24 sps:$4 sm:$0xff]  }
  0xf4   :  { %v2532_v62 = vrot.slane %v2525_v61, %v5780_v37  ;;  %v2501_v0 = vsel %vm370_vm1, %v2485_v38, %v2429_v50  ;;  %v2550_v18 = vcombine.low %v2499_v26, %v2448_v43  ;;  %v2487_v20 = vsel %vm353_vm2, %v2468_v28, %v5746_v52 }
  0xf5   :  { %v2548_v8 = vrot.slane %v2541_v48, %v5780_v37  ;;  %v2566_v46 = vcombine.low %v2501_v0, %v2449_v60  ;;  %2848 = vmatpush1.bf16.msra.mxu0 %v5623_v51  ;;  %v2452_v52 = vrot.slane %v4560_v24, 6  ;;  %v2453_v60 = vrot.slane %v4561_v17, 6  ;;  %v5086_v17 = vld [vmem:[#allocation2 + $0xcc] ss:$24 sps:$4 sm:$0xff]  }
  0xf6   :  { %v2557_v12 = vrot.slane %v2550_v18, %v5780_v37  ;;  %v2431_v47 = vpop.permute.xlu0 %2430  ;;  %2849 = vmatprep.subr.bf16.mxu0 %v5632_v27  ;;  %v5079_v27 = vld [vmem:[%s6872_s0 + $0x4c] sm:$0xc] }
  0xf7   :  { %v4562_v39 = vcombine.high %v2532_v62, %v2548_v8  ;;  %v2573_v51 = vrot.slane %v2566_v46, %v5780_v37  ;;  %v2433_v36 = vpop.permute.xlu1 %2432  ;;  %v2503_v10 = vsel %vm370_vm1, %v2487_v20, %v2431_v47  ;;  %v2474_v11 = vsel %vm336_vm0, %v5079_v27, %v5727_v7  ;;  %v5091_v20 = vld [vmem:[#allocation2 + $0x68] ss:$24 sps:$4 sm:$0xff]   ;;  %v5093_v47 = vld [vmem:[#allocation2 + $0x38] ss:$24 sps:$4 sm:$0xff]  }
  0xf8   :  { %v2564_v43 = vrot.slane %v2557_v12, %v5780_v37  ;;  %v2505_v15 = vsel %vm370_vm1, %v2489_v13, %v2433_v36  ;;  %v2582_v55 = vcombine.low %v2503_v10, %v2450_v2  ;;  %1269 = vmatmul.mubr.bf16.gmra.mxu0 %v5635_v30  ;;  %v5080_v30 = vld [vmem:[%s6872_s0 + $0x58] sm:$0xc]  ;;  %v2491_v23 = vsel %vm353_vm2, %v2474_v11, %v5758_v25  ;;  %v5092_v12 = vld [vmem:[#allocation2 + $0x3c] ss:$24 sps:$4 sm:$0xff]   ;;  %v5094_v13 = vld [vmem:[#allocation2 + $0xc] ss:$24 sps:$4 sm:$0xff]  }
  0xf9   :  { %v2580_v29 = vrot.slane %v2573_v51, %v5780_v37  ;;  %v2598_v32 = vcombine.low %v2505_v15, %v2451_v54  ;;  %4535 = vmatprep.mubr.msk.bf16.mxu0 %vm336_vm0, %v5651_v53  ;;  %2850 = vmatpush1.bf16.msra.mxu0 %v5638_v31  ;;  %v2477_v57 = vsel %vm336_vm0, %v5080_v30, %v5733_v35  ;;  %v5096_v51 = vld [vmem:[#allocation2 + $0x1bc] ss:$24 sps:$4 sm:$0xff]   ;;  %v5097_v36 = vld [vmem:[#allocation2 + $0x1b8] ss:$24 sps:$4 sm:$0xff]   ;;  %v5098_v10 = vld [vmem:[#allocation2 + $0x18c] ss:$24 sps:$4 sm:$0xff]  }
  0xfa   :  { %v2589_v7 = vrot.slane %v2582_v55, %v5780_v37  ;;  %v2435_v6 = vpop.permute.xlu0 %2434  ;;  %2851 = vmatprep.subr.bf16.mxu0 %v5646_v44  ;;  %v2493_v53 = vsel %vm353_vm2, %v2477_v57, %v5761_v3  ;;  %v2671_v25 = vrot.slane %v4562_v39, %v5780_v37  ;;  %v5095_v39 = vld [vmem:[#allocation2 + $0x8] ss:$24 sps:$4 sm:$0xff]   ;;  %v5896_v15 = vsub.s32 0, %v5524_v63 }
  0xfb   :  { %v4563_v61 = vcombine.high %v2564_v43, %v2580_v29  ;;  %v2605_v31 = vrot.slane %v2598_v32, %v5780_v37  ;;  %v2437_v49 = vpop.permute.xlu1 %2436  ;;  %v2507_v54 = vsel %vm370_vm1, %v2491_v23, %v2435_v6  ;;  %v5099_v43 = vld [vmem:[#allocation2 + $0x188] ss:$24 sps:$4 sm:$0xff]   ;;  %v6882_v55 = vsub.s32 1, %v5524_v63 }
  0xfc   :  { %v2596_v38 = vrot.slane %v2589_v7, %v5780_v37  ;;  %v2509_v35 = vsel %vm370_vm1, %v2493_v53, %v2437_v49  ;;  %v2614_v48 = vcombine.low %v2507_v54, %v2452_v52  ;;  %6906 = vst [vmem:[#allocation14_spill] sm:$0xff] %v5896_v15  ;;  %v135_v52 = vld [vmem:[%s6874_s2] sm:$0x3f]  ;;  %v5903_v27 = vsub.s32 2, %v5524_v63 }
  0xfd   :  { %v2678_v50 = vrot.slane %v4563_v61, %v5780_v37  ;;  %v2612_v44 = vrot.slane %v2605_v31, %v5780_v37  ;;  %v2630_v26 = vcombine.low %v2509_v35, %v2453_v60  ;;  %2852 = vmatpush1.bf16.msra.mxu0 %v5657_v59  ;;  %v402_v11 = vsub.s32 3, %v5524_v63 }
  0xfe   :  { %v2621_v3 = vrot.slane %v2614_v48, %v5780_v37  ;;  %2853 = vmatprep.subr.bf16.mxu0 %v5664_v5  ;;  %6907 = vst [vmem:[#allocation15_spill] sm:$0xff] %v5903_v27  ;;  %v5907_v29 = vrot.slane %v135_v52, %v5896_v15  ;;  %v5911_v32 = vrot.slane %v135_v52, %v6882_v55  ;;  %v406_v61 = vsub.s32 4, %v5524_v63  ;;  %v4884_v55 = vld [vmem:[#allocation5 + $0x174] ss:$8 sps:$4 sm:$0xff]  }
  0xff   :  { %v2693_v2 = vcombine.low %v2671_v25, %v2678_v50  ;;  %v4564_v62 = vcombine.high %v2596_v38, %v2612_v44  ;;  %v2637_v0 = vrot.slane %v2630_v26, %v5780_v37  ;;  %v2694_v18 = vcombine.high %v2671_v25, %v2678_v50 }
 0x100   :  { %v2628_v24 = vrot.slane %v2621_v3, %v5780_v37  ;;  %1279 = vmatmul.mubr.bf16.gmra.mxu0 %v5670_v19  ;;  %v5914_v60 = vrot.slane %v135_v52, %v5903_v27  ;;  %v5916_v30 = vrot.slane %v135_v52, %v402_v11  ;;  %v557_v57 = vcombine.high %v5907_v29, %v5911_v32 }
 0x101   :  { %v2644_v58 = vrot.slane %v2637_v0, %v5780_v37  ;;  %4536 = vmatprep.mubr.msk.bf16.mxu0 %vm336_vm0, %v5689_v9  ;;  %2854 = vmatpush1.bf16.msra.mxu0 %v5673_v21  ;;  %v2685_v5 = vrot.slane %v4564_v62, %v5780_v37  ;;  %v2710_v46 = vrot.slane %v2694_v18, %v5780_v37  ;;  %v410_v31 = vsub.s32 5, %v5524_v63 }
 0x102   :  { %2855 = vmatprep.subr.bf16.mxu0 %v5680_v40  ;;  %v2703_v40 = vrot.slane %v2693_v2, %v5780_v37  ;;  %v559_v6 = vcombine.high %v5914_v60, %v5916_v30  ;;  %v5924_v53 = vcombine.low %v5907_v29, %v5911_v32  ;;  %v5930_v49 = vcombine.low %v5907_v29, %v5907_v29 }
 0x103   :  { %v4565_v59 = vcombine.high %v2628_v24, %v2644_v58  ;;  %v5934_v54 = vcombine.low %v5914_v60, %v5914_v60  ;;  %v5938_v48 = vcombine.low %v5911_v32, %v5911_v32  ;;  %v5942_v25 = vcombine.low %v5916_v30, %v5916_v30 }
 0x104   :  { %6908 = vst [vmem:[#allocation16_spill] sm:$0xff] %v5924_v53  ;;  %v5945_v50 = vcombine.low %v557_v57, %v5907_v29  ;;  %v5949_v44 = vcombine.low %v5914_v60, %v5916_v30  ;;  %v5956_v24 = vcombine.low %v559_v6, %v5914_v60  ;;  %v5960_v58 = vcombine.high %v5911_v32, %v5924_v53 }
 0x105   :  { %v2692_v28 = vrot.slane %v4565_v59, %v5780_v37  ;;  %2856 = vmatpush1.bf16.msra.mxu0 %v5692_v33  ;;  %v5962_v59 = vrot.slane %v135_v52, %v406_v61 }
 0x106   :  { %2869 = vmatprep.subr.bf16.mxu0 %v5697_v1  ;;  %6909 = vst [vmem:[#allocation17_spill] sm:$0xff] %v5949_v44 }
 0x107   :  { %v2695_v8 = vcombine.low %v2685_v5, %v2692_v28  ;;  %v2696_v19 = vcombine.high %v2685_v5, %v2692_v28  ;;  %v5964_v5 = vrot.slane %v135_v52, %v410_v31 }
 0x108   :  { %1289 = vmatmul.mubr.bf16.gmra.mxu0 %v5707_v34  ;;  %v5081_v34 = vld [vmem:[#allocation2 + $0x158] ss:$24 sps:$4 sm:$0xff]  }
 0x109   :  { %4537 = vmatprep.mubr.msk.bf16.mxu0 %vm336_vm0, %v5715_v16  ;;  %v2724_v21 = vrot.slane %v2696_v19, %v5780_v37  ;;  %v2717_v9 = vrot.slane %v2695_v8, %v5780_v37  ;;  %2870 = vmatpush2.bf16.msra.mxu0 %v5710_v14  ;;  %v5082_v16 = vld [vmem:[#allocation2 + $0x12c] ss:$24 sps:$4 sm:$0xff]   ;;  %v5083_v14 = vld [vmem:[#allocation2 + $0x128] ss:$24 sps:$4 sm:$0xff]   ;;  %v5085_v37 = vld [vmem:[#allocation2 + $0xf8] ss:$24 sps:$4 sm:$0xff]  }
 0x10a   :  { %2871 = vmatprep.subr.bf16.mxu0 %v5718_v22  ;;  %v5084_v22 = vld [vmem:[#allocation2 + $0xfc] ss:$24 sps:$4 sm:$0xff]  }
 0x10b   :  { %v2726_v33 = vcombine.low %v2710_v46, %v2724_v21  ;;  %v2725_v1 = vcombine.low %v2703_v40, %v2717_v9  ;;  %v5968_v9 = vcombine.high %v5916_v30, %v5949_v44 }
 0x10d   :  { %4568 = vmatprep.mubr.msk.bf16.mxu1 %vm336_vm0, %v2726_v33  ;;  %2872 = vmatpush2.bf16.msra.mxu0 %v5730_v41  ;;  %v5087_v41 = vld [vmem:[#allocation2 + $0xc8] ss:$24 sps:$4 sm:$0xff]  }
 0x10e   :  { %2788 = vmatmul.mubr.bf16.vlgmr.msra.gmra.mxu1 %v2725_v1  ;;  %4049 = vmatprep.subr.bf16.mxu0 %v4884_v55 }
 0x10f   :  { %2799 = vmatpush1.bf16.msra.mxu1 %v5081_v34  ;;  %4569 = vmatprep.mubr.msk.bf16.mxu1 %vm336_vm0, %v2726_v33 }
 0x110   :  { %1299 = vmatmul.mubr.bf16.gmra.mxu0 %v5737_v45  ;;  %2800 = vmatprep.subr.bf16.mxu1 %v5082_v16  ;;  %v5090_v45 = vld [vmem:[#allocation2 + $0x6c] ss:$24 sps:$4 sm:$0xff]  }
 0x111   :  { %4570 = vmatprep.mubr.msk.bf16.mxu0 %vm336_vm0, %v2726_v33  ;;  %v561_v33 = vcombine.high %v5962_v59, %v5964_v5 }
 0x113   :  { %2801 = vmatpush1.bf16.msra.mxu1 %v5083_v14 }
 0x114   :  { %2802 = vmatprep.subr.bf16.mxu1 %v5084_v22 }
 0x117   :  { %2803 = vmatpush1.bf16.msra.mxu1 %v5085_v37 }
 0x118   :  { %2874 = vmatmul.mubr.bf16.vlgmr.msra.gmra.mxu0 %v2725_v1  ;;  %2804 = vmatprep.subr.bf16.mxu1 %v5086_v17 }
 0x11b   :  { %2805 = vmatpush1.bf16.msra.mxu1 %v5087_v41 }
 0x11c   :  { %2806 = vmatprep.subr.bf16.mxu1 %v5088_v42 }
 0x11f   :  { %2807 = vmatpush1.bf16.msra.mxu1 %v5089_v56 }
 0x120   :  { %2808 = vmatprep.subr.bf16.mxu1 %v5090_v45 }
 0x123   :  { %2809 = vmatpush1.bf16.msra.mxu1 %v5091_v20 }
 0x124   :  { %2810 = vmatprep.subr.bf16.mxu1 %v5092_v12 }
 0x127   :  { %2811 = vmatpush1.bf16.msra.mxu1 %v5093_v47 }
 0x128   :  { %2812 = vmatprep.subr.bf16.mxu1 %v5094_v13 }
 0x12b   :  { %2813 = vmatpush1.bf16.msra.mxu1 %v5095_v39 }
 0x12c   :  { %2826 = vmatprep.subr.bf16.mxu1 %v5096_v51 }
 0x12f   :  { %2827 = vmatpush2.bf16.msra.mxu1 %v5097_v36 }
 0x130   :  { %2828 = vmatprep.subr.bf16.mxu1 %v5098_v10 }
 0x133   :  { %2829 = vmatpush2.bf16.msra.mxu1 %v5099_v43 }
 0x136   :  { %2831 = vmatmul.mubr.bf16.vlgmr.msra.gmra.mxu1 %v2725_v1  ;;  %v560_v1 = vcombine.low %v5962_v59, %v5964_v5 }
 0x178   :  { %v1064_v23 = vpop.f32.mrf.mxu0  ;;  %v1157_v7 = vpop.f32.mrf.mxu1 }
 0x179   :  { %v1065_v26 = vadd.f32 %v1064_v23, %v5907_v29  ;;  %v1158_v3 = vadd.f32 %v1157_v7, %v5914_v60 }
 0x17a   :  { %v1066_v38 = vpop.f32.mrf.mxu0  ;;  %v1159_v35 = vpop.f32.mrf.mxu1 }
 0x17b   :  { %v1067_v2 = vadd.f32 %v1066_v38, %v5911_v32  ;;  %v1160_v62 = vadd.f32 %v1159_v35, %v5916_v30 }
 0x17c   :  { %v1068_v0 = vpop.f32.mrf.mxu0  ;;  %v1161_v18 = vpop.f32.mrf.mxu1 }
 0x17d   :  { %v1381_v28 = vcombine.low %v1065_v26, %v1067_v2  ;;  %v1382_v8 = vcombine.high %v1065_v26, %v1067_v2  ;;  %v1383_v19 = vcombine.low %v1158_v3, %v1160_v62  ;;  %v1384_v46 = vcombine.high %v1158_v3, %v1160_v62 }
 0x17e   :  { %v1070_v21 = vpop.f32.mrf.mxu0  ;;  %v1163_v40 = vpop.f32.mrf.mxu1  ;;  %v1069_v37 = vadd.f32 %v5930_v49, %v1068_v0  ;;  %v1162_v17 = vadd.f32 %v5934_v54, %v1161_v18 }
 0x17f   :  { %v1525_v34 = vmax.f32 %v1381_v28, 0.0  ;;  %v1528_v16 = vmax.f32 %v1382_v8, 0.0  ;;  %v1526_v14 = vmax.f32 %v1383_v19, 0.0  ;;  %v1529_v22 = vmax.f32 %v1384_v46, 0.0 }
 0x180   :  { %v1071_v41 = vadd.f32 %v5938_v48, %v1070_v21  ;;  %v1164_v42 = vadd.f32 %v5942_v25, %v1163_v40  ;;  %v1074_v56 = vpop.f32.mrf.mxu0  ;;  %v1167_v45 = vpop.f32.mrf.mxu1 }
 0x181   :  { %v1669_v20 = vcombine.low %v1525_v34, %v1528_v16  ;;  %v1670_v12 = vcombine.high %v1525_v34, %v1528_v16  ;;  %v1671_v47 = vcombine.low %v1526_v14, %v1529_v22  ;;  %v1672_v13 = vcombine.high %v1526_v14, %v1529_v22 }
 0x182   :  { %v1387_v39 = vcombine.low %v1069_v37, %v1071_v41  ;;  %v1388_v51 = vcombine.high %v1069_v37, %v1071_v41  ;;  %v1389_v36 = vcombine.low %v1162_v17, %v1164_v42  ;;  %v1390_v10 = vcombine.high %v1162_v17, %v1164_v42  ;;  %v1076_v43 = vpop.f32.mrf.mxu0  ;;  %v1169_v52 = vpop.f32.mrf.mxu1 }
 0x183   :  { %v1075_v11 = vadd.f32 %v5945_v50, %v1074_v56  ;;  %v1168_v57 = vadd.f32 %v5956_v24, %v1167_v45  ;;  %v1077_v23 = vadd.f32 %v5960_v58, %v1076_v43  ;;  %v1170_v7 = vadd.f32 %v5968_v9, %v1169_v52 }
 0x184   :  { %v1531_v6 = vmax.f32 %v1387_v39, 0.0  ;;  %v1534_v61 = vmax.f32 %v1388_v51, 0.0  ;;  %v1532_v31 = vmax.f32 %v1389_v36, 0.0  ;;  %v5982_v38 = vmax.f32 %v1390_v10, 0.0  ;;  %v5984_v35 = vpop.f32.mrf.mxu0  ;;  %v5992_v17 = vpop.f32.mrf.mxu1 }
 0x185   :  { %v1393_v26 = vcombine.low %v1075_v11, %v1077_v23  ;;  %v1394_v3 = vcombine.high %v1075_v11, %v1077_v23  ;;  %v1395_v2 = vcombine.low %v1168_v57, %v1170_v7  ;;  %v1396_v62 = vcombine.high %v1168_v57, %v1170_v7 }
 0x186   :  { %v1675_v0 = vcombine.high %v1531_v6, %v1531_v6  ;;  %v1814_v18 = vsel %vm1813_vm3, %v1531_v6, -inf  ;;  %v1676_v28 = vcombine.high %v1532_v31, %v1532_v31  ;;  %v1830_v8 = vsel %vm1813_vm3, %v1532_v31, -inf  ;;  %v5988_v19 = vpop.f32.mrf.mxu0  ;;  %v1173_v31 = vpop.f32.mrf.mxu1 }
 0x187   :  { %v1815_v46 = vmax.f32 %v1669_v20, %v1814_v18  ;;  %v1831_v21 = vmax.f32 %v1671_v47, %v1830_v8  ;;  %v1537_v40 = vmax.f32 %v1393_v26, 0.0  ;;  %v1540_v34 = vmax.f32 %v1394_v3, 0.0 }
 0x188   :  { %v1822_v16 = vsel %vm1813_vm3, %v1675_v0, -inf  ;;  %v1838_v14 = vsel %vm1813_vm3, %v1676_v28, -inf  ;;  %v1538_v22 = vmax.f32 %v1395_v2, 0.0  ;;  %v1541_v37 = vmax.f32 %v1396_v62, 0.0  ;;  %v5994_v41 = vpop.f32.mrf.mxu0 }
 0x189   :  { %v1816_v42 = vrot.slane %v1815_v46, 4  ;;  %v1823_v56 = vmax.f32 %v1670_v12, %v1822_v16  ;;  %v1832_v45 = vrot.slane %v1831_v21, 4  ;;  %v1839_v39 = vmax.f32 %v1672_v13, %v1838_v14 }
 0x18a   :  { %v1678_v51 = vcombine.low %v1534_v61, %v1537_v40  ;;  %v1679_v36 = vcombine.high %v1534_v61, %v1537_v40  ;;  %v1684_v20 = vcombine.high %v1540_v34, %v1540_v34  ;;  %v1862_v47 = vsel %vm1813_vm3, %v1540_v34, -inf  ;;  %v5997_v10 = vpop.f32.mrf.mxu0 }
 0x18b   :  { %v1817_v43 = vmax.f32 %v1815_v46, %v1816_v42  ;;  %v1824_v52 = vrot.slane %v1823_v56, 4  ;;  %v1833_v11 = vmax.f32 %v1831_v21, %v1832_v45  ;;  %v1840_v57 = vrot.slane %v1839_v39, 4  ;;  %v1177_v42 = vpop.f32.mrf.mxu1 }
 0x18c   :  { %v1863_v23 = vmax.f32 %v1678_v51, %v1862_v47  ;;  %v1870_v7 = vsel %vm1813_vm3, %v1684_v20, -inf  ;;  %v1680_v6 = vcombine.low %v5982_v38, %v1538_v22  ;;  %v1681_v12 = vcombine.high %v5982_v38, %v1538_v22  ;;  %v6002_v13 = vpop.f32.mrf.mxu0 }
 0x18d   :  { %v1818_v61 = vrot.slane %v1817_v43, 2  ;;  %v1825_v26 = vmax.f32 %v1823_v56, %v1824_v52  ;;  %v1834_v3 = vrot.slane %v1833_v11, 2  ;;  %v1841_v2 = vmax.f32 %v1839_v39, %v1840_v57 }
 0x18e   :  { %v1864_v62 = vrot.slane %v1863_v23, 4  ;;  %v1871_v0 = vmax.f32 %v1679_v36, %v1870_v7  ;;  %v1685_v18 = vcombine.high %v1541_v37, %v1541_v37  ;;  %v1878_v28 = vsel %vm1813_vm3, %v1541_v37, -inf  ;;  %v6005_v8 = vpop.f32.mrf.mxu0 }
 0x18f   :  { %v1819_v46 = vmax.f32 %v1817_v43, %v1818_v61  ;;  %v1826_v21 = vrot.slane %v1825_v26, 2  ;;  %v1835_v40 = vmax.f32 %v1833_v11, %v1834_v3  ;;  %v1842_v34 = vrot.slane %v1841_v2, 2  ;;  %v1179_v3 = vpop.f32.mrf.mxu1 }
 0x190   :  { %v1865_v16 = vmax.f32 %v1863_v23, %v1864_v62  ;;  %v1872_v38 = vrot.slane %v1871_v0, 4  ;;  %v1879_v14 = vmax.f32 %v1680_v6, %v1878_v28  ;;  %v1886_v22 = vsel %vm1813_vm3, %v1685_v18, -inf  ;;  %v6008_v56 = vpop.f32.mrf.mxu0 }
 0x191   :  { %v1820_v45 = vrot.slane %v1819_v46, 1  ;;  %v1827_v39 = vmax.f32 %v1825_v26, %v1826_v21  ;;  %v1836_v51 = vrot.slane %v1835_v40, 1  ;;  %v1843_v36 = vmax.f32 %v1841_v2, %v1842_v34 }
 0x192   :  { %v1866_v20 = vrot.slane %v1865_v16, 2  ;;  %v1873_v37 = vmax.f32 %v1871_v0, %v1872_v38  ;;  %v1880_v47 = vrot.slane %v1879_v14, 4  ;;  %v1887_v52 = vmax.f32 %v1681_v12, %v1886_v22  ;;  %v6010_v43 = vpop.f32.mrf.mxu0 }
 0x193   :  { %v1828_v11 = vrot.slane %v1827_v39, 1  ;;  %v1844_v57 = vrot.slane %v1843_v36, 1  ;;  %v6016_v26 = vcombine.low %v5962_v59, %v5962_v59  ;;  %v6020_v2 = vcombine.low %v5964_v5, %v5964_v5 }
 0x194   :  { %v1867_v23 = vmax.f32 %v1865_v16, %v1866_v20  ;;  %v1874_v7 = vrot.slane %v1873_v37, 2  ;;  %v1881_v6 = vmax.f32 %v1879_v14, %v1880_v47  ;;  %v1888_v61 = vrot.slane %v1887_v52, 4  ;;  %v6012_v62 = vpop.f32.mrf.mxu0 }
 0x195   :  { %6910 = vst [vmem:[#allocation18_spill] sm:$0xff] %v6016_v26  ;;  %6911 = vst [vmem:[#allocation19_spill] sm:$0xff] %v6020_v2  ;;  %v6026_v12 = vcombine.low %v561_v33, %v5962_v59  ;;  %v6032_v0 = vcombine.high %v5964_v5, %v560_v1  ;;  %v6034_v18 = vmax.f32 %v1819_v46, %v1820_v45 }
 0x196   :  { %v6036_v28 = vmax.f32 %v1827_v39, %v1828_v11  ;;  %v6038_v21 = vmax.f32 %v1835_v40, %v1836_v51  ;;  %v1868_v34 = vrot.slane %v1867_v23, 1  ;;  %v6040_v16 = vpop.f32.mrf.mxu0  ;;  %v1079_v38 = vadd.f32 %v5984_v35, %v5907_v29  ;;  %v1181_v39 = vpop.f32.mrf.mxu1 }
 0x197   :  { %6912 = vst [vmem:[#allocation20_spill] sm:$0xff] %v6026_v12  ;;  %6913 = vst [vmem:[#allocation21_spill] sm:$0xff] %v6032_v0  ;;  %v1172_v33 = vadd.f32 %v5992_v17, %v5914_v60  ;;  %v1081_v14 = vadd.f32 %v5988_v19, %v5911_v32  ;;  %v1174_v1 = vadd.f32 %v1173_v31, %v5916_v30  ;;  %v1882_v40 = vrot.slane %v1881_v6, 2  ;;  %v4896_v0 = vld [vmem:[#allocation5 + $0x144] ss:$8 sps:$4 sm:$0xff]  }
 0x198   :  { %6914 = vst [vmem:[#allocation22_spill] sm:$0xff] %v6034_v18  ;;  %6915 = vst [vmem:[#allocation23_spill] sm:$0xff] %v6036_v28  ;;  %v6049_v46 = vmax.f32 %v1843_v36, %v1844_v57  ;;  %v6051_v22 = vmax.f32 %v1873_v37, %v1874_v7  ;;  %v6053_v45 = vmax.f32 %v1887_v52, %v1888_v61  ;;  %v6055_v51 = vpop.f32.mrf.mxu0  ;;  %v4887_v28 = vld [vmem:[#allocation5 + $0x164] ss:$8 sps:$4 sm:$0xff]  }
 0x199   :  { %6916 = vst [vmem:[#allocation24_spill] sm:$0xff] %v6038_v21  ;;  %v1399_v20 = vcombine.low %v1079_v38, %v1081_v14  ;;  %v1400_v35 = vcombine.high %v1079_v38, %v1081_v14  ;;  %v1401_v47 = vcombine.low %v1172_v33, %v1174_v1  ;;  %v1402_v11 = vcombine.high %v1172_v33, %v1174_v1 }
 0x19a   :  { %6917 = vst [vmem:[#allocation25_spill] sm:$0xff] %v6049_v46  ;;  %v6057_v17 = vmax.f32 %v1867_v23, %v1868_v34  ;;  %v1085_v19 = vadd.f32 %v5930_v49, %v5994_v41  ;;  %v1178_v31 = vadd.f32 %v5934_v54, %v1177_v42  ;;  %v1087_v36 = vadd.f32 %v5938_v48, %v5997_v10  ;;  %v6064_v37 = vpop.f32.mrf.mxu0  ;;  %v1183_v41 = vpop.f32.mrf.mxu1 }
 0x19b   :  { %v1543_v52 = vmax.f32 %v1399_v20, 0.0  ;;  %v1546_v57 = vmax.f32 %v1400_v35, 0.0  ;;  %v6066_v7 = vmax.f32 %v1401_v47, 0.0  ;;  %v6068_v61 = vmax.f32 %v1402_v11, 0.0 }
 0x19c   :  { %6918 = vst [vmem:[#allocation26_spill] sm:$0xff] %v6057_v17  ;;  %v6071_v23 = vmax.f32 %v1881_v6, %v1882_v40  ;;  %v1405_v34 = vcombine.low %v1085_v19, %v1087_v36  ;;  %v1406_v33 = vcombine.high %v1085_v19, %v1087_v36  ;;  %v6073_v14 = vpop.f32.mrf.mxu0  ;;  %v1890_v42 = vrot.slane %v6053_v45, 2 }
 0x19d   :  { %v1687_v10 = vcombine.low %v1543_v52, %v1546_v57  ;;  %v1688_v1 = vcombine.high %v1543_v52, %v1546_v57  ;;  %v1689_v20 = vcombine.low %v6066_v7, %v6068_v61  ;;  %v1690_v35 = vcombine.high %v6066_v7, %v6068_v61 }
 0x19e   :  { %v1549_v47 = vmax.f32 %v1405_v34, 0.0  ;;  %v6080_v11 = vmax.f32 %v1406_v33, 0.0  ;;  %v1180_v6 = vadd.f32 %v5942_v25, %v1179_v3  ;;  %v6083_v40 = vpop.f32.mrf.mxu0  ;;  %v1089_v19 = vadd.f32 %v5945_v50, %v6002_v13  ;;  %v4882_v3 = vld [vmem:[#allocation5 + $0x170] ss:$8 sps:$4 sm:$0xff]  }
 0x19f   :  { %v1182_v36 = vadd.f32 %v5956_v24, %v1181_v39  ;;  %v1091_v52 = vadd.f32 %v5960_v58, %v6005_v8  ;;  %v1184_v57 = vadd.f32 %v5968_v9, %v1183_v41  ;;  %4050 = vmatpush1.bf16.msra.mxu0 %v4882_v3  ;;  %v1884_v53 = vrot.slane %v6071_v23, 1 }
 0x1a0   :  { %v1693_v38 = vcombine.high %v1549_v47, %v1549_v47  ;;  %v1910_v7 = vsel %vm1813_vm3, %v1549_v47, -inf  ;;  %v1407_v61 = vcombine.low %v1178_v31, %v1180_v6  ;;  %v1408_v34 = vcombine.high %v1178_v31, %v1180_v6  ;;  %v6092_v33 = vpop.f32.mrf.mxu0  ;;  %4051 = vmatprep.subr.bf16.mxu0 %v4887_v28 }
 0x1a1   :  { %v1911_v63 = vmax.f32 %v1687_v10, %v1910_v7  ;;  %v1411_v46 = vcombine.low %v1089_v19, %v1091_v52  ;;  %v1412_v21 = vcombine.high %v1089_v19, %v1091_v52  ;;  %v1413_v13 = vcombine.low %v1182_v36, %v1184_v57  ;;  %v6102_v52 = vpop.f32.mrf.mxu1  ;;  %v4885_v7 = vld [vmem:[#allocation5 + $0x160] ss:$8 sps:$4 sm:$0xff]  }
 0x1a2   :  { %v1918_v39 = vsel %vm1813_vm3, %v1693_v38, -inf  ;;  %v1550_v27 = vmax.f32 %v1407_v61, 0.0  ;;  %v6095_v8 = vmax.f32 %v1408_v34, 0.0  ;;  %v1414_v41 = vcombine.high %v1182_v36, %v1184_v57  ;;  %v6097_v15 = vpop.f32.mrf.mxu0 }
 0x1a3   :  { %v1912_v47 = vrot.slane %v1911_v63, 4  ;;  %v1919_v17 = vmax.f32 %v1688_v1, %v1918_v39  ;;  %v1555_v31 = vmax.f32 %v1411_v46, 0.0  ;;  %v1558_v6 = vmax.f32 %v1412_v21, 0.0  ;;  %4052 = vmatpush1.bf16.msra.mxu0 %v4885_v7 }
 0x1a4   :  { %v1694_v18 = vcombine.high %v1550_v27, %v1550_v27  ;;  %v1926_v10 = vsel %vm1813_vm3, %v1550_v27, -inf  ;;  %v6100_v19 = vmax.f32 %v1413_v13, 0.0  ;;  %v1559_v55 = vmax.f32 %v1414_v41, 0.0  ;;  %v6104_v38 = vpop.f32.mrf.mxu0 }
 0x1a5   :  { %v1913_v36 = vmax.f32 %v1911_v63, %v1912_v47  ;;  %v1920_v57 = vrot.slane %v1919_v17, 4  ;;  %v1927_v61 = vmax.f32 %v1689_v20, %v1926_v10  ;;  %v1696_v34 = vcombine.low %v6080_v11, %v1555_v31  ;;  %v4890_v63 = vld [vmem:[#allocation5 + $0x154] ss:$8 sps:$4 sm:$0xff]  }
 0x1a6   :  { %v1934_v21 = vsel %vm1813_vm3, %v1694_v18, -inf  ;;  %v1697_v46 = vcombine.high %v6080_v11, %v1555_v31  ;;  %v1702_v1 = vcombine.high %v1558_v6, %v1558_v6  ;;  %v1958_v27 = vsel %vm1813_vm3, %v1558_v6, -inf  ;;  %v6110_v3 = vpop.f32.mrf.mxu0  ;;  %v6118_v11 = vpop.f32.mrf.mxu1  ;;  %v4888_v6 = vld [vmem:[#allocation5 + $0x150] ss:$8 sps:$4 sm:$0xff]   ;;  %4053 = vmatprep.subr.bf16.mxu0 %v4890_v63 }
 0x1a7   :  { %v1914_v13 = vrot.slane %v1913_v36, 2  ;;  %v1921_v39 = vmax.f32 %v1919_v17, %v1920_v57  ;;  %v1928_v41 = vrot.slane %v1927_v61, 4  ;;  %v1935_v44 = vmax.f32 %v1690_v35, %v1934_v21  ;;  %4054 = vmatpush1.bf16.msra.mxu0 %v4888_v6  ;;  %v4894_v6 = vld [vmem:[#allocation5 + $0x140] ss:$8 sps:$4 sm:$0xff]  }
 0x1a8   :  { %v6113_v20 = vmax.f32 %v6053_v45, %v1890_v42  ;;  %v1959_v47 = vmax.f32 %v1696_v34, %v1958_v27  ;;  %v1966_v28 = vsel %vm1813_vm3, %v1702_v1, -inf  ;;  %v1698_v18 = vcombine.low %v6095_v8, %v6100_v19  ;;  %v6120_v31 = vpop.f32.mrf.mxu0  ;;  %v4893_v45 = vld [vmem:[#allocation5 + $0x74] ss:$8 sps:$4 sm:$0xff]   ;;  %v4891_v27 = vld [vmem:[#allocation5 + $0x70] ss:$8 sps:$4 sm:$0xff]   ;;  %4055 = vmatprep.subr.bf16.mxu0 %v4896_v0 }
 0x1a9   :  { %v1922_v10 = vrot.slane %v1921_v39, 2  ;;  %v1929_v7 = vmax.f32 %v1927_v61, %v1928_v41  ;;  %v1936_v17 = vrot.slane %v1935_v44, 4  ;;  %v1699_v35 = vcombine.high %v6095_v8, %v6100_v19  ;;  %4008 = vmatprep.subr.bf16.mxu1 %v4893_v45 }
 0x1aa   :  { %v1960_v42 = vrot.slane %v1959_v47, 4  ;;  %v1967_v57 = vmax.f32 %v1697_v46, %v1966_v28  ;;  %v1703_v34 = vcombine.high %v1559_v55, %v1559_v55  ;;  %v1974_v21 = vsel %vm1813_vm3, %v1559_v55, -inf  ;;  %v6125_v1 = vpop.f32.mrf.mxu0  ;;  %v6131_v28 = vpop.f32.mrf.mxu1  ;;  %4009 = vmatpush1.bf16.msra.mxu1 %v4891_v27 }
 0x1ab   :  { %v6128_v4 = vmax.f32 %v1913_v36, %v1914_v13  ;;  %v1930_v61 = vrot.slane %v1929_v7, 2  ;;  %v1937_v41 = vmax.f32 %v1935_v44, %v1936_v17  ;;  %v1975_v63 = vmax.f32 %v1698_v18, %v1974_v21  ;;  %v4899_v13 = vld [vmem:[#allocation5 + $0x64] ss:$8 sps:$4 sm:$0xff]   ;;  %4056 = vmatpush1.bf16.msra.mxu0 %v4894_v6 }
 0x1ac   :  { %v1961_v8 = vmax.f32 %v1959_v47, %v1960_v42  ;;  %v1968_v19 = vrot.slane %v1967_v57, 4  ;;  %v1982_v46 = vsel %vm1813_vm3, %v1703_v34, -inf  ;;  %v6133_v55 = vpop.f32.mrf.mxu0  ;;  %v1892_v12 = vrot.slane %v6113_v20, 1  ;;  %v4897_v34 = vld [vmem:[#allocation5 + $0x60] ss:$8 sps:$4 sm:$0xff]   ;;  %4010 = vmatprep.subr.bf16.mxu1 %v4899_v13 }
 0x1ad   :  { %v6136_v2 = vmax.f32 %v1921_v39, %v1922_v10  ;;  %v6138_v36 = vmax.f32 %v1929_v7, %v1930_v61  ;;  %v1938_v44 = vrot.slane %v1937_v41, 2  ;;  %v1976_v18 = vrot.slane %v1975_v63, 4  ;;  %v4902_v7 = vld [vmem:[#allocation5 + $0x134] ss:$8 sps:$4 sm:$0xff]  }
 0x1ae   :  { %v1962_v47 = vrot.slane %v1961_v8, 2  ;;  %v1969_v17 = vmax.f32 %v1967_v57, %v1968_v19  ;;  %v1983_v45 = vmax.f32 %v1699_v35, %v1982_v46  ;;  %v6140_v42 = vpop.f32.mrf.mxu0  ;;  %v6920_v21 = vrot.slane %v6051_v22, 1  ;;  %v6151_v46 = vpop.f32.mrf.mxu1  ;;  %4011 = vmatpush1.bf16.msra.mxu1 %v4897_v34  ;;  %4057 = vmatprep.subr.bf16.mxu0 %v4902_v7  ;;  %v4906_v34 = vld [vmem:[#allocation5 + $0x120] ss:$8 sps:$4 sm:$0xff]   ;;  %v4911_v7 = vld [vmem:[#allocation5 + $0x44] ss:$8 sps:$4 sm:$0xff]  }
 0x1af   :  { %6919 = vst [vmem:[#allocation27_spill] sm:$0xff] %v6140_v42  ;;  %v6148_v39 = vmax.f32 %v6071_v23, %v1884_v53  ;;  %v1916_v10 = vrot.slane %v6128_v4, 1  ;;  %v1939_v0 = vmax.f32 %v1937_v41, %v1938_v44  ;;  %v1977_v35 = vmax.f32 %v1975_v63, %v1976_v18  ;;  %v4900_v42 = vld [vmem:[#allocation5 + $0x130] ss:$8 sps:$4 sm:$0xff]  }
 0x1b0   :  { %v6145_v27 = vmax.f32 %v6051_v22, %v6920_v21  ;;  %v1963_v57 = vmax.f32 %v1961_v8, %v1962_v47  ;;  %v1970_v61 = vrot.slane %v1969_v17, 2  ;;  %v1984_v19 = vrot.slane %v1983_v45, 4  ;;  %v6153_v6 = vpop.f32.mrf.mxu0  ;;  %v4903_v22 = vld [vmem:[#allocation5 + $0x50] ss:$8 sps:$4 sm:$0xff]   ;;  %v4905_v8 = vld [vmem:[#allocation5 + $0x54] ss:$8 sps:$4 sm:$0xff]   ;;  %4058 = vmatpush1.bf16.msra.mxu0 %v4900_v42  ;;  %v1197_v42 = vpop.f32.mrf.mxu1 }
 0x1b1   :  { %6922 = vst [vmem:[#allocation29_spill] sm:$0xff] %v6148_v39  ;;  %6923 = vst [vmem:[#allocation30_spill] sm:$0xff] %v6153_v6  ;;  %v1924_v21 = vrot.slane %v6136_v2, 1  ;;  %v1932_v53 = vrot.slane %v6138_v36, 1  ;;  %v1095_v23 = vadd.f32 %v6008_v56, %v5907_v29  ;;  %v1097_v41 = vadd.f32 %v6010_v43, %v5911_v32  ;;  %v4908_v39 = vld [vmem:[#allocation5 + $0x124] ss:$8 sps:$4 sm:$0xff]   ;;  %4012 = vmatprep.subr.bf16.mxu1 %v4905_v8 }
 0x1b2   :  { %6921 = vst [vmem:[#allocation28_spill] sm:$0xff] %v6145_v27  ;;  %v6162_v63 = vmax.f32 %v6113_v20, %v1892_v12  ;;  %v1940_v44 = vrot.slane %v1939_v0, 1  ;;  %v1978_v13 = vrot.slane %v1977_v35, 2  ;;  %v1985_v47 = vmax.f32 %v1983_v45, %v1984_v19  ;;  %v6164_v18 = vpop.f32.mrf.mxu0  ;;  %v4914_v12 = vld [vmem:[#allocation5 + $0x114] ss:$8 sps:$4 sm:$0xff]   ;;  %4013 = vmatpush1.bf16.msra.mxu1 %v4903_v22  ;;  %4059 = vmatprep.subr.bf16.mxu0 %v4908_v39 }
 0x1b3   :  { %6925 = vst [vmem:[#allocation32_spill] sm:$0xff] %v6164_v18  ;;  %v1188_v27 = vadd.f32 %v6102_v52, %v5914_v60  ;;  %v1417_v56 = vcombine.low %v1095_v23, %v1097_v41  ;;  %v1418_v6 = vcombine.high %v1095_v23, %v1097_v41  ;;  %v1190_v43 = vadd.f32 %v6118_v11, %v5916_v30  ;;  %v4909_v52 = vld [vmem:[#allocation5 + $0x40] ss:$8 sps:$4 sm:$0xff]   ;;  %v4917_v8 = vld [vmem:[#allocation5 + $0x34] ss:$8 sps:$4 sm:$0xff]  }
 0x1b4   :  { %6924 = vst [vmem:[#allocation31_spill] sm:$0xff] %v6162_v63  ;;  %v1964_v20 = vrot.slane %v1963_v57, 1  ;;  %v6170_v63 = vmax.f32 %v1969_v17, %v1970_v61  ;;  %v6172_v45 = vmax.f32 %v1977_v35, %v1978_v13  ;;  %v1986_v19 = vrot.slane %v1985_v47, 2  ;;  %v6174_v18 = vpop.f32.mrf.mxu0  ;;  %4014 = vmatprep.subr.bf16.mxu1 %v4911_v7  ;;  %4060 = vmatpush1.bf16.msra.mxu0 %v4906_v34 }
 0x1b5   :  { %v6176_v26 = vmax.f32 %v1417_v56, 0.0  ;;  %v6178_v23 = vmax.f32 %v1418_v6, 0.0  ;;  %v1419_v11 = vcombine.low %v1188_v27, %v1190_v43  ;;  %v1420_v41 = vcombine.high %v1188_v27, %v1190_v43  ;;  %v4912_v6 = vld [vmem:[#allocation5 + $0x110] ss:$8 sps:$4 sm:$0xff]   ;;  %4061 = vmatprep.subr.bf16.mxu0 %v4914_v12 }
 0x1b6   :  { %v6181_v17 = vmax.f32 %v6128_v4, %v1916_v10  ;;  %v6184_v61 = vmax.f32 %v6136_v2, %v1924_v21  ;;  %v6187_v35 = vmax.f32 %v6138_v36, %v1932_v53  ;;  %v6189_v22 = vmax.f32 %v1939_v0, %v1940_v44  ;;  %v6191_v39 = vpop.f32.mrf.mxu0  ;;  %v4920_v2 = vld [vmem:[#allocation5 + $0x104] ss:$8 sps:$4 sm:$0xff]   ;;  %v1199_v44 = vpop.f32.mrf.mxu1  ;;  %4015 = vmatpush1.bf16.msra.mxu1 %v4909_v52  ;;  %v4915_v56 = vld [vmem:[#allocation5 + $0x30] ss:$8 sps:$4 sm:$0xff]  }
 0x1b7   :  { %v1705_v27 = vcombine.low %v6176_v26, %v6178_v23  ;;  %v6197_v4 = vmax.f32 %v1419_v11, 0.0  ;;  %v6199_v10 = vmax.f32 %v1420_v41, 0.0  ;;  %v6201_v36 = vmax.f32 %v1963_v57, %v1964_v20  ;;  %4016 = vmatprep.subr.bf16.mxu1 %v4917_v8  ;;  %v4926_v8 = vld [vmem:[#allocation5 + $0x1f4] ss:$8 sps:$4 sm:$0xff]  }
 0x1b8   :  { %6926 = vst [vmem:[#allocation33_spill] sm:$0xff] %v6181_v17  ;;  %6927 = vst [vmem:[#allocation34_spill] sm:$0xff] %v6184_v61  ;;  %v1099_v21 = vadd.f32 %v5930_v49, %v6012_v62  ;;  %v1101_v53 = vadd.f32 %v5938_v48, %v6040_v16  ;;  %v6208_v34 = vpop.f32.mrf.mxu0  ;;  %v6211_v7 = vmax.f32 %v1985_v47, %v1986_v19  ;;  %v4923_v62 = vld [vmem:[#allocation5 + $0x24] ss:$8 sps:$4 sm:$0xff]   ;;  %4062 = vmatpush1.bf16.msra.mxu0 %v4912_v6  ;;  %v4918_v47 = vld [vmem:[#allocation5 + $0x100] ss:$8 sps:$4 sm:$0xff]  }
 0x1b9   :  { %6928 = vst [vmem:[#allocation35_spill] sm:$0xff] %v6187_v35  ;;  %6929 = vst [vmem:[#allocation36_spill] sm:$0xff] %v6189_v22  ;;  %v1192_v57 = vadd.f32 %v5934_v54, %v6131_v28  ;;  %v1194_v12 = vadd.f32 %v5942_v25, %v6151_v46  ;;  %v1707_v16 = vcombine.low %v6197_v4, %v6199_v10  ;;  %4063 = vmatprep.subr.bf16.mxu0 %v4920_v2  ;;  %v4921_v6 = vld [vmem:[#allocation5 + $0x20] ss:$8 sps:$4 sm:$0xff]  }
 0x1ba   :  { %6930 = vst [vmem:[#allocation37_spill] sm:$0xff] %v6201_v36  ;;  %v1423_v20 = vcombine.low %v1099_v21, %v1101_v53  ;;  %v1424_v11 = vcombine.high %v1099_v21, %v1101_v53  ;;  %v1105_v52 = vadd.f32 %v5945_v50, %v6055_v51  ;;  %v6221_v41 = vpop.f32.mrf.mxu0  ;;  %v1107_v28 = vadd.f32 %v5960_v58, %v6064_v37 }
 0x1bb   :  { %v1425_v19 = vcombine.low %v1192_v57, %v1194_v12  ;;  %v1426_v43 = vcombine.high %v1192_v57, %v1194_v12  ;;  %v1200_v46 = vadd.f32 %v5968_v9, %v1199_v44  ;;  %v1708_v0 = vcombine.high %v6197_v4, %v6199_v10  ;;  %4017 = vmatpush1.bf16.msra.mxu1 %v4915_v56  ;;  %v4924_v10 = vld [vmem:[#allocation5 + $0x1f0] ss:$8 sps:$4 sm:$0xff]  }
 0x1bc   :  { %v1567_v21 = vmax.f32 %v1423_v20, 0.0  ;;  %v1570_v53 = vmax.f32 %v1424_v11, 0.0  ;;  %v1198_v51 = vadd.f32 %v5956_v24, %v1197_v42  ;;  %v6229_v13 = vpop.f32.mrf.mxu0  ;;  %v1429_v12 = vcombine.low %v1105_v52, %v1107_v28  ;;  %4018 = vmatprep.subr.bf16.mxu1 %v4923_v62  ;;  %4064 = vmatpush1.bf16.msra.mxu0 %v4918_v47 }
 0x1bd   :  { %v1568_v61 = vmax.f32 %v1425_v19, 0.0  ;;  %v6231_v57 = vmax.f32 %v1426_v43, 0.0  ;;  %v1430_v37 = vcombine.high %v1105_v52, %v1107_v28  ;;  %4065 = vmatprep.subr.bf16.mxu0 %v4926_v8  ;;  %v6240_v28 = vpop.f32.mrf.mxu1  ;;  %v4929_v8 = vld [vmem:[#allocation5 + $0x14] ss:$8 sps:$4 sm:$0xff]  }
 0x1be   :  { %v1711_v44 = vcombine.high %v1567_v21, %v1567_v21  ;;  %v2006_v2 = vsel %vm1813_vm3, %v1567_v21, -inf  ;;  %v1431_v22 = vcombine.low %v1198_v51, %v1200_v46  ;;  %v1432_v35 = vcombine.high %v1198_v51, %v1200_v46  ;;  %v6234_v4 = vpop.f32.mrf.mxu0 }
 0x1bf   :  { %v2007_v42 = vmax.f32 %v1705_v27, %v2006_v2  ;;  %v1712_v20 = vcombine.high %v1568_v61, %v1568_v61  ;;  %v2022_v56 = vsel %vm1813_vm3, %v1568_v61, -inf  ;;  %v1573_v11 = vmax.f32 %v1429_v12, 0.0  ;;  %4019 = vmatpush1.bf16.msra.mxu1 %v4921_v6  ;;  %v4927_v2 = vld [vmem:[#allocation5 + $0x10] ss:$8 sps:$4 sm:$0xff]  }
 0x1c0   :  { %v2014_v43 = vsel %vm1813_vm3, %v1711_v44, -inf  ;;  %v2023_v19 = vmax.f32 %v1707_v16, %v2022_v56  ;;  %v1576_v52 = vmax.f32 %v1430_v37, 0.0  ;;  %v6238_v62 = vmax.f32 %v1431_v22, 0.0  ;;  %v6242_v21 = vpop.f32.mrf.mxu0  ;;  %4066 = vmatpush2.bf16.msra.mxu0 %v4924_v10  ;;  %4020 = vmatprep.subr.bf16.mxu1 %v4929_v8 }
 0x1c1   :  { %6931 = vst [vmem:[#allocation38_spill] sm:$0xff] %v6242_v21  ;;  %v2008_v46 = vrot.slane %v2007_v42, 4  ;;  %v6932_v27 = vcombine.high %v6176_v26, %v6178_v23  ;;  %v2030_v61 = vsel %vm1813_vm3, %v1712_v20, -inf  ;;  %v1714_v51 = vcombine.low %v1570_v53, %v1573_v11  ;;  %v4932_v26 = vld [vmem:[#allocation5 + $0x1e4] ss:$8 sps:$4 sm:$0xff]   ;;  %v1203_v21 = vpop.f32.mrf.mxu1 }
 0x1c2   :  { %v2024_v12 = vrot.slane %v2023_v19, 4  ;;  %v2031_v44 = vmax.f32 %v1708_v0, %v2030_v61  ;;  %v1715_v16 = vcombine.high %v1570_v53, %v1573_v11  ;;  %v1720_v37 = vcombine.high %v1576_v52, %v1576_v52  ;;  %v6248_v22 = vpop.f32.mrf.mxu0  ;;  %v4930_v53 = vld [vmem:[#allocation5 + $0x1e0] ss:$8 sps:$4 sm:$0xff]   ;;  %4067 = vmatprep.subr.bf16.mxu0 %v4932_v26 }
 0x1c3   :  { %v2015_v47 = vmax.f32 %v6932_v27, %v2014_v43  ;;  %v2009_v56 = vmax.f32 %v2007_v42, %v2008_v46  ;;  %v2054_v6 = vsel %vm1813_vm3, %v1576_v52, -inf  ;;  %v1577_v17 = vmax.f32 %v1432_v35, 0.0  ;;  %4021 = vmatpush1.bf16.msra.mxu1 %v4927_v2 }
 0x1c4   :  { %v2025_v23 = vmax.f32 %v2023_v19, %v2024_v12  ;;  %v2032_v43 = vrot.slane %v2031_v44, 4  ;;  %v2055_v20 = vmax.f32 %v1714_v51, %v2054_v6  ;;  %v2062_v27 = vsel %vm1813_vm3, %v1720_v37, -inf  ;;  %v6252_v0 = vpop.f32.mrf.mxu0  ;;  %4068 = vmatpush2.bf16.msra.mxu0 %v4930_v53 }
 0x1c5   :  { %v2016_v36 = vrot.slane %v2015_v47, 4  ;;  %6933 = vst [vmem:[#allocation39_spill] sm:$0xff] %v6252_v0  ;;  %v2010_v11 = vrot.slane %v2009_v56, 2  ;;  %v2063_v61 = vmax.f32 %v1715_v16, %v2062_v27  ;;  %v1716_v42 = vcombine.low %v6231_v57, %v6238_v62  ;;  %v6262_v16 = vpop.f32.mrf.mxu1 }
 0x1c6   :  { %v1988_v35 = vrot.slane %v6211_v7, 1  ;;  %v2026_v52 = vrot.slane %v2025_v23, 2  ;;  %v2033_v19 = vmax.f32 %v2031_v44, %v2032_v43  ;;  %v2056_v46 = vrot.slane %v2055_v20, 4  ;;  %v6257_v51 = vpop.f32.mrf.mxu0 }
 0x1c7   :  { %v2017_v10 = vmax.f32 %v2015_v47, %v2016_v36  ;;  %6934 = vst [vmem:[#allocation40_spill] sm:$0xff] %v6257_v51  ;;  %v2011_v8 = vmax.f32 %v2009_v56, %v2010_v11  ;;  %v2064_v37 = vrot.slane %v2063_v61, 4  ;;  %v1721_v2 = vcombine.high %v1577_v17, %v1577_v17 }
 0x1c8   :  { %v2027_v6 = vmax.f32 %v2025_v23, %v2026_v52  ;;  %v2057_v0 = vmax.f32 %v2055_v20, %v2056_v46  ;;  %v1717_v36 = vcombine.high %v6231_v57, %v6238_v62  ;;  %v2070_v47 = vsel %vm1813_vm3, %v1577_v17, -inf  ;;  %v6264_v26 = vpop.f32.mrf.mxu0 }
 0x1c9   :  { %v2018_v12 = vrot.slane %v2017_v10, 2  ;;  %v2012_v44 = vrot.slane %v2011_v8, 1  ;;  %v2034_v43 = vrot.slane %v2033_v19, 2  ;;  %v2065_v27 = vmax.f32 %v2063_v61, %v2064_v37 }
 0x1ca   :  { %v2071_v51 = vmax.f32 %v1716_v42, %v2070_v47  ;;  %v6935_v56 = vrot.slane %v6170_v63, 1  ;;  %v2058_v20 = vrot.slane %v2057_v0, 2  ;;  %v2078_v11 = vsel %vm1813_vm3, %v1721_v2, -inf  ;;  %v6272_v57 = vpop.f32.mrf.mxu0 }
 0x1cb   :  { %v2019_v23 = vmax.f32 %v2017_v10, %v2018_v12  ;;  %v6937_v17 = vrot.slane %v6172_v45, 1  ;;  %v6280_v52 = vmax.f32 %v6211_v7, %v1988_v35  ;;  %v2066_v61 = vrot.slane %v2065_v27, 2  ;;  %v1209_v12 = vpop.f32.mrf.mxu1 }
 0x1cc   :  { %v6269_v53 = vmax.f32 %v6170_v63, %v6935_v56  ;;  %v2072_v42 = vrot.slane %v2071_v51, 4  ;;  %v2028_v46 = vrot.slane %v2027_v6, 1  ;;  %v2079_v37 = vmax.f32 %v1717_v36, %v2078_v11  ;;  %v6286_v2 = vpop.f32.mrf.mxu0 }
 0x1cd   :  { %v6277_v62 = vmax.f32 %v6172_v45, %v6937_v17  ;;  %v1109_v63 = vadd.f32 %v6073_v14, %v5907_v29  ;;  %v1202_v10 = vadd.f32 %v6240_v28, %v5914_v60  ;;  %v6288_v47 = vmax.f32 %v2011_v8, %v2012_v44 }
 0x1ce   :  { %6936 = vst [vmem:[#allocation41_spill] sm:$0xff] %v6269_v53  ;;  %v6290_v45 = vmax.f32 %v2033_v19, %v2034_v43  ;;  %v2073_v56 = vmax.f32 %v2071_v51, %v2072_v42  ;;  %v1111_v7 = vadd.f32 %v6083_v40, %v5911_v32  ;;  %v2020_v35 = vrot.slane %v2019_v23, 1  ;;  %v6297_v14 = vpop.f32.mrf.mxu0  ;;  %v1211_v42 = vpop.f32.mrf.mxu1  ;;  %v4935_v40 = vld [vmem:[#allocation5 + $0x4] ss:$8 sps:$4 sm:$0xff]  }
 0x1cf   :  { %6938 = vst [vmem:[#allocation42_spill] sm:$0xff] %v6288_v47  ;;  %v6294_v17 = vmax.f32 %v2057_v0, %v2058_v20  ;;  %v2080_v36 = vrot.slane %v2079_v37, 4  ;;  %v1204_v29 = vadd.f32 %v1203_v21, %v5916_v30  ;;  %v6299_v60 = vmax.f32 %v2065_v27, %v2066_v61  ;;  %v4933_v27 = vld [vmem:[#allocation5] ss:$8 sps:$4 sm:$0xff]   ;;  %4022 = vmatprep.subr.bf16.mxu1 %v4935_v40  ;;  %v4941_v40 = vld [vmem:[#allocation5 + $0xf4] ss:$8 sps:$4 sm:$0xff]  }
 0x1d0   :  { %v2074_v28 = vrot.slane %v2073_v56, 2  ;;  %v1435_v11 = vcombine.low %v1109_v63, %v1111_v7  ;;  %v1436_v8 = vcombine.high %v1109_v63, %v1111_v7  ;;  %v6301_v44 = vmax.f32 %v2027_v6, %v2028_v46  ;;  %v6303_v32 = vpop.f32.mrf.mxu0  ;;  %4023 = vmatpush1.bf16.msra.mxu1 %v4933_v27  ;;  %v4944_v7 = vld [vmem:[#allocation5 + $0x1c4] ss:$8 sps:$4 sm:$0xff]  }
 0x1d1   :  { %v2081_v19 = vmax.f32 %v2079_v37, %v2080_v36  ;;  %v1437_v51 = vcombine.low %v1202_v10, %v1204_v29  ;;  %v1438_v43 = vcombine.high %v1202_v10, %v1204_v29  ;;  %v6312_v61 = vmax.f32 %v2019_v23, %v2020_v35  ;;  %v4938_v10 = vld [vmem:[#allocation5 + $0x1d4] ss:$8 sps:$4 sm:$0xff]   ;;  %v4936_v35 = vld [vmem:[#allocation5 + $0x1d0] ss:$8 sps:$4 sm:$0xff]   ;;  %4024 = vmatprep.subr.bf16.mxu1 %v4941_v40 }
 0x1d2   :  { %v6306_v20 = vmax.f32 %v2073_v56, %v2074_v28  ;;  %v6308_v30 = vmax.f32 %v1435_v11, 0.0  ;;  %v6310_v21 = vmax.f32 %v1436_v8, 0.0  ;;  %v6318_v63 = vpop.f32.mrf.mxu0  ;;  %v1115_v11 = vadd.f32 %v5930_v49, %v6092_v33  ;;  %4069 = vmatprep.subr.bf16.mxu0 %v4938_v10  ;;  %v4939_v49 = vld [vmem:[#allocation5 + $0xf0] ss:$8 sps:$4 sm:$0xff]  }
 0x1d3   :  { %v2082_v6 = vrot.slane %v2081_v19, 2  ;;  %v6314_v46 = vmax.f32 %v1437_v51, 0.0  ;;  %v6316_v37 = vmax.f32 %v1438_v43, 0.0  ;;  %v1117_v8 = vadd.f32 %v5938_v48, %v6097_v15  ;;  %v1213_v51 = vpop.f32.mrf.mxu1  ;;  %4070 = vmatpush2.bf16.msra.mxu0 %v4936_v35 }
 0x1d4   :  { %v1723_v36 = vcombine.low %v6308_v30, %v6310_v21  ;;  %v1724_v23 = vcombine.high %v6308_v30, %v6310_v21  ;;  %v6333_v43 = vpop.f32.mrf.mxu0  ;;  %v1119_v48 = vadd.f32 %v5945_v50, %v6104_v38  ;;  %v1121_v10 = vadd.f32 %v5960_v58, %v6110_v3  ;;  %4025 = vmatpush2.bf16.msra.mxu1 %v4939_v49  ;;  %v4947_v58 = vld [vmem:[#allocation5 + $0xe4] ss:$8 sps:$4 sm:$0xff]   ;;  %v4950_v49 = vld [vmem:[#allocation5 + $0x1b4] ss:$8 sps:$4 sm:$0xff]   ;;  %v4954_v21 = vld [vmem:[#allocation5 + $0x1a0] ss:$8 sps:$4 sm:$0xff]  }
 0x1d5   :  { %v6327_v28 = vmax.f32 %v2081_v19, %v2082_v6  ;;  %v1725_v56 = vcombine.low %v6314_v46, %v6316_v37  ;;  %v1726_v27 = vcombine.high %v6314_v46, %v6316_v37  ;;  %v1208_v19 = vadd.f32 %v5934_v54, %v6262_v16  ;;  %v4942_v16 = vld [vmem:[#allocation5 + $0x1c0] ss:$8 sps:$4 sm:$0xff]   ;;  %4071 = vmatprep.subr.bf16.mxu0 %v4944_v7 }
 0x1d6   :  { %v1210_v6 = vadd.f32 %v5942_v25, %v1209_v12  ;;  %v1441_v33 = vcombine.low %v1115_v11, %v1117_v8  ;;  %v1442_v15 = vcombine.high %v1115_v11, %v1117_v8  ;;  %v6346_v29 = vpop.f32.mrf.mxu0  ;;  %v1212_v54 = vadd.f32 %v5956_v24, %v1211_v42  ;;  %4026 = vmatprep.subr.bf16.mxu1 %v4947_v58  ;;  %v4951_v58 = vld [vmem:[#allocation5 + $0xd0] ss:$8 sps:$4 sm:$0xff]  }
 0x1d7   :  { %v1214_v25 = vadd.f32 %v5968_v9, %v1213_v51  ;;  %v1447_v50 = vcombine.low %v1119_v48, %v1121_v10  ;;  %v1448_v40 = vcombine.high %v1119_v48, %v1121_v10  ;;  %4072 = vmatpush2.bf16.msra.mxu0 %v4942_v16 }
 0x1d8   :  { %v1443_v46 = vcombine.low %v1208_v19, %v1210_v6  ;;  %v1444_v37 = vcombine.high %v1208_v19, %v1210_v6  ;;  %v1585_v35 = vmax.f32 %v1441_v33, 0.0  ;;  %v1588_v11 = vmax.f32 %v1442_v15, 0.0  ;;  %v2875_v38 = vpop.f32.mrf.mxu0  ;;  %v4945_v19 = vld [vmem:[#allocation5 + $0xe0] ss:$8 sps:$4 sm:$0xff]   ;;  %4073 = vmatprep.subr.bf16.mxu0 %v4950_v49 }
 0x1d9   :  { %v1449_v0 = vcombine.low %v1212_v54, %v1214_v25  ;;  %v1591_v42 = vmax.f32 %v1447_v50, 0.0  ;;  %v1450_v51 = vcombine.high %v1212_v54, %v1214_v25  ;;  %v1594_v38 = vmax.f32 %v1448_v40, 0.0  ;;  %4027 = vmatpush2.bf16.msra.mxu1 %v4945_v19 }
 0x1da   :  { %v1586_v3 = vmax.f32 %v1443_v46, 0.0  ;;  %v6351_v8 = vmax.f32 %v1444_v37, 0.0  ;;  %v1729_v24 = vcombine.high %v1585_v35, %v1585_v35  ;;  %v2102_v9 = vsel %vm1813_vm3, %v1585_v35, -inf  ;;  %v2876_v6 = vpop.f32.mrf.mxu0  ;;  %v4948_v46 = vld [vmem:[#allocation5 + $0x1b0] ss:$8 sps:$4 sm:$0xff]  }
 0x1db   :  { %v2103_v33 = vmax.f32 %v1723_v36, %v2102_v9  ;;  %v1732_v37 = vcombine.low %v1588_v11, %v1591_v42  ;;  %v1733_v16 = vcombine.high %v1588_v11, %v1591_v42  ;;  %v4953_v35 = vld [vmem:[#allocation5 + $0xd4] ss:$8 sps:$4 sm:$0xff]   ;;  %v1738_v25 = vcombine.high %v1594_v38, %v1594_v38  ;;  %4074 = vmatpush2.bf16.msra.mxu0 %v4948_v46 }
 0x1dc   :  { %v1730_v15 = vcombine.high %v1586_v3, %v1586_v3  ;;  %v2118_v7 = vsel %vm1813_vm3, %v1586_v3, -inf  ;;  %v2110_v48 = vsel %vm1813_vm3, %v1729_v24, -inf  ;;  %v2877_v12 = vpop.f32.mrf.mxu0  ;;  %v2150_v19 = vsel %vm1813_vm3, %v1594_v38, -inf  ;;  %4028 = vmatprep.subr.bf16.mxu1 %v4953_v35 }
 0x1dd   :  { %v2119_v10 = vmax.f32 %v1725_v56, %v2118_v7  ;;  %v2104_v50 = vrot.slane %v2103_v33, 4  ;;  %v2111_v54 = vmax.f32 %v1724_v23, %v2110_v48  ;;  %v6361_v56 = vmax.f32 %v1449_v0, 0.0  ;;  %v4956_v12 = vld [vmem:[#allocation5 + $0x1a4] ss:$8 sps:$4 sm:$0xff]   ;;  %4029 = vmatpush2.bf16.msra.mxu1 %v4951_v58 }
 0x1de   :  { %v2126_v36 = vsel %vm1813_vm3, %v1730_v15, -inf  ;;  %v2878_v11 = vpop.f32.mrf.mxu0  ;;  %v2151_v42 = vmax.f32 %v1732_v37, %v2150_v19  ;;  %v2158_v30 = vsel %vm1813_vm3, %v1738_v25, -inf  ;;  %v1595_v15 = vmax.f32 %v1450_v51, 0.0  ;;  %4075 = vmatprep.subr.bf16.mxu0 %v4956_v12 }
 0x1df   :  { %v2120_v3 = vrot.slane %v2119_v10, 4  ;;  %v2127_v40 = vmax.f32 %v1726_v27, %v2126_v36  ;;  %v2105_v24 = vmax.f32 %v2103_v33, %v2104_v50  ;;  %v2112_v9 = vrot.slane %v2111_v54, 4  ;;  %v4959_v27 = vld [vmem:[#allocation5 + $0xc4] ss:$8 sps:$4 sm:$0xff]   ;;  %4076 = vmatpush2.bf16.msra.mxu0 %v4954_v21  ;;  %v4957_v33 = vld [vmem:[#allocation5 + $0xc0] ss:$8 sps:$4 sm:$0xff]  }
 0x1e0   :  { %v2159_v49 = vmax.f32 %v1733_v16, %v2158_v30  ;;  %v2152_v0 = vrot.slane %v2151_v42, 4  ;;  %v1734_v46 = vcombine.low %v6351_v8, %v6361_v56  ;;  %v1735_v50 = vcombine.high %v6351_v8, %v6361_v56  ;;  %4030 = vmatprep.subr.bf16.mxu1 %v4959_v27  ;;  %v4962_v16 = vld [vmem:[#allocation5 + $0x194] ss:$8 sps:$4 sm:$0xff]  }
 0x1e1   :  { %v2121_v23 = vmax.f32 %v2119_v10, %v2120_v3  ;;  %v2128_v6 = vrot.slane %v2127_v40, 4  ;;  %v2106_v7 = vrot.slane %v2105_v24, 2  ;;  %v2113_v38 = vmax.f32 %v2111_v54, %v2112_v9  ;;  %v4960_v10 = vld [vmem:[#allocation5 + $0x190] ss:$8 sps:$4 sm:$0xff]   ;;  %4031 = vmatpush2.bf16.msra.mxu1 %v4957_v33  ;;  %v4965_v3 = vld [vmem:[#allocation5 + $0xb4] ss:$8 sps:$4 sm:$0xff]   ;;  %4077 = vmatprep.subr.bf16.mxu0 %v4962_v16 }
 0x1e2   :  { %v2160_v35 = vrot.slane %v2159_v49, 4  ;;  %v2153_v25 = vmax.f32 %v2151_v42, %v2152_v0  ;;  %v1739_v58 = vcombine.high %v1595_v15, %v1595_v15  ;;  %v4963_v54 = vld [vmem:[#allocation5 + $0xb0] ss:$8 sps:$4 sm:$0xff]   ;;  %v2166_v9 = vsel %vm1813_vm3, %v1595_v15, -inf  ;;  %4032 = vmatprep.subr.bf16.mxu1 %v4965_v3  ;;  %v4971_v42 = vld [vmem:[#allocation5 + $0xa4] ss:$8 sps:$4 sm:$0xff]  }
 0x1e3   :  { %v2122_v48 = vrot.slane %v2121_v23, 2  ;;  %v2129_v37 = vmax.f32 %v2127_v40, %v2128_v6  ;;  %v2107_v51 = vmax.f32 %v2105_v24, %v2106_v7  ;;  %v2114_v36 = vrot.slane %v2113_v38, 2  ;;  %v4968_v40 = vld [vmem:[#allocation5 + $0x184] ss:$8 sps:$4 sm:$0xff]   ;;  %4078 = vmatpush2.bf16.msra.mxu0 %v4960_v10  ;;  %v4966_v24 = vld [vmem:[#allocation5 + $0x180] ss:$8 sps:$4 sm:$0xff]  }
 0x1e4   :  { %v2161_v12 = vmax.f32 %v2159_v49, %v2160_v35  ;;  %v2154_v8 = vrot.slane %v2153_v25, 2  ;;  %v2167_v56 = vmax.f32 %v1734_v46, %v2166_v9  ;;  %v6939_v6 = vrot.slane %v6290_v45, 1  ;;  %4079 = vmatprep.subr.bf16.mxu0 %v4968_v40  ;;  %v6949_v9 = vld [vmem:[#allocation19_spill] sm:$0xff]  ;;  %v6950_v40 = vld [vmem:[#allocation30_spill] sm:$0xff] }
 0x1e5   :  { %v2123_v19 = vmax.f32 %v2121_v23, %v2122_v48  ;;  %v2130_v11 = vrot.slane %v2129_v37, 2  ;;  %v2108_v30 = vrot.slane %v2107_v51, 1  ;;  %v6369_v21 = vmax.f32 %v2113_v38, %v2114_v36  ;;  %4033 = vmatpush2.bf16.msra.mxu1 %v4963_v54  ;;  %v4969_v48 = vld [vmem:[#allocation5 + $0xa0] ss:$8 sps:$4 sm:$0xff]  }
 0x1e6   :  { %v6374_v27 = vmax.f32 %v6290_v45, %v6939_v6  ;;  %v6940_v23 = vrot.slane %v6294_v17, 1  ;;  %v6942_v15 = vrot.slane %v6299_v60, 1  ;;  %v2174_v38 = vsel %vm1813_vm3, %v1739_v58, -inf  ;;  %4034 = vmatprep.subr.bf16.mxu1 %v4971_v42  ;;  %v4974_v6 = vld [vmem:[#allocation5 + $0x94] ss:$8 sps:$4 sm:$0xff]  }
 0x1e7   :  { %v6944_v0 = vrot.slane %v6306_v20, 1  ;;  %v2124_v45 = vrot.slane %v2123_v19, 1  ;;  %v6392_v33 = vmax.f32 %v2129_v37, %v2130_v11  ;;  %v6945_v35 = vrot.slane %v6327_v28, 1  ;;  %4080 = vmatpush2.bf16.msra.mxu0 %v4966_v24  ;;  %v6948_v11 = vld [vmem:[#allocation27_spill] sm:$0xff]  ;;  %v4972_v24 = vld [vmem:[#allocation5 + $0x90] ss:$8 sps:$4 sm:$0xff]  }
 0x1e8   :  { %v6379_v49 = vmax.f32 %v6294_v17, %v6940_v23  ;;  %v6384_v7 = vmax.f32 %v6299_v60, %v6942_v15  ;;  %v1251_v17 = vadd.f32 %v6120_v31, %v5962_v59  ;;  %v6401_v10 = vmax.f32 %v2107_v51, %v2108_v30  ;;  %v6947_v31 = vld [vmem:[#allocation18_spill] sm:$0xff]  ;;  %v6951_v51 = vld [vmem:[#allocation20_spill] sm:$0xff] }
 0x1e9   :  { %v6390_v46 = vmax.f32 %v6306_v20, %v6944_v0  ;;  %v6399_v60 = vmax.f32 %v6327_v28, %v6945_v35  ;;  %v2155_v16 = vmax.f32 %v2153_v25, %v2154_v8  ;;  %v2162_v36 = vrot.slane %v2161_v12, 2  ;;  %v6952_v25 = vld [vmem:[#allocation32_spill] sm:$0xff]  ;;  %v6953_v8 = vld [vmem:[#allocation21_spill] sm:$0xff]  ;;  %4035 = vmatpush2.bf16.msra.mxu1 %v4969_v48 }
 0x1ea   :  { %6941 = vst [vmem:[#allocation43_spill] sm:$0xff] %v6379_v49  ;;  %6943 = vst [vmem:[#allocation44_spill] sm:$0xff] %v6384_v7  ;;  %v2168_v58 = vrot.slane %v2167_v56, 4  ;;  %v2175_v37 = vmax.f32 %v1735_v50, %v2174_v38  ;;  %v1253_v3 = vadd.f32 %v6125_v1, %v5964_v5  ;;  %v1255_v54 = vadd.f32 %v6947_v31, %v6133_v55 }
 0x1eb   :  { %6946 = vst [vmem:[#allocation45_spill] sm:$0xff] %v6401_v10  ;;  %v1257_v28 = vadd.f32 %v6949_v9, %v6948_v11  ;;  %v1261_v30 = vadd.f32 %v6951_v51, %v6950_v40  ;;  %v1263_v42 = vadd.f32 %v6953_v8, %v6952_v25  ;;  %v6414_v23 = vmax.f32 %v2123_v19, %v2124_v45  ;;  %v4977_v11 = vld [vmem:[#allocation5 + $0x84] ss:$8 sps:$4 sm:$0xff]  }
 0x1ec   :  { %v1385_v15 = vcombine.low %v1251_v17, %v1253_v3  ;;  %v1386_v1 = vcombine.high %v1251_v17, %v1253_v3  ;;  %v2156_v38 = vrot.slane %v2155_v16, 1  ;;  %4036 = vmatprep.subr.bf16.mxu1 %v4974_v6  ;;  %v2169_v20 = vmax.f32 %v2167_v56, %v2168_v58  ;;  %v4975_v3 = vld [vmem:[#allocation5 + $0x80] ss:$8 sps:$4 sm:$0xff]  }
 0x1ed   :  { %v1391_v55 = vcombine.low %v1255_v54, %v1257_v28  ;;  %v1392_v0 = vcombine.high %v1255_v54, %v1257_v28  ;;  %v1397_v35 = vcombine.low %v1261_v30, %v1263_v42  ;;  %v1398_v49 = vcombine.high %v1261_v30, %v1263_v42  ;;  %4037 = vmatpush2.bf16.msra.mxu1 %v4972_v24  ;;  %v4980_v24 = vld [vmem:[#allocation5 + $0x274] ss:$8 sps:$4 sm:$0xff]  }
 0x1ee   :  { %v1527_v40 = vmax.f32 %v1385_v15, 0.0  ;;  %v1530_v10 = vmax.f32 %v1386_v1, 0.0  ;;  %v2176_v25 = vrot.slane %v2175_v37, 4  ;;  %v6417_v7 = vmax.f32 %v2161_v12, %v2162_v36  ;;  %4038 = vmatprep.subr.bf16.mxu1 %v4977_v11 }
 0x1ef   :  { %v1533_v47 = vmax.f32 %v1391_v55, 0.0  ;;  %v1536_v19 = vmax.f32 %v1392_v0, 0.0  ;;  %v1539_v45 = vmax.f32 %v1397_v35, 0.0  ;;  %v1542_v48 = vmax.f32 %v1398_v49, 0.0 }
 0x1f0   :  { %v1673_v50 = vcombine.low %v1527_v40, %v1530_v10  ;;  %v1674_v17 = vcombine.high %v1527_v40, %v1530_v10  ;;  %v6419_v53 = vmax.f32 %v2155_v16, %v2156_v38  ;;  %v2170_v58 = vrot.slane %v2169_v20, 2 }
 0x1f1   :  { %v1677_v54 = vcombine.high %v1533_v47, %v1533_v47  ;;  %v1846_v28 = vsel %vm1813_vm3, %v1533_v47, -inf  ;;  %v1682_v56 = vcombine.low %v1536_v19, %v1539_v45  ;;  %v1683_v42 = vcombine.high %v1536_v19, %v1539_v45  ;;  %4039 = vmatpush2.bf16.msra.mxu1 %v4975_v3 }
 0x1f2   :  { %6954 = vst [vmem:[#allocation18_spill] sm:$0xff] %v6419_v53  ;;  %v1847_v30 = vmax.f32 %v1673_v50, %v1846_v28  ;;  %v1686_v6 = vcombine.high %v1542_v48, %v1542_v48  ;;  %v6422_v15 = vmax.f32 %v2175_v37, %v2176_v25  ;;  %v1894_v10 = vsel %vm1813_vm3, %v1542_v48, -inf  ;;  %4090 = vmatprep.subr.bf16.mxu1 %v4980_v24 }
 0x1f3   :  { %v1854_v12 = vsel %vm1813_vm3, %v1677_v54, -inf  ;;  %v1265_v49 = vadd.f32 %v6174_v18, %v5962_v59  ;;  %v1895_v1 = vmax.f32 %v1682_v56, %v1894_v10  ;;  %v1267_v50 = vadd.f32 %v6191_v39, %v5964_v5 }
 0x1f4   :  { %v1848_v16 = vrot.slane %v1847_v30, 4  ;;  %v1855_v36 = vmax.f32 %v1674_v17, %v1854_v12  ;;  %v1902_v47 = vsel %vm1813_vm3, %v1686_v6, -inf  ;;  %v1271_v37 = vadd.f32 %v6947_v31, %v6208_v34 }
 0x1f5   :  { %v1903_v38 = vmax.f32 %v1683_v42, %v1902_v47  ;;  %v1273_v55 = vadd.f32 %v6949_v9, %v6221_v41  ;;  %v6435_v0 = vmax.f32 %v2169_v20, %v2170_v58  ;;  %v1896_v11 = vrot.slane %v1895_v1, 4 }
 0x1f6   :  { %v1849_v18 = vmax.f32 %v1847_v30, %v1848_v16  ;;  %v1856_v35 = vrot.slane %v1855_v36, 4  ;;  %v1403_v25 = vcombine.low %v1265_v49, %v1267_v50  ;;  %v1404_v19 = vcombine.high %v1265_v49, %v1267_v50 }
 0x1f7   :  { %v1904_v40 = vrot.slane %v1903_v38, 4  ;;  %v1409_v45 = vcombine.low %v1271_v37, %v1273_v55  ;;  %v1897_v39 = vmax.f32 %v1895_v1, %v1896_v11  ;;  %v1410_v3 = vcombine.high %v1271_v37, %v1273_v55 }
 0x1f8   :  { %v1850_v17 = vrot.slane %v1849_v18, 2  ;;  %v1857_v48 = vmax.f32 %v1855_v36, %v1856_v35  ;;  %v1545_v34 = vmax.f32 %v1403_v25, 0.0  ;;  %v1548_v28 = vmax.f32 %v1404_v19, 0.0 }
 0x1f9   :  { %v1905_v54 = vmax.f32 %v1903_v38, %v1904_v40  ;;  %v1551_v56 = vmax.f32 %v1409_v45, 0.0  ;;  %v2178_v41 = vrot.slane %v6422_v15, 2  ;;  %v1898_v30 = vrot.slane %v1897_v39, 2 }
 0x1fa   :  { %v1851_v20 = vmax.f32 %v1849_v18, %v1850_v17  ;;  %v1858_v58 = vrot.slane %v1857_v48, 2  ;;  %v1691_v6 = vcombine.low %v1545_v34, %v1548_v28  ;;  %v1692_v12 = vcombine.high %v1545_v34, %v1548_v28 }
 0x1fb   :  { %v1906_v42 = vrot.slane %v1905_v54, 2  ;;  %v1695_v10 = vcombine.high %v1551_v56, %v1551_v56  ;;  %v1899_v47 = vmax.f32 %v1897_v39, %v1898_v30  ;;  %v1942_v36 = vsel %vm1813_vm3, %v1551_v56, -inf  ;;  %v6955_v30 = vld [vmem:[#allocation38_spill] sm:$0xff] }
 0x1fc   :  { %v1852_v16 = vrot.slane %v1851_v20, 1  ;;  %v1859_v49 = vmax.f32 %v1857_v48, %v1858_v58  ;;  %v2172_v1 = vrot.slane %v6435_v0, 1  ;;  %v1943_v38 = vmax.f32 %v1691_v6, %v1942_v36  ;;  %v6957_v36 = vld [vmem:[#allocation40_spill] sm:$0xff] }
 0x1fd   :  { %v1907_v24 = vmax.f32 %v1905_v54, %v1906_v42  ;;  %v1950_v50 = vsel %vm1813_vm3, %v1695_v10, -inf  ;;  %v1900_v55 = vrot.slane %v1899_v47, 1  ;;  %v1554_v18 = vmax.f32 %v1410_v3, 0.0 }
 0x1fe   :  { %v1860_v37 = vrot.slane %v1859_v49, 1  ;;  %v1951_v35 = vmax.f32 %v1692_v12, %v1950_v50  ;;  %v1944_v40 = vrot.slane %v1943_v38, 4  ;;  %v1275_v25 = vadd.f32 %v6951_v51, %v6229_v13 }
 0x1ff   :  { %v1908_v11 = vrot.slane %v1907_v24, 1  ;;  %v1277_v19 = vadd.f32 %v6953_v8, %v6234_v4  ;;  %v1853_v45 = vmax.f32 %v1851_v20, %v1852_v16  ;;  %v1901_v48 = vmax.f32 %v1899_v47, %v1900_v55 }
 0x200   :  { %v1861_v17 = vmax.f32 %v1859_v49, %v1860_v37  ;;  %v1952_v39 = vrot.slane %v1951_v35, 4  ;;  %v1945_v34 = vmax.f32 %v1943_v38, %v1944_v40  ;;  %v1281_v42 = vadd.f32 %v6955_v30, %v5962_v59  ;;  %v6956_v49 = vld [vmem:[#allocation39_spill] sm:$0xff] }
 0x201   :  { %v1909_v54 = vmax.f32 %v1907_v24, %v1908_v11  ;;  %v1415_v28 = vcombine.low %v1275_v25, %v1277_v19  ;;  %v1416_v56 = vcombine.high %v1275_v25, %v1277_v19  ;;  %v3398_v58 = vsel %vm3313_vm4, %v1901_v48, %v1853_v45 }
 0x202   :  { %v1953_v3 = vmax.f32 %v1951_v35, %v1952_v39  ;;  %v1283_v13 = vadd.f32 %v6248_v22, %v5964_v5  ;;  %v1946_v4 = vrot.slane %v1945_v34, 2  ;;  %v1285_v47 = vadd.f32 %v6947_v31, %v6956_v49 }
 0x203   :  { %v6451_v6 = vsel %vm3313_vm4, %v1909_v54, %v1861_v17  ;;  %v1557_v20 = vmax.f32 %v1415_v28, 0.0  ;;  %v1560_v12 = vmax.f32 %v1416_v56, 0.0  ;;  %v1287_v24 = vadd.f32 %v6949_v9, %v6957_v36 }
 0x204   :  { %v1421_v10 = vcombine.low %v1281_v42, %v1283_v13  ;;  %v1422_v16 = vcombine.high %v1281_v42, %v1283_v13  ;;  %v1947_v38 = vmax.f32 %v1945_v34, %v1946_v4  ;;  %v1954_v35 = vrot.slane %v1953_v3, 2 }
 0x205   :  { %v1700_v50 = vcombine.low %v1554_v18, %v1557_v20  ;;  %v1701_v37 = vcombine.high %v1554_v18, %v1557_v20  ;;  %v1704_v55 = vcombine.high %v1560_v12, %v1560_v12  ;;  %v1990_v22 = vsel %vm1813_vm3, %v1560_v12, -inf }
 0x206   :  { %v1563_v11 = vmax.f32 %v1421_v10, 0.0  ;;  %v1566_v40 = vmax.f32 %v1422_v16, 0.0  ;;  %v1948_v25 = vrot.slane %v1947_v38, 1  ;;  %v1427_v17 = vcombine.low %v1285_v47, %v1287_v24 }
 0x207   :  { %v1991_v19 = vmax.f32 %v1700_v50, %v1990_v22  ;;  %v1998_v45 = vsel %vm1813_vm3, %v1704_v55, -inf  ;;  %v1428_v34 = vcombine.high %v1285_v47, %v1287_v24  ;;  %v1291_v42 = vadd.f32 %v6951_v51, %v6264_v26 }
 0x208   :  { %v1999_v48 = vmax.f32 %v1701_v37, %v1998_v45  ;;  %v1709_v39 = vcombine.low %v1563_v11, %v1566_v40  ;;  %v1710_v54 = vcombine.high %v1563_v11, %v1566_v40  ;;  %v1949_v28 = vmax.f32 %v1947_v38, %v1948_v25  ;;  %v6472_v40 = vpop.f32.mrf.mxu1 }
 0x209   :  { %v1992_v56 = vrot.slane %v1991_v19, 4  ;;  %v1569_v30 = vmax.f32 %v1427_v17, 0.0  ;;  %v1293_v13 = vadd.f32 %v6953_v8, %v6272_v57  ;;  %v6463_v4 = vmax.f32 %v1953_v3, %v1954_v35  ;;  %v6958_v17 = vld [vmem:[#allocation13_spill] sm:$0xff] }
 0x20a   :  { %v2000_v18 = vrot.slane %v1999_v48, 4  ;;  %v3399_v20 = vsel %vm3315_vm5, %v1949_v28, %v3398_v58  ;;  %v1572_v38 = vmax.f32 %v1428_v34, 0.0  ;;  %v1295_v58 = vadd.f32 %v6286_v2, %v5962_v59 }
 0x20b   :  { %v1993_v12 = vmax.f32 %v1991_v19, %v1992_v56  ;;  %v1713_v10 = vcombine.high %v1569_v30, %v1569_v30  ;;  %v2038_v49 = vsel %vm1813_vm3, %v1569_v30, -inf  ;;  %v1433_v36 = vcombine.low %v1291_v42, %v1293_v13 }
 0x20c   :  { %v2001_v16 = vmax.f32 %v1999_v48, %v2000_v18  ;;  %v1434_v47 = vcombine.high %v1291_v42, %v1293_v13  ;;  %v2039_v50 = vmax.f32 %v1709_v39, %v2038_v49  ;;  %v1297_v11 = vadd.f32 %v6297_v14, %v5964_v5  ;;  %v6959_v48 = vld [vmem:[#allocation16_spill] sm:$0xff] }
 0x20d   :  { %v1994_v24 = vrot.slane %v1993_v12, 2  ;;  %v2046_v37 = vsel %vm1813_vm3, %v1713_v10, -inf  ;;  %v1575_v22 = vmax.f32 %v1433_v36, 0.0  ;;  %v2652_v39 = vrot.slane %v6959_v48, %v6958_v17 }
 0x20e   :  { %v2002_v26 = vrot.slane %v2001_v16, 2  ;;  %v2047_v55 = vmax.f32 %v1710_v54, %v2046_v37  ;;  %v1578_v57 = vmax.f32 %v1434_v47, 0.0  ;;  %v2040_v35 = vrot.slane %v2039_v50, 4 }
 0x20f   :  { %v1995_v3 = vmax.f32 %v1993_v12, %v1994_v24  ;;  %v1718_v19 = vcombine.low %v1572_v38, %v1575_v22  ;;  %v1719_v45 = vcombine.high %v1572_v38, %v1575_v22  ;;  %v1439_v59 = vcombine.low %v1295_v58, %v1297_v11  ;;  %v2791_v12 = vpop.f32.mrf.mxu1 }
 0x210   :  { %v2048_v25 = vrot.slane %v2047_v55, 4  ;;  %v2041_v54 = vmax.f32 %v2039_v50, %v2040_v35  ;;  %v1722_v56 = vcombine.high %v1578_v57, %v1578_v57  ;;  %v2086_v34 = vsel %vm1813_vm3, %v1578_v57, -inf }
 0x211   :  { %v1996_v28 = vrot.slane %v1995_v3, 1  ;;  %v2003_v30 = vmax.f32 %v2001_v16, %v2002_v26  ;;  %v2087_v42 = vmax.f32 %v1718_v19, %v2086_v34  ;;  %v1440_v14 = vcombine.high %v1295_v58, %v1297_v11 }
 0x212   :  { %v2049_v18 = vmax.f32 %v2047_v55, %v2048_v25  ;;  %v2042_v13 = vrot.slane %v2041_v54, 2  ;;  %v2094_v5 = vsel %vm1813_vm3, %v1722_v56, -inf  ;;  %v6481_v10 = vmax.f32 %v6422_v15, %v2178_v41  ;;  %v2793_v15 = vpop.f32.mrf.mxu1 }
 0x213   :  { %v1997_v2 = vmax.f32 %v1995_v3, %v1996_v28  ;;  %v2088_v36 = vrot.slane %v2087_v42, 4  ;;  %v2095_v47 = vmax.f32 %v1719_v45, %v2094_v5  ;;  %v1581_v38 = vmax.f32 %v1439_v59, 0.0 }
 0x214   :  { %v2050_v49 = vrot.slane %v2049_v18, 2  ;;  %v2043_v16 = vmax.f32 %v2041_v54, %v2042_v13  ;;  %v1584_v50 = vmax.f32 %v1440_v14, 0.0  ;;  %v4566_v22 = vcombine.low %v2652_v39, %v2652_v39 }
 0x215   :  { %v6484_v24 = vsel %vm3317_vm6, %v1997_v2, %v3399_v20  ;;  %v2089_v26 = vmax.f32 %v2087_v42, %v2088_v36  ;;  %v2096_v55 = vrot.slane %v2095_v47, 4  ;;  %v1956_v57 = vrot.slane %v6463_v4, 1 }
 0x216   :  { %v2051_v37 = vmax.f32 %v2049_v18, %v2050_v49  ;;  %v2004_v3 = vrot.slane %v2003_v30, 1  ;;  %v1727_v35 = vcombine.low %v1581_v38, %v1584_v50  ;;  %v1728_v58 = vcombine.high %v1581_v38, %v1584_v50 }
 0x217   :  { %v2044_v41 = vrot.slane %v2043_v16, 1  ;;  %v2090_v11 = vrot.slane %v2089_v26, 2  ;;  %v2097_v25 = vmax.f32 %v2095_v47, %v2096_v55  ;;  %v2736_v19 = vrot.slane %v4566_v22, %v6958_v17 }
 0x218   :  { %v1301_v20 = vadd.f32 %v6947_v31, %v6303_v32  ;;  %v1303_v45 = vadd.f32 %v6949_v9, %v6318_v63  ;;  %v1305_v48 = vadd.f32 %v6951_v51, %v6333_v43  ;;  %v1307_v39 = vadd.f32 %v6953_v8, %v6346_v29  ;;  %v2795_v31 = vpop.f32.mrf.mxu1 }
 0x219   :  { %v6499_v28 = vmax.f32 %v6435_v0, %v2172_v1  ;;  %v2052_v54 = vrot.slane %v2051_v37, 1  ;;  %v2091_v56 = vmax.f32 %v2089_v26, %v2090_v11  ;;  %v2098_v34 = vrot.slane %v2097_v25, 2 }
 0x21a   :  { %v2744_v18 = vcombine.low %v2736_v19, %v2736_v19  ;;  %v2745_v42 = vcombine.high %v2736_v19, %v2736_v19  ;;  %v1445_v32 = vcombine.low %v1301_v20, %v1303_v45  ;;  %v1451_v59 = vcombine.low %v1305_v48, %v1307_v39  ;;  %v2832_v49 = vpop.f32.mrf.mxu1 }
 0x21b   :  { %v2180_v63 = vrot.slane %v6481_v10, 1  ;;  %v6503_v43 = vmax.f32 %v6463_v4, %v1956_v57  ;;  %v2099_v9 = vmax.f32 %v2097_v25, %v2098_v34  ;;  %v1446_v29 = vcombine.high %v1301_v20, %v1303_v45 }
 0x21c   :  { %v6505_v51 = vmax.f32 %v2003_v30, %v2004_v3  ;;  %v6507_v8 = vmax.f32 %v2043_v16, %v2044_v41  ;;  %v2792_v0 = vadd.f32 %v2791_v12, %v2745_v42  ;;  %v1587_v1 = vmax.f32 %v1445_v32, 0.0  ;;  %v2834_v25 = vpop.f32.mrf.mxu1 }
 0x21d   :  { %v6509_v2 = vmax.f32 %v2051_v37, %v2052_v54  ;;  %v2092_v13 = vrot.slane %v2091_v56, 1  ;;  %v2796_v5 = vadd.f32 %v2795_v31, %v2745_v42  ;;  %v1452_v14 = vcombine.high %v1305_v48, %v1307_v39 }
 0x21e   :  { %v2790_v36 = vadd.f32 %v6472_v40, %v2744_v18  ;;  %v1731_v47 = vcombine.high %v1587_v1, %v1587_v1  ;;  %v2134_v4 = vsel %vm1813_vm3, %v1587_v1, -inf  ;;  %v1593_v38 = vmax.f32 %v1451_v59, 0.0 }
 0x21f   :  { %v2100_v50 = vrot.slane %v2099_v9, 1  ;;  %v1590_v26 = vmax.f32 %v1446_v29, 0.0  ;;  %v2135_v30 = vmax.f32 %v1727_v35, %v2134_v4  ;;  %v2794_v55 = vadd.f32 %v2793_v15, %v2744_v18  ;;  %v6960_v15 = vld [vmem:[#allocation17_spill] sm:$0xff] }
 0x220   :  { %v2888_v16 = vcombine.low %v2790_v36, %v2792_v0  ;;  %v2889_v22 = vcombine.high %v2790_v36, %v2792_v0  ;;  %v2142_v12 = vsel %vm1813_vm3, %v1731_v47, -inf  ;;  %v1596_v37 = vmax.f32 %v1452_v14, 0.0  ;;  %v2836_v0 = vpop.f32.mrf.mxu1 }
 0x221   :  { %v2136_v57 = vrot.slane %v2135_v30, 4  ;;  %v2143_v3 = vmax.f32 %v1728_v58, %v2142_v12  ;;  %v2924_v41 = vcombine.low %v2794_v55, %v2796_v5  ;;  %v2925_v11 = vcombine.high %v2794_v55, %v2796_v5 }
 0x222   :  { %v1736_v19 = vcombine.low %v1590_v26, %v1593_v38  ;;  %v1737_v40 = vcombine.high %v1590_v26, %v1593_v38  ;;  %v1740_v20 = vcombine.high %v1596_v37, %v1596_v37  ;;  %v2182_v45 = vsel %vm1813_vm3, %v1596_v37, -inf }
 0x223   :  { %v6515_v48 = vmax.f32 %v2091_v56, %v2092_v13  ;;  %v2137_v39 = vmax.f32 %v2135_v30, %v2136_v57  ;;  %v2144_v35 = vrot.slane %v2143_v3, 4  ;;  %v2659_v54 = vrot.slane %v6960_v15, %v6958_v17 }
 0x224   :  { %v2101_v34 = vmax.f32 %v2099_v9, %v2100_v50  ;;  %v6520_v18 = vrot.slane %v2888_v16, %v6958_v17  ;;  %v2183_v58 = vmax.f32 %v1736_v19, %v2182_v45  ;;  %v2190_v42 = vsel %vm1813_vm3, %v1740_v20, -inf }
 0x225   :  { %v2138_v32 = vrot.slane %v2137_v39, 2  ;;  %v2145_v31 = vmax.f32 %v2143_v3, %v2144_v35  ;;  %v2191_v59 = vmax.f32 %v1737_v40, %v2190_v42  ;;  %v4567_v29 = vcombine.low %v2659_v54, %v2659_v54 }
 0x226   :  { %v2905_v56 = vrot.slane %v2889_v22, %v6958_v17  ;;  %v6525_v1 = vrot.slane %v2924_v41, %v6958_v17  ;;  %v6528_v13 = vrot.slane %v2925_v11, %v6958_v17  ;;  %v2184_v9 = vrot.slane %v2183_v58, 4  ;;  %v2838_v22 = vpop.f32.mrf.mxu1 }
 0x227   :  { %v2139_v5 = vmax.f32 %v2137_v39, %v2138_v32  ;;  %v2146_v14 = vrot.slane %v2145_v31, 2  ;;  %v2192_v36 = vrot.slane %v2191_v59, 4  ;;  %v2743_v47 = vrot.slane %v4567_v29, %v6958_v17 }
 0x228   :  { %v2185_v4 = vmax.f32 %v2183_v58, %v2184_v9  ;;  %v6961_v38 = vrot.slane %v6392_v33, 1  ;;  %v6537_v26 = vmax.f32 %v6481_v10, %v2180_v63  ;;  %v2164_v57 = vrot.slane %v6417_v7, 1 }
 0x229   :  { %v2147_v30 = vmax.f32 %v2145_v31, %v2146_v14  ;;  %v2193_v55 = vmax.f32 %v2191_v59, %v2192_v36  ;;  %v2746_v16 = vcombine.low %v2743_v47, %v2743_v47  ;;  %v2747_v37 = vcombine.high %v2743_v47, %v2743_v47 }
 0x22a   :  { %v6534_v50 = vmax.f32 %v6392_v33, %v6961_v38  ;;  %v2186_v12 = vrot.slane %v2185_v4, 2  ;;  %v3406_v3 = vsel %vm3315_vm5, %v6503_v43, %v6451_v6  ;;  %v2140_v41 = vrot.slane %v2139_v5, 1 }
 0x22b   :  { %v2194_v33 = vrot.slane %v2193_v55, 2  ;;  %v2833_v11 = vadd.f32 %v2832_v49, %v2746_v16  ;;  %v2837_v19 = vadd.f32 %v2836_v0, %v2746_v16  ;;  %v2835_v63 = vadd.f32 %v2834_v25, %v2747_v37 }
 0x22c   :  { %v2187_v10 = vmax.f32 %v2185_v4, %v2186_v12  ;;  %v2839_v40 = vadd.f32 %v2838_v22, %v2747_v37  ;;  %v2148_v20 = vrot.slane %v2147_v30, 1  ;;  %v6962_v45 = vrot.slane %v6369_v21, 1 }
 0x22d   :  { %v2195_v35 = vmax.f32 %v2193_v55, %v2194_v33  ;;  %v3407_v15 = vsel %vm3317_vm6, %v6505_v51, %v3406_v3  ;;  %v3401_v6 = vsel %vm3319_vm7, %v6507_v8, %v6484_v24  ;;  %v2890_v43 = vcombine.low %v2833_v11, %v2835_v63 }
 0x22e   :  { %v6546_v39 = vmax.f32 %v6369_v21, %v6962_v45  ;;  %v2891_v49 = vcombine.high %v2833_v11, %v2835_v63  ;;  %v2926_v54 = vcombine.low %v2837_v19, %v2839_v40  ;;  %v6554_v25 = vmax.f32 %v6417_v7, %v2164_v57 }
 0x22f   :  { %v6556_v58 = vmax.f32 %v2139_v5, %v2140_v41  ;;  %v2188_v42 = vrot.slane %v2187_v10, 1  ;;  %v2927_v21 = vcombine.high %v2837_v19, %v2839_v40  ;;  %v3408_v32 = vsel %vm3319_vm7, %v6509_v2, %v3407_v15 }
 0x230   :  { %6963 = vst [vmem:[#allocation27_spill] sm:$0xff] %v6554_v25  ;;  %v2912_v51 = vrot.slane %v2890_v43, %v6958_v17  ;;  %v2919_v31 = vrot.slane %v2891_v49, %v6958_v17  ;;  %v2948_v24 = vrot.slane %v2926_v54, %v6958_v17  ;;  %v6563_v8 = vmax.f32 %v2147_v30, %v2148_v20 }
 0x231   :  { %6964 = vst [vmem:[#allocation19_spill] sm:$0xff] %v6556_v58  ;;  %v6566_v59 = vrot.slane %v2927_v21, %v6958_v17  ;;  %v2196_v7 = vrot.slane %v2195_v35, 1  ;;  %v6569_v29 = vsel %vm3321_vm8, %v2101_v34, %v3408_v32  ;;  %v6573_v0 = vsel %vm3321_vm8, %v6515_v48, %v3401_v6 }
 0x232   :  { %6965 = vst [vmem:[#allocation30_spill] sm:$0xff] %v6563_v8  ;;  %6966 = vst [vmem:[#allocation20_spill] sm:$0xff] %v6569_v29  ;;  %v2920_v2 = vcombine.low %v6520_v18, %v2912_v51  ;;  %v2921_v9 = vcombine.high %v6520_v18, %v2912_v51  ;;  %v2922_v5 = vcombine.low %v2905_v56, %v2919_v31 }
 0x233   :  { %6967 = vst [vmem:[#allocation32_spill] sm:$0xff] %v6573_v0  ;;  %v2923_v14 = vcombine.high %v2905_v56, %v2919_v31  ;;  %v6577_v36 = vmax.f32 %v2187_v10, %v2188_v42  ;;  %v2956_v47 = vcombine.low %v6525_v1, %v2948_v24  ;;  %v2957_v4 = vcombine.high %v6525_v1, %v2948_v24 }
 0x234   :  { %v2958_v34 = vcombine.low %v6528_v13, %v6566_v59  ;;  %v6583_v38 = vmax.f32 %v2920_v2, 0.0  ;;  %v6585_v30 = vmax.f32 %v2921_v9, 0.0  ;;  %v6587_v48 = vmax.f32 %v2922_v5, 0.0 }
 0x235   :  { %6968 = vst [vmem:[#allocation21_spill] sm:$0xff] %v6577_v36  ;;  %v6589_v55 = vmax.f32 %v2923_v14, 0.0  ;;  %v2959_v18 = vcombine.high %v6528_v13, %v6566_v59  ;;  %v6593_v56 = vmax.f32 %v2956_v47, 0.0  ;;  %v6595_v16 = vmax.f32 %v2957_v4, 0.0 }
 0x236   :  { %v6597_v22 = vmax.f32 %v2195_v35, %v2196_v7  ;;  %v2990_v1 = vrot.slane %v6583_v38, %v6958_v17  ;;  %v2998_v12 = vrot.slane %v6585_v30, %v6958_v17  ;;  %v3006_v37 = vrot.slane %v6587_v48, %v6958_v17 }
 0x237   :  { %v3014_v57 = vrot.slane %v6589_v55, %v6958_v17  ;;  %v3193_v3 = vrot.slane %v6583_v38, 4  ;;  %v6610_v11 = vmax.f32 %v2958_v34, 0.0  ;;  %v6978_v59 = vrot.slane %v6585_v30, 4 }
 0x238   :  { %6969 = vst [vmem:[#allocation38_spill] sm:$0xff] %v6597_v22  ;;  %v2991_v19 = vcombine.high %v2990_v1, %v2990_v1  ;;  %v2999_v10 = vcombine.high %v2998_v12, %v2998_v12  ;;  %v3007_v63 = vcombine.high %v3006_v37, %v3006_v37  ;;  %v3065_v20 = vsel %vm3064_vm9, %v2990_v1, -inf }
 0x239   :  { %v3015_v40 = vcombine.high %v3014_v57, %v3014_v57  ;;  %v3079_v45 = vsel %vm3064_vm9, %v2998_v12, -inf  ;;  %v3093_v35 = vsel %vm3064_vm9, %v3006_v37, -inf  ;;  %v3107_v15 = vsel %vm3064_vm9, %v3014_v57, -inf }
 0x23a   :  { %v3066_v6 = vrot.slane %v3065_v20, 4  ;;  %v3072_v43 = vsel %vm3064_vm9, %v2991_v19, -inf  ;;  %v3080_v49 = vrot.slane %v3079_v45, 4  ;;  %v3086_v54 = vsel %vm3064_vm9, %v2999_v10, -inf }
 0x23b   :  { %v3073_v42 = vrot.slane %v3072_v43, 4  ;;  %v3087_v21 = vrot.slane %v3086_v54, 4  ;;  %v3094_v32 = vrot.slane %v3093_v35, 4  ;;  %v3100_v51 = vsel %vm3064_vm9, %v3007_v63, -inf }
 0x23c   :  { %v3067_v31 = vmax.f32 %v3065_v20, %v3066_v6  ;;  %v3081_v24 = vmax.f32 %v3079_v45, %v3080_v49  ;;  %v3101_v7 = vrot.slane %v3100_v51, 4  ;;  %v3108_v2 = vrot.slane %v3107_v15, 4 }
 0x23d   :  { %v3074_v9 = vmax.f32 %v3072_v43, %v3073_v42  ;;  %v3088_v5 = vmax.f32 %v3086_v54, %v3087_v21  ;;  %v3095_v14 = vmax.f32 %v3093_v35, %v3094_v32  ;;  %v3114_v47 = vsel %vm3064_vm9, %v3015_v40, -inf }
 0x23e   :  { %v3068_v4 = vrot.slane %v3067_v31, 2  ;;  %v3082_v34 = vrot.slane %v3081_v24, 2  ;;  %v3102_v1 = vmax.f32 %v3100_v51, %v3101_v7  ;;  %v3109_v12 = vmax.f32 %v3107_v15, %v3108_v2 }
 0x23f   :  { %v3075_v37 = vrot.slane %v3074_v9, 2  ;;  %v3089_v57 = vrot.slane %v3088_v5, 2  ;;  %v3096_v19 = vrot.slane %v3095_v14, 2  ;;  %v3115_v10 = vrot.slane %v3114_v47, 4 }
 0x240   :  { %v3069_v33 = vmax.f32 %v3067_v31, %v3068_v4  ;;  %v3083_v41 = vmax.f32 %v3081_v24, %v3082_v34  ;;  %v3103_v63 = vrot.slane %v3102_v1, 2  ;;  %v3110_v20 = vrot.slane %v3109_v12, 2 }
 0x241   :  { %v3076_v45 = vmax.f32 %v3074_v9, %v3075_v37  ;;  %v3090_v6 = vmax.f32 %v3088_v5, %v3089_v57  ;;  %v3097_v49 = vmax.f32 %v3095_v14, %v3096_v19  ;;  %v3116_v43 = vmax.f32 %v3114_v47, %v3115_v10  ;;  %v6973_v57 = vld [vmem:[#allocation23_spill] sm:$0xff]  ;;  %v6974_v10 = vld [vmem:[#allocation26_spill] sm:$0xff]  ;;  %v6989_v19 = vld [vmem:[#allocation25_spill] sm:$0xff] }
 0x242   :  { %v3070_v54 = vrot.slane %v3069_v33, 1  ;;  %v3084_v35 = vrot.slane %v3083_v41, 1  ;;  %v3104_v42 = vmax.f32 %v3102_v1, %v3103_v63  ;;  %v3111_v40 = vmax.f32 %v3109_v12, %v3110_v20  ;;  %v6972_v12 = vld [vmem:[#allocation22_spill] sm:$0xff]  ;;  %v6975_v20 = vld [vmem:[#allocation28_spill] sm:$0xff]  ;;  %v6986_v63 = vld [vmem:[#allocation35_spill] sm:$0xff] }
 0x243   :  { %v3077_v21 = vrot.slane %v3076_v45, 1  ;;  %v3091_v32 = vrot.slane %v3090_v6, 1  ;;  %v3098_v51 = vrot.slane %v3097_v49, 1  ;;  %v3117_v15 = vrot.slane %v3116_v43, 2 }
 0x244   :  { %v6620_v7 = vmax.f32 %v3069_v33, %v3070_v54  ;;  %v6622_v2 = vmax.f32 %v3083_v41, %v3084_v35  ;;  %v3105_v31 = vrot.slane %v3104_v42, 1  ;;  %v3112_v24 = vrot.slane %v3111_v40, 1 }
 0x245   :  { %v6624_v4 = vmax.f32 %v3076_v45, %v3077_v21  ;;  %v6626_v9 = vmax.f32 %v3090_v6, %v3091_v32  ;;  %v6628_v5 = vmax.f32 %v3097_v49, %v3098_v51  ;;  %v3118_v14 = vmax.f32 %v3116_v43, %v3117_v15  ;;  %v6977_v49 = vld [vmem:[#allocation14_spill] sm:$0xff]  ;;  %v6979_v43 = vld [vmem:[#allocation15_spill] sm:$0xff] }
 0x246   :  { %v6630_v47 = vmax.f32 %v3104_v42, %v3105_v31  ;;  %v6632_v34 = vmax.f32 %v3111_v40, %v3112_v24  ;;  %v3196_v1 = vrot.slane %v6589_v55, 4  ;;  %v6638_v41 = vmax.f32 %v2959_v18, 0.0  ;;  %v6988_v24 = vld [vmem:[#allocation24_spill] sm:$0xff] }
 0x247   :  { %6970 = vst [vmem:[#allocation39_spill] sm:$0xff] %v6628_v5  ;;  %v3119_v33 = vrot.slane %v3118_v14, 1  ;;  %v3204_v13 = vrot.slane %v3193_v3, %v6977_v49  ;;  %v3212_v18 = vrot.slane %v6978_v59, %v6977_v49  ;;  %v3208_v54 = vrot.slane %v3193_v3, %v6979_v43 }
 0x248   :  { %6971 = vst [vmem:[#allocation40_spill] sm:$0xff] %v6632_v34  ;;  %v6980_v35 = vmov %v6978_v59  ;;  %v6981_v40 = vrot.slane %v6587_v48, 4  ;;  %v3228_v38 = vrot.slane %v3196_v1, %v6977_v49  ;;  %v3232_v3 = vrot.slane %v3196_v1, %v6979_v43  ;;  %v6984_v59 = vld [vmem:[#allocation29_spill] sm:$0xff] }
 0x249   :  { %v3216_v42 = vrot.slane %v6980_v35, %v6979_v43  ;;  %v6668_v15 = vmax.f32 %v3118_v14, %v3119_v33  ;;  %v3283_v30 = vmax.f32 %v6984_v59, %v3212_v18  ;;  %v6985_v35 = vld [vmem:[#allocation31_spill] sm:$0xff]  ;;  %v3022_v33 = vrot.slane %v6593_v56, %v6958_v17 }
 0x24a   :  { %v3220_v21 = vrot.slane %v6981_v40, %v6977_v49  ;;  %v6982_v32 = vmov %v6981_v40  ;;  %v6987_v40 = vld [vmem:[#allocation36_spill] sm:$0xff]  ;;  %v3287_v48 = vmax.f32 %v6277_v62, %v3228_v38  ;;  %v3288_v14 = vmax.f32 %v6280_v52, %v3232_v3 }
 0x24b   :  { %v3224_v51 = vrot.slane %v6982_v32, %v6979_v43  ;;  %v3284_v6 = vmax.f32 %v6985_v35, %v3216_v42  ;;  %v3030_v32 = vrot.slane %v6595_v16, %v6958_v17  ;;  %v3281_v1 = vmax.f32 %v6988_v24, %v3204_v13 }
 0x24c   :  { %v3285_v37 = vmax.f32 %v6986_v63, %v3220_v21  ;;  %v3282_v18 = vmax.f32 %v6989_v19, %v3208_v54  ;;  %v3352_v59 = vrot.slane %v3283_v30, 7  ;;  %v3023_v21 = vcombine.high %v3022_v33, %v3022_v33 }
 0x24d   :  { %v3286_v45 = vmax.f32 %v6987_v40, %v3224_v51  ;;  %v3366_v35 = vrot.slane %v3284_v6, 7  ;;  %v3031_v51 = vcombine.high %v3030_v32, %v3030_v32  ;;  %v6688_v62 = vrot.slane %v3287_v48, 5 }
 0x24e   :  { %v3354_v42 = vrot.slane %v3285_v37, 6  ;;  %v6690_v52 = vrot.slane %v3288_v14, 5  ;;  %v3038_v38 = vrot.slane %v6610_v11, %v6958_v17  ;;  %v3046_v3 = vrot.slane %v6638_v41, %v6958_v17 }
 0x24f   :  { %v6686_v63 = vrot.slane %v3286_v45, 6  ;;  %v3353_v13 = vsel %vm3313_vm4, %v3352_v59, %v3281_v1  ;;  %v3121_v19 = vsel %vm3064_vm9, %v3022_v33, -inf  ;;  %v3128_v37 = vsel %vm3064_vm9, %v3023_v21, -inf }
 0x250   :  { %v3135_v45 = vsel %vm3064_vm9, %v3030_v32, -inf  ;;  %v3039_v6 = vcombine.high %v3038_v38, %v3038_v38  ;;  %v3047_v54 = vcombine.high %v3046_v3, %v3046_v3  ;;  %v3122_v24 = vrot.slane %v3121_v19, 4 }
 0x251   :  { %v3129_v30 = vrot.slane %v3128_v37, 4  ;;  %v3136_v40 = vrot.slane %v3135_v45, 4  ;;  %v3142_v48 = vsel %vm3064_vm9, %v3031_v51, -inf  ;;  %v3149_v14 = vsel %vm3064_vm9, %v3038_v38, -inf }
 0x252   :  { %v3163_v36 = vsel %vm3064_vm9, %v3046_v3, -inf  ;;  %v3123_v17 = vmax.f32 %v3121_v19, %v3122_v24  ;;  %v3143_v1 = vrot.slane %v3142_v48, 4  ;;  %v3150_v59 = vrot.slane %v3149_v14, 4 }
 0x253   :  { %v3130_v53 = vmax.f32 %v3128_v37, %v3129_v30  ;;  %v3137_v33 = vmax.f32 %v3135_v45, %v3136_v40  ;;  %v3156_v21 = vsel %vm3064_vm9, %v3039_v6, -inf  ;;  %v3164_v25 = vrot.slane %v3163_v36, 4 }
 0x254   :  { %v3170_v32 = vsel %vm3064_vm9, %v3047_v54, -inf  ;;  %v3124_v58 = vrot.slane %v3123_v17, 2  ;;  %v3144_v22 = vmax.f32 %v3142_v48, %v3143_v1  ;;  %v3151_v34 = vmax.f32 %v3149_v14, %v3150_v59 }
 0x255   :  { %v3131_v0 = vrot.slane %v3130_v53, 2  ;;  %v3138_v31 = vrot.slane %v3137_v33, 2  ;;  %v3157_v51 = vrot.slane %v3156_v21, 4  ;;  %v3165_v8 = vmax.f32 %v3163_v36, %v3164_v25 }
 0x256   :  { %v3171_v38 = vrot.slane %v3170_v32, 4  ;;  %v3125_v29 = vmax.f32 %v3123_v17, %v3124_v58  ;;  %v3145_v19 = vrot.slane %v3144_v22, 2  ;;  %v3152_v37 = vrot.slane %v3151_v34, 2 }
 0x257   :  { %v3132_v3 = vmax.f32 %v3130_v53, %v3131_v0  ;;  %v3367_v24 = vsel %vm3313_vm4, %v3366_v35, %v3282_v18  ;;  %v3139_v45 = vmax.f32 %v3137_v33, %v3138_v31  ;;  %v3158_v30 = vmax.f32 %v3156_v21, %v3157_v51 }
 0x258   :  { %v3166_v6 = vrot.slane %v3165_v8, 2  ;;  %v3355_v40 = vsel %vm3315_vm5, %v3354_v42, %v3353_v13  ;;  %v3126_v54 = vrot.slane %v3125_v29, 1  ;;  %v3153_v5 = vmax.f32 %v3151_v34, %v3152_v37 }
 0x259   :  { %v3172_v55 = vmax.f32 %v3170_v32, %v3171_v38  ;;  %v3133_v48 = vrot.slane %v3132_v3, 1  ;;  %v3140_v14 = vrot.slane %v3139_v45, 1  ;;  %v3197_v25 = vrot.slane %v6593_v56, 4 }
 0x25a   :  { %v6707_v1 = vmax.f32 %v3165_v8, %v3166_v6  ;;  %v3146_v58 = vmax.f32 %v3144_v22, %v3145_v19  ;;  %v3159_v53 = vrot.slane %v3158_v30, 2  ;;  %v3198_v0 = vrot.slane %v6595_v16, 4 }
 0x25b   :  { %v3199_v36 = vrot.slane %v6610_v11, 4  ;;  %v6712_v31 = vmax.f32 %v3125_v29, %v3126_v54  ;;  %v3154_v18 = vrot.slane %v3153_v5, 1  ;;  %v3200_v42 = vrot.slane %v6638_v41, 4 }
 0x25c   :  { %v3236_v34 = vrot.slane %v3197_v25, %v6977_v49  ;;  %v6716_v35 = vmax.f32 %v3139_v45, %v3140_v14  ;;  %v3168_v8 = vrot.slane %v6707_v1, 1  ;;  %v3240_v56 = vrot.slane %v3197_v25, %v6979_v43 }
 0x25d   :  { %v3244_v22 = vrot.slane %v3198_v0, %v6977_v49  ;;  %v3248_v16 = vrot.slane %v3198_v0, %v6979_v43  ;;  %v3252_v29 = vrot.slane %v3199_v36, %v6977_v49  ;;  %v3256_v11 = vrot.slane %v3199_v36, %v6979_v43 }
 0x25e   :  { %v3260_v41 = vrot.slane %v3200_v42, %v6977_v49  ;;  %v3264_v13 = vrot.slane %v3200_v42, %v6979_v43  ;;  %v3289_v17 = vmax.f32 %v6301_v44, %v3236_v34  ;;  %v3290_v59 = vmax.f32 %v6374_v27, %v3240_v56 }
 0x25f   :  { %v3291_v33 = vmax.f32 %v6390_v46, %v3244_v22  ;;  %v3292_v21 = vmax.f32 %v6399_v60, %v3248_v16  ;;  %v3293_v32 = vmax.f32 %v6414_v23, %v3252_v29  ;;  %v3294_v51 = vmax.f32 %v6534_v50, %v3256_v11  ;;  %v6990_v16 = vld [vmem:[#allocation34_spill] sm:$0xff] }
 0x260   :  { %v3369_v38 = vsel %vm3315_vm5, %v6686_v63, %v3367_v24  ;;  %v3358_v19 = vrot.slane %v3289_v17, 4  ;;  %v3372_v45 = vrot.slane %v3290_v59, 4  ;;  %v3296_v43 = vmax.f32 %v6537_v26, %v3264_v13  ;;  %v6992_v17 = vld [vmem:[#allocation44_spill] sm:$0xff] }
 0x261   :  { %v3360_v37 = vrot.slane %v3291_v33, 3  ;;  %v3362_v6 = vrot.slane %v3293_v32, 2  ;;  %v3371_v44 = vsel %vm3317_vm6, %v6690_v52, %v3369_v38  ;;  %v3374_v27 = vrot.slane %v3292_v21, 3 }
 0x262   :  { %v3376_v46 = vrot.slane %v3294_v51, 2  ;;  %v3373_v60 = vsel %vm3319_vm7, %v3372_v45, %v3371_v44  ;;  %v3378_v54 = vrot.slane %v3296_v43, 1  ;;  %v3295_v23 = vmax.f32 %v6499_v28, %v3260_v41  ;;  %v7003_v45 = vld [vmem:[#allocation30_spill] sm:$0xff] }
 0x263   :  { %v3357_v50 = vsel %vm3317_vm6, %v6688_v62, %v3355_v40  ;;  %v3375_v63 = vsel %vm3321_vm8, %v3374_v27, %v3373_v60  ;;  %v3134_v14 = vmax.f32 %v3132_v3, %v3133_v48  ;;  %v3147_v26 = vrot.slane %v3146_v58, 1  ;;  %v7008_v27 = vld [vmem:[#allocation32_spill] sm:$0xff] }
 0x264   :  { %v3359_v24 = vsel %vm3319_vm7, %v3358_v19, %v3357_v50  ;;  %v3377_v25 = vsel %vm3323_vm10, %v3376_v46, %v3375_v63  ;;  %v3364_v0 = vrot.slane %v3295_v23, 1  ;;  %v3160_v36 = vmax.f32 %v3158_v30, %v3159_v53  ;;  %v6991_v53 = vld [vmem:[#allocation41_spill] sm:$0xff]  ;;  %v7009_v46 = vld [vmem:[#allocation19_spill] sm:$0xff] }
 0x265   :  { %v3361_v52 = vsel %vm3321_vm8, %v3360_v37, %v3359_v24  ;;  %v3379_v42 = vsel %vm3325_vm11, %v3378_v54, %v3377_v25  ;;  %v3148_v28 = vmax.f32 %v3146_v58, %v3147_v26  ;;  %v3173_v56 = vrot.slane %v3172_v55, 2  ;;  %v6999_v19 = vld [vmem:[#allocation33_spill] sm:$0xff]  ;;  %v7002_v37 = vld [vmem:[#allocation20_spill] sm:$0xff]  ;;  %v7010_v54 = vld [vmem:[#allocation27_spill] sm:$0xff] }
 0x266   :  { %v3363_v34 = vsel %vm3323_vm10, %v3362_v6, %v3361_v52  ;;  %v3417_v22 = vpack.c.bf16 %v3379_v42, %v3379_v42  ;;  %v3161_v40 = vrot.slane %v3160_v36, 1  ;;  %v3182_v3 = vmax.f32 %v6990_v16, %v6630_v47  ;;  %v7011_v63 = vld [vmem:[#allocation45_spill] sm:$0xff]  ;;  %v7012_v26 = vld [vmem:[#allocation18_spill] sm:$0xff] }
 0x267   :  { %v3365_v62 = vsel %vm3325_vm11, %v3364_v0, %v3363_v34  ;;  %v3155_v48 = vmax.f32 %v3153_v5, %v3154_v18  ;;  %v3174_v11 = vmax.f32 %v3172_v55, %v3173_v56  ;;  %v3186_v41 = vmax.f32 %v6312_v61, %v3134_v14  ;;  %v6995_v5 = vld [vmem:[#allocation42_spill] sm:$0xff]  ;;  %v7013_v0 = vld [vmem:[#allocation21_spill] sm:$0xff] }
 0x268   :  { %v3416_v29 = vpack.c.bf16 %v3365_v62, %v3365_v62  ;;  %4081 = vmatprep.mubr.bf16.mxu0 %v3417_v22  ;;  %v3162_v30 = vmax.f32 %v3160_v36, %v3161_v40  ;;  %v3184_v13 = vmax.f32 %v6991_v53, %v6668_v15  ;;  %v3188_v58 = vmax.f32 %v6992_v17, %v3148_v28  ;;  %v4978_v56 = vld [vmem:[#allocation5 + $0x270] ss:$8 sps:$4 sm:$0xff]   ;;  %v4983_v40 = vld [vmem:[#allocation5 + $0x264] ss:$8 sps:$4 sm:$0xff]   ;;  %v4993_v17 = vld [vmem:[#allocation5 + $0x220] ss:$8 sps:$4 sm:$0xff]  }
 0x269   :  { %v6993_v59 = vmax.f32 %v6973_v57, %v6624_v4  ;;  %v6994_v33 = vmax.f32 %v6975_v20, %v6626_v9  ;;  %v3185_v55 = vmax.f32 %v6995_v5, %v6712_v31  ;;  %v3175_v61 = vrot.slane %v3174_v11, 1  ;;  %v6996_v4 = vld [vmem:[#allocation43_spill] sm:$0xff]  ;;  %v4990_v53 = vld [vmem:[#allocation5 + $0x230] ss:$8 sps:$4 sm:$0xff]   ;;  %v5004_v5 = vld [vmem:[#allocation5 + $0x2f4] ss:$8 sps:$4 sm:$0xff]  }
 0x26a   :  { %4082 = vmatmul.mubr.bf16.vlgmr.msra.gmra.mxu0 %v3416_v29  ;;  %v3169_v21 = vmax.f32 %v6707_v1, %v3168_v8  ;;  %v3190_v15 = vmax.f32 %v6546_v39, %v3162_v30  ;;  %v3187_v57 = vmax.f32 %v6996_v4, %v6716_v35  ;;  %v6997_v9 = vmax.f32 %v6972_v12, %v6620_v7  ;;  %v7000_v1 = vld [vmem:[#allocation39_spill] sm:$0xff]  ;;  %v7004_v7 = vld [vmem:[#allocation37_spill] sm:$0xff]  ;;  %v7005_v12 = vld [vmem:[#allocation40_spill] sm:$0xff] }
 0x26b   :  { %v3327_v47 = vsel %vm3313_vm4, %v6994_v33, %v6993_v59  ;;  %v6998_v20 = vmax.f32 %v6974_v10, %v6622_v2  ;;  %v3176_v51 = vmax.f32 %v3174_v11, %v3175_v61  ;;  %v7001_v8 = vmax.f32 %v6999_v19, %v7000_v1  ;;  %v7007_v10 = vld [vmem:[#allocation38_spill] sm:$0xff]  ;;  %v4989_v11 = vld [vmem:[#allocation5 + $0x244] ss:$8 sps:$4 sm:$0xff]   ;;  %v5011_v4 = vld [vmem:[#allocation5 + $0x2c0] ss:$8 sps:$4 sm:$0xff]  }
 0x26c   :  { %v3328_v18 = vsel %vm3315_vm5, %v3182_v3, %v3327_v47  ;;  %v3410_v35 = vsel %vm3323_vm10, %v7003_v45, %v7002_v37  ;;  %v7006_v6 = vmax.f32 %v7004_v7, %v7005_v12  ;;  %v3403_v60 = vsel %vm3323_vm10, %v7009_v46, %v7008_v27  ;;  %v4981_v3 = vld [vmem:[#allocation5 + $0x260] ss:$8 sps:$4 sm:$0xff]   ;;  %v4984_v29 = vld [vmem:[#allocation5 + $0x250] ss:$8 sps:$4 sm:$0xff]   ;;  %v4992_v30 = vld [vmem:[#allocation5 + $0x234] ss:$8 sps:$4 sm:$0xff]  }
 0x26d   :  { %v3329_v32 = vsel %vm3317_vm6, %v3184_v13, %v3328_v18  ;;  %v3314_v31 = vsel %vm3313_vm4, %v6998_v20, %v6997_v9  ;;  %v3411_v44 = vsel %vm3325_vm11, %v7007_v10, %v3410_v35  ;;  %v3192_v23 = vmax.f32 %v7010_v54, %v3176_v51  ;;  %v4995_v13 = vld [vmem:[#allocation5 + $0x224] ss:$8 sps:$4 sm:$0xff]   ;;  %v4996_v59 = vld [vmem:[#allocation5 + $0x210] ss:$8 sps:$4 sm:$0xff]   ;;  %v4999_v47 = vld [vmem:[#allocation5 + $0x200] ss:$8 sps:$4 sm:$0xff]  }
 0x26e   :  { %v3330_v38 = vsel %vm3319_vm7, %v3186_v41, %v3329_v32  ;;  %v3316_v39 = vsel %vm3315_vm5, %v7001_v8, %v3314_v31  ;;  %v3189_v24 = vmax.f32 %v7011_v63, %v3155_v48  ;;  %v3191_v25 = vmax.f32 %v7012_v26, %v3169_v21  ;;  %v4986_v48 = vld [vmem:[#allocation5 + $0x254] ss:$8 sps:$4 sm:$0xff]   ;;  %v4987_v41 = vld [vmem:[#allocation5 + $0x240] ss:$8 sps:$4 sm:$0xff]   ;;  %v5001_v33 = vld [vmem:[#allocation5 + $0x204] ss:$8 sps:$4 sm:$0xff]  }
 0x26f   :  { %v3331_v43 = vsel %vm3321_vm8, %v3188_v58, %v3330_v38  ;;  %v3318_v2 = vsel %vm3317_vm6, %v7006_v6, %v3316_v39  ;;  %v6802_v36 = vsel %vm3325_vm11, %v7013_v0, %v3403_v60  ;;  %v3419_v16 = vpack.c.bf16 %v3411_v44, %v3411_v44  ;;  %v4998_v58 = vld [vmem:[#allocation5 + $0x214] ss:$8 sps:$4 sm:$0xff]   ;;  %v5007_v61 = vld [vmem:[#allocation5 + $0x2e4] ss:$8 sps:$4 sm:$0xff]   ;;  %v5005_v18 = vld [vmem:[#allocation5 + $0x2e0] ss:$8 sps:$4 sm:$0xff]  }
 0x270   :  { %v3332_v50 = vsel %vm3323_vm10, %v3190_v15, %v3331_v43  ;;  %v3320_v14 = vsel %vm3319_vm7, %v3185_v55, %v3318_v2  ;;  %v5002_v55 = vld [vmem:[#allocation5 + $0x2f0] ss:$8 sps:$4 sm:$0xff]   ;;  %v5010_v21 = vld [vmem:[#allocation5 + $0x2d4] ss:$8 sps:$4 sm:$0xff]   ;;  %v5013_v32 = vld [vmem:[#allocation5 + $0x2c4] ss:$8 sps:$4 sm:$0xff]   ;;  %v3418_v8 = vpack.c.bf16 %v6802_v36, %v6802_v36 }
 0x271   :  { %v3322_v52 = vsel %vm3321_vm8, %v3187_v57, %v3320_v14  ;;  %v3333_v42 = vsel %vm3325_vm11, %v3192_v23, %v3332_v50  ;;  %v5008_v15 = vld [vmem:[#allocation5 + $0x2d0] ss:$8 sps:$4 sm:$0xff]   ;;  %v5016_v57 = vld [vmem:[#allocation5 + $0x2b4] ss:$8 sps:$4 sm:$0xff]   ;;  %v5019_v20 = vld [vmem:[#allocation5 + $0x2a4] ss:$8 sps:$4 sm:$0xff]  }
 0x272   :  { %v3324_v34 = vsel %vm3323_vm10, %v3189_v24, %v3322_v52  ;;  %v3415_v28 = vpack.c.bf16 %v3333_v42, %v3333_v42  ;;  %v5014_v9 = vld [vmem:[#allocation5 + $0x2b0] ss:$8 sps:$4 sm:$0xff]   ;;  %v5017_v31 = vld [vmem:[#allocation5 + $0x2a0] ss:$8 sps:$4 sm:$0xff]   ;;  %v5022_v51 = vld [vmem:[#allocation5 + $0x294] ss:$8 sps:$4 sm:$0xff]  }
 0x273   :  { %v3326_v22 = vsel %vm3325_vm11, %v3191_v25, %v3324_v34  ;;  %v5020_v38 = vld [vmem:[#allocation5 + $0x290] ss:$8 sps:$4 sm:$0xff]   ;;  %v5025_v19 = vld [vmem:[#allocation5 + $0x284] ss:$8 sps:$4 sm:$0xff]   ;;  %v5023_v1 = vld [vmem:[#allocation5 + $0x280] ss:$8 sps:$4 sm:$0xff]  }
 0x274   :  { %v3414_v62 = vpack.c.bf16 %v3326_v22, %v3326_v22  ;;  %4040 = vmatprep.mubr.bf16.mxu1 %v3415_v28  ;;  %v5026_v39 = vld [vmem:[%s6877_s5 + $0x78] sm:$0xff]   ;;  %v5028_v45 = vld [vmem:[%s6877_s5 + $0x70] sm:$0xff]   ;;  %v5030_v43 = vld [vmem:[%s6877_s5 + $0x68] sm:$0xff]   ;;  %v5199_v50 = vmov 0.0  }
 0x275   :  { %v5027_v37 = vld [vmem:[%s6877_s5 + $0x38] sm:$0xff]   ;;  %4693 = vmatprep.subr.bf16.mxu0 %v5026_v39  ;;  %v5029_v35 = vld [vmem:[%s6877_s5 + $0x30] sm:$0xff]   ;;  %v5031_v7 = vld [vmem:[%s6877_s5 + $0x28] sm:$0xff]  }
 0x276   :  { %4041 = vmatmul.mubr.bf16.vlgmr.msra.gmra.mxu1 %v3414_v62  ;;  %4694 = vmatpush3.bf16.msra.mxu0 %v5027_v37  ;;  %v5032_v12 = vld [vmem:[%s6877_s5 + $0x60] sm:$0xff]   ;;  %v5034_v2 = vld [vmem:[%s6877_s5 + $0x58] sm:$0xff]   ;;  %v5036_v44 = vld [vmem:[%s6877_s5 + $0x50] sm:$0xff]  }
 0x277   :  { %4091 = vmatpush1.bf16.msra.mxu1 %v4978_v56  ;;  %4122 = vmatprep.mubr.bf16.mxu1 %v3419_v16  ;;  %v5033_v6 = vld [vmem:[%s6877_s5 + $0x20] sm:$0xff]   ;;  %v5035_v10 = vld [vmem:[%s6877_s5 + $0x18] sm:$0xff]   ;;  %v5037_v27 = vld [vmem:[%s6877_s5 + $0x10] sm:$0xff]  }
 0x278   :  { %4092 = vmatprep.subr.bf16.mxu1 %v4983_v40  ;;  %4695 = vmatprep.subr.bf16.mxu0 %v5028_v45  ;;  %v5038_v46 = vld [vmem:[%s6877_s5 + $0x48] sm:$0xff]   ;;  %v5040_v54 = vld [vmem:[%s6877_s5 + $0x40] sm:$0xff]  }
 0x279   :  { %v5039_v60 = vld [vmem:[%s6877_s5 + $0x8] sm:$0xff]   ;;  %v5041_v23 = vld [vmem:[%s6877_s5] sm:$0xff]  }
 0x27a   :  { %4696 = vmatpush3.bf16.msra.mxu0 %v5029_v35  ;;  %v3516_v42 = vld [vmem:[%s6876_s4] sm:$0x3]  ;;  %v7014_v28 = vld [vmem:[#allocation12_spill] sm:$0xff] }
 0x27b   :  { %4093 = vmatpush1.bf16.msra.mxu1 %v4981_v3  ;;  %4697 = vmatprep.subr.bf16.mxu0 %v5030_v43  ;;  %v3521_v34 = vrot.slane %v3516_v42, %v6977_v49  ;;  %v7015_v56 = vsub.s32 1, %v7014_v28  ;;  %v5043_v49 = vld [vmem:[#allocation7 + $0x30] sm:$0xff]  }
 0x27c   :  { %4094 = vmatprep.subr.bf16.mxu1 %v4986_v48 }
 0x27d   :  { %v3525_v22 = vrot.slane %v3516_v42, %v7015_v56 }
 0x27e   :  { %4698 = vmatpush3.bf16.msra.mxu0 %v5031_v7 }
 0x27f   :  { %4095 = vmatpush1.bf16.msra.mxu1 %v4984_v29  ;;  %4699 = vmatprep.subr.bf16.mxu0 %v5032_v12 }
 0x280   :  { %4096 = vmatprep.subr.bf16.mxu1 %v4989_v11 }
 0x282   :  { %4700 = vmatpush3.bf16.msra.mxu0 %v5033_v6 }
 0x283   :  { %4097 = vmatpush1.bf16.msra.mxu1 %v4987_v41  ;;  %4701 = vmatprep.subr.bf16.mxu0 %v5034_v2 }
 0x284   :  { %4098 = vmatprep.subr.bf16.mxu1 %v4992_v30 }
 0x286   :  { %4702 = vmatpush3.bf16.msra.mxu0 %v5035_v10 }
 0x287   :  { %4099 = vmatpush1.bf16.msra.mxu1 %v4990_v53  ;;  %4703 = vmatprep.subr.bf16.mxu0 %v5036_v44 }
 0x288   :  { %4100 = vmatprep.subr.bf16.mxu1 %v4995_v13 }
 0x28a   :  { %4704 = vmatpush3.bf16.msra.mxu0 %v5037_v27 }
 0x28b   :  { %4101 = vmatpush1.bf16.msra.mxu1 %v4993_v17  ;;  %4705 = vmatprep.subr.bf16.mxu0 %v5038_v46 }
 0x28c   :  { %4102 = vmatprep.subr.bf16.mxu1 %v4998_v58 }
 0x28e   :  { %4706 = vmatpush3.bf16.msra.mxu0 %v5039_v60 }
 0x28f   :  { %4103 = vmatpush1.bf16.msra.mxu1 %v4996_v59  ;;  %4707 = vmatprep.subr.bf16.mxu0 %v5040_v54  ;;  %v5042_v59 = vld [vmem:[#allocation7 + $0x38] sm:$0xff]  }
 0x290   :  { %4104 = vmatprep.subr.bf16.mxu1 %v5001_v33 }
 0x292   :  { %4708 = vmatpush3.bf16.msra.mxu0 %v5041_v23 }
 0x293   :  { %4105 = vmatpush1.bf16.msra.mxu1 %v4999_v47  ;;  %4724 = vmatprep.subr.bf16.mxu0 %v5199_v50  ;;  %v5044_v47 = vld [vmem:[#allocation7 + $0x28] sm:$0xff]  }
 0x294   :  { %4106 = vmatprep.subr.bf16.mxu1 %v5004_v5  ;;  %v5045_v5 = vld [vmem:[#allocation7 + $0x20] sm:$0xff]  }
 0x297   :  { %4107 = vmatpush2.bf16.msra.mxu1 %v5002_v55  ;;  %v5046_v55 = vld [vmem:[#allocation7 + $0x18] sm:$0xff]  }
 0x298   :  { %4108 = vmatprep.subr.bf16.mxu1 %v5007_v61  ;;  %v5047_v61 = vld [vmem:[#allocation7 + $0x10] sm:$0xff]  }
 0x29b   :  { %4109 = vmatpush2.bf16.msra.mxu1 %v5005_v18  ;;  %v5048_v18 = vld [vmem:[#allocation7 + $0x8] sm:$0xff]  }
 0x29c   :  { %4110 = vmatprep.subr.bf16.mxu1 %v5010_v21  ;;  %v5049_v21 = vld [vmem:[#allocation7] sm:$0xff]  }
 0x29f   :  { %4111 = vmatpush2.bf16.msra.mxu1 %v5008_v15 }
 0x2a0   :  { %4112 = vmatprep.subr.bf16.mxu1 %v5013_v32  ;;  %v4667_v32 = vld [vmem:[%s6878_s6] ss:$0 sm:$0xff]  ;;  %s5160_s6 = scalar_lea.vmem %s4431_s1, 128 }
 0x2a1   :  { %p5161_p1 = scmp.ne.s32.totalorder %s4431_s1, %s5160_s6  ;;  %p5166_p3 = scmp.lt.s32.totalorder %s5160_s6, %s5160_s6 }
 0x2a3   :  { %4113 = vmatpush2.bf16.msra.mxu1 %v5011_v4  ;;  %p5167_p4 = por %p5166_p3, %p5165_p2 }
 0x2a4   :  { %4114 = vmatprep.subr.bf16.mxu1 %v5016_v57 }
 0x2a5   :  { %p5168_p5 = pnand %p5167_p4, %p5161_p1 }
 0x2a7   :  { %4115 = vmatpush2.bf16.msra.mxu1 %v5014_v9 }
 0x2a8   :  { %4116 = vmatprep.subr.bf16.mxu1 %v5019_v20 }
 0x2ab   :  { %4117 = vmatpush2.bf16.msra.mxu1 %v5017_v31 }
 0x2ac   :  { %4118 = vmatprep.subr.bf16.mxu1 %v5022_v51 }
 0x2af   :  { %4119 = vmatpush2.bf16.msra.mxu1 %v5020_v38 }
 0x2b0   :  { %4120 = vmatprep.subr.bf16.mxu1 %v5025_v19  ;;  %v4684_v19 = vld [vmem:[%s6880_s8] ss:$0 sm:$0xff] }
 0x2b3   :  { %4121 = vmatpush2.bf16.msra.mxu1 %v5023_v1 }
 0x2b6   :  { %4123 = vmatmul.mubr.bf16.vlgmr.msra.gmra.mxu1 %v3418_v8 }
 0x32a   :  { %v4083_v63 = vpop.f32.mrf.mxu0 }
 0x32c   :  { %v4085_v24 = vpop.f32.mrf.mxu0 }
 0x32e   :  { %v4087_v14 = vpop.f32.mrf.mxu0 }
 0x330   :  { %v4088_v26 = vpop.f32.mrf.mxu0 }
 0x336   :  { %v4042_v25 = vpop.f32.mrf.mxu1 }
 0x337   :  { %v4043_v62 = vadd.f32 %v4042_v25, %v3521_v34 }
 0x338   :  { %v4044_v52 = vpop.f32.mrf.mxu1 }
 0x339   :  { %v4045_v40 = vadd.f32 %v4044_v52, %v3525_v22  ;;  %v4084_v16 = vadd.f32 %v4083_v63, %v4043_v62 }
 0x33a   :  { %v4046_v0 = vpop.f32.mrf.mxu1 }
 0x33b   :  { %v4086_v29 = vadd.f32 %v4085_v24, %v4045_v40 }
 0x33c   :  { %v4047_v36 = vpop.f32.mrf.mxu1 }
 0x376   :  { %v4124_v3 = vpop.f32.mrf.mxu1 }
 0x377   :  { %v4125_v48 = vadd.f32 %v4124_v3, %v4084_v16 }
 0x378   :  { %v4126_v11 = vpop.f32.mrf.mxu1 }
 0x379   :  { %v4127_v41 = vadd.f32 %v4126_v11, %v4086_v29  ;;  %v4131_v30 = vmax.f32 %v4125_v48, 0.0 }
 0x37a   :  { %v4128_v53 = vpop.f32.mrf.mxu1 }
 0x37b   :  { %v4132_v13 = vmax.f32 %v4127_v41, 0.0  ;;  %v4133_v33 = vpack.c.bf16 %v4131_v30, %v4131_v30 }
 0x37c   :  { %v4129_v17 = vpop.f32.mrf.mxu1 }
 0x37d   :  { %v4134_v58 = vpack.c.bf16 %v4132_v13, %v4132_v13 }
 0x37f   :  { %4302 = vmatprep.mubr.bf16.mxu0 %v4134_v58 }
 0x380   :  { %4303 = vmatmul.mubr.bf16.vlgmr.msra.gmra.mxu0 %v4133_v33 }
 0x381   :  { %4725 = vmatpush3.bf16.msra.mxu0 %v5042_v59  ;;  %4740 = vmatprep.mubr.msk.bf16.mxu0 %vm5200_vm12, %v5199_v50 }
 0x382   :  { %4726 = vmatprep.subr.bf16.mxu0 %v5199_v50 }
 0x385   :  { %4727 = vmatpush3.bf16.msra.mxu0 %v5043_v49 }
 0x386   :  { %4728 = vmatprep.subr.bf16.mxu0 %v5199_v50 }
 0x389   :  { %4729 = vmatpush3.bf16.msra.mxu0 %v5044_v47 }
 0x38a   :  { %4730 = vmatprep.subr.bf16.mxu0 %v5199_v50 }
 0x38d   :  { %4731 = vmatpush3.bf16.msra.mxu0 %v5045_v5 }
 0x38e   :  { %4732 = vmatprep.subr.bf16.mxu0 %v5199_v50 }
 0x391   :  { %4733 = vmatpush3.bf16.msra.mxu0 %v5046_v55 }
 0x392   :  { %4734 = vmatprep.subr.bf16.mxu0 %v5199_v50 }
 0x395   :  { %4735 = vmatpush3.bf16.msra.mxu0 %v5047_v61 }
 0x396   :  { %4736 = vmatprep.subr.bf16.mxu0 %v5199_v50 }
 0x399   :  { %4737 = vmatpush3.bf16.msra.mxu0 %v5048_v18 }
 0x39a   :  { %4738 = vmatprep.subr.bf16.mxu0 %v5199_v50 }
 0x39d   :  { %4739 = vmatpush3.bf16.msra.mxu0 %v5049_v21 }
 0x440   :  { %v4709_v15 = vpop.f32.mrf.mxu0 }
 0x442   :  { %v4710_v4 = vpop.f32.mrf.mxu0 }
 0x443   :  { %v4711_v57 = vadd.f32 %v4710_v4, %v4709_v15 }
 0x444   :  { %v4712_v9 = vpop.f32.mrf.mxu0 }
 0x445   :  { %v4305_v20 = vadd.f32 %v4711_v57, %v4667_v32 }
 0x446   :  { %v4713_v31 = vpop.f32.mrf.mxu0 }
 0x447   :  { %v4310_v51 = vmax.f32 %v4305_v20, 0.0 }
 0x449   :  { %v4311_v38 = vpack.c.bf16 %v4310_v51, %v4310_v51 }
 0x44b   :  { %4741 = vmatmul.mubr.bf16.vlgmr.msra.gmra.mxu0 %v4311_v38 }
 0x50b   :  { %v4417_v1 = vpop.f32.mrf.mxu0 }
 0x50c   :  { %v4418_v8 = vadd.f32 %v4684_v19, %v4417_v1 }
 0x50d   :  { %v4742_v39 = vpop.f32.mrf.mxu0 }
 0x50e   :  { %4423 = vst [vmem:[#allocation8] sm:$0xff] %v4418_v8 }
 0x50f   :  { %v4420_v37 = vpop.f32.mrf.mxu0 }
 0x510   :  { %5171 = shalt.err (!%p5168_p5)
}
 0x511   :  { %4433 = dma.vmem_to_hbm [thread:$0]  %s4431_s1, 128, %s6881_s9, [#allocation4]   ;;  %v4743_v45 = vpop.f32.mrf.mxu0 }
 0x512   :  { %5184 = dma.done.wait [#allocation4], 128  }
 0x513   :  { %5185 = vsyncadd [#allocation4], 4294967168 }
 0x514   :  { %4437 = vsyncpa [#allocation3], 1 }
 0x515   :  { %4438 = vsyncpa [#allocation6], 1 }
 0x516   :  { %4439 = vsyncpa [#allocation4], 1 }

</bundles_post_ra>
